<compile_context>
chip_gen: v7x
topology: tpu7x:2x2x1
jax: 0.10.0
libtpu: 0.0.40
codegen_flags: <defaults>
</compile_context>

<pallas_src>
import functools

import jax
import jax.numpy as jnp
from jax.experimental import pallas as pl
from jax.experimental.pallas import tpu as pltpu


def _round_up(x, m):
    return (x + m - 1) // m * m


# ---------------------------------------------------------------------------
# Generic tiled linear kernel: out = (relu?)(x) @ W + b
# Used for (a) the hoisted layer-1 input projection (bf16 output) and (b) the
# ReLU+classifier head. Row tiles 512 (or the full padded extent when smaller);
# column tiles lane-dense (multiples of 128).
# ---------------------------------------------------------------------------
def _linear_kernel(x_ref, w_ref, b_ref, o_ref, *, apply_relu):
    x = x_ref[...]
    if apply_relu:
        x = jnp.maximum(x, 0.0)
    acc = jnp.dot(x.astype(jnp.bfloat16), w_ref[...],
                  preferred_element_type=jnp.float32) + b_ref[...]
    o_ref[...] = acc.astype(o_ref.dtype)


def linear2d_pallas(x2d, w, b, *, apply_relu=False, out_dtype=jnp.float32):
    """x2d: (N, K); w: (K, M) bf16; b: (1, M) f32 -> (N, M) out_dtype."""
    N, K = x2d.shape
    M = w.shape[1]

    # Larger row tiles (512) cut classifier-weight re-streaming on the
    # HBM-bandwidth-bound head; tn is either 512 or the full padded row extent.
    tn = min(512, _round_up(N, 8))
    n_pad = _round_up(N, tn)
    if M % 128 == 0 and M <= 512:
        tv = M
    elif M % 512 == 0:
        tv = 512
    elif M % 256 == 0:
        tv = 256
    elif M % 128 == 0:
        tv = 128
    else:
        tv = min(512, _round_up(M, 128))
    m_pad = _round_up(M, tv)

    if n_pad != N:
        x2d = jnp.pad(x2d, ((0, n_pad - N), (0, 0)))
    if m_pad != M:
        w = jnp.pad(w, ((0, 0), (0, m_pad - M)))
        b = jnp.pad(b, ((0, 0), (0, m_pad - M)))

    # TODO(synk): add a K grid axis + VMEM accumulator (P3) if K grows past
    #             ~1-2K so operand blocks stay within the v7x VMEM budget.
    out = pl.pallas_call(
        functools.partial(_linear_kernel, apply_relu=apply_relu),
        out_shape=jax.ShapeDtypeStruct((n_pad, m_pad), out_dtype),
        grid_spec=pltpu.PrefetchScalarGridSpec(
            num_scalar_prefetch=0,
            grid=(n_pad // tn, m_pad // tv),
            in_specs=[
                pl.BlockSpec((tn, K), lambda i, j: (i, 0)),
                pl.BlockSpec((K, tv), lambda i, j: (0, j)),
                pl.BlockSpec((1, tv), lambda i, j: (0, j)),
            ],
            out_specs=pl.BlockSpec((tn, tv), lambda i, j: (i, j)),
        ),
        compiler_params=pltpu.CompilerParams(
            dimension_semantics=("parallel", "parallel"),
            vmem_limit_bytes=32 * 1024 * 1024),
        cost_estimate=pl.CostEstimate(
            flops=2 * n_pad * K * m_pad,
            transcendentals=0,
            bytes_accessed=x2d.dtype.itemsize * n_pad * K + 2 * K * m_pad
            + 4 * m_pad + jnp.dtype(out_dtype).itemsize * n_pad * m_pad),
    )(x2d, w, b)
    return out[:N, :M]


# ---------------------------------------------------------------------------
# Fused 2-layer LSTM recurrence, chunked over time.
#   gx1   : (T_pad, B_pad, 4H) bf16 -- precomputed x @ W_ih1 + (b_ih1 + b_hh1)
#   w_hh1 : (H, 4H) bf16
#   w_ih2 : (H, 4H) bf16
#   w_hh2 : (H, 4H) bf16
#   b2    : (1, 4H) f32            -- b_ih2 + b_hh2
# Output (T_pad, B_pad, H) f32, streamed per (TT, BB, H) chunk.
# ---------------------------------------------------------------------------
def _lstm2_kernel(gx1_ref, whh1_ref, wih2_ref, whh2_ref, b2_ref, out_ref,
                  h1_sc, c1_sc, h2_sc, c2_sc, *, tt):
    tc = pl.program_id(1)
    H = c1_sc.shape[-1]

    @pl.when(tc == 0)
    def _():
        h1_sc[...] = jnp.zeros_like(h1_sc)
        c1_sc[...] = jnp.zeros_like(c1_sc)
        h2_sc[...] = jnp.zeros_like(h2_sc)
        c2_sc[...] = jnp.zeros_like(c2_sc)

    def cell(gates, c_prev):
        # PyTorch gate order: input, forget, cell(g), output
        i = jax.nn.sigmoid(gates[:, 0 * H:1 * H])
        f = jax.nn.sigmoid(gates[:, 1 * H:2 * H])
        g = jnp.tanh(gates[:, 2 * H:3 * H])
        o = jax.nn.sigmoid(gates[:, 3 * H:4 * H])
        c = f * c_prev + i * g
        return o * jnp.tanh(c), c

    whh1 = whh1_ref[...]
    wih2 = wih2_ref[...]
    whh2 = whh2_ref[...]
    b2 = b2_ref[...]

    # Carry the recurrent state in registers within the chunk; write the VMEM
    # scratch back once per chunk.
    h1, c1 = h1_sc[...], c1_sc[...]
    h2, c2 = h2_sc[...], c2_sc[...]

    # Statically unrolled chunk of `tt` timesteps (amortizes per-grid-step
    # overhead; static indices keep gx1 loads / output stores simple).
    for k in range(tt):
        # Layer-2 recurrent partial depends only on the previous step's h2:
        # issue it first so this MXU matmul overlaps layer-1's gate math.
        g2_rec = jnp.dot(h2.astype(jnp.bfloat16), whh2,
                         preferred_element_type=jnp.float32)

        # Layer 1: input projection precomputed; only h_{t-1} @ W_hh1 here.
        g1 = gx1_ref[k].astype(jnp.float32) + jnp.dot(
            h1.astype(jnp.bfloat16), whh1, preferred_element_type=jnp.float32)
        h1, c1 = cell(g1, c1)

        # Layer 2 (eval-mode inter-layer dropout is the identity).
        g2 = jnp.dot(h1.astype(jnp.bfloat16), wih2,
                     preferred_element_type=jnp.float32) + g2_rec + b2
        h2, c2 = cell(g2, c2)

        # Full-tile store into the streamed (TT, BB, H) output block.
        out_ref[k] = h2.astype(out_ref.dtype)

    h1_sc[...] = h1
    c1_sc[...] = c1
    h2_sc[...] = h2
    c2_sc[...] = c2


def fused_lstm2_pallas(gx1, w_hh1, w_ih2, w_hh2, b2, *, tt=8):
    T_pad, B_pad, G = gx1.shape
    H = w_hh1.shape[0]
    assert T_pad % tt == 0

    # Batch halves are independent: split them across the two v7x TensorCores
    # when the halves stay tile-aligned for the bf16 gx1 blocks. On v5e/v6e
    # (single TC) the extra axis is just a sequential outer loop.
    bb = B_pad // 2 if B_pad % 32 == 0 else B_pad
    nb = B_pad // bb
    nt = T_pad // tt

    return pl.pallas_call(
        functools.partial(_lstm2_kernel, tt=tt),
        out_shape=jax.ShapeDtypeStruct((T_pad, B_pad, H), jnp.float32),
        grid_spec=pltpu.PrefetchScalarGridSpec(
            num_scalar_prefetch=0,
            grid=(nb, nt),
            in_specs=[
                pl.BlockSpec((tt, bb, G), lambda b, t: (t, b, 0)),
                pl.BlockSpec((H, G), lambda b, t: (0, 0)),
                pl.BlockSpec((H, G), lambda b, t: (0, 0)),
                pl.BlockSpec((H, G), lambda b, t: (0, 0)),
                pl.BlockSpec((1, G), lambda b, t: (0, 0)),
            ],
            # Streamed per time chunk (no whole-sequence VMEM residency).
            out_specs=pl.BlockSpec((tt, bb, H), lambda b, t: (t, b, 0)),
            scratch_shapes=[
                pltpu.VMEM((bb, H), jnp.float32),   # h1
                pltpu.VMEM((bb, H), jnp.float32),   # c1
                pltpu.VMEM((bb, H), jnp.float32),   # h2
                pltpu.VMEM((bb, H), jnp.float32),   # c2
            ],
        ),
        compiler_params=pltpu.CompilerParams(
            dimension_semantics=("parallel", "arbitrary"),  # time sequential
            vmem_limit_bytes=48 * 1024 * 1024),
        cost_estimate=pl.CostEstimate(
            flops=2 * 3 * H * G * B_pad * T_pad,
            transcendentals=10 * B_pad * T_pad * H,
            bytes_accessed=2 * T_pad * B_pad * G + 2 * 3 * H * G + 4 * G
            + 4 * T_pad * B_pad * H),
    )(gx1, w_hh1, w_ih2, w_hh2, b2)


# ---------------------------------------------------------------------------
# Full model forward
# ---------------------------------------------------------------------------
@jax.jit
def packed_lstm_lm_forward(tokens, params):
    """tokens: (B, T) int32 -> logits (B, T, V) f32 (batch_first, eval mode)."""
    emb = params["embedding"]
    B, T = tokens.shape
    E = emb.shape[1]
    H = params["w_hh1"].shape[0]
    V = params["w_cls"].shape[1]
    TT = 8
    B_pad = _round_up(B, 8)
    T_pad = _round_up(T, TT)

    # Embedding lookup gathered directly time-major: transpose the tiny (B, T)
    # int32 token matrix instead of the (T, B, E) activation tensor.
    x = emb[tokens.T]                                         # (T, B, E) f32
    if B_pad != B or T_pad != T:
        x = jnp.pad(x, ((0, T_pad - T), (0, B_pad - B), (0, 0)))

    # (1) Layer-1 input projection for ALL timesteps as one tiled MXU matmul,
    #     emitted in bf16 (halves the recurrence's largest input stream).
    gx1 = linear2d_pallas(x.reshape(T_pad * B_pad, E), params["w_ih1"],
                          params["b1"], out_dtype=jnp.bfloat16)
    gx1 = gx1.reshape(T_pad, B_pad, 4 * H)

    # (2) Both LSTM layers fused, chunked over time, output streamed.
    h = fused_lstm2_pallas(gx1, params["w_hh1"], params["w_ih2"],
                           params["w_hh2"], params["b2"], tt=TT)

    # (3) ReLU + classification head. Only the small (T, B, H) hidden tensor is
    #     transposed so the head sees dense batch-major rows and the logits
    #     come out batch-first without touching the large (B, T, V) tensor.
    h_bt = jnp.transpose(h[:T, :B], (1, 0, 2)).reshape(B * T, H)
    logits = linear2d_pallas(h_bt, params["w_cls"], params["b_cls"],
                             apply_relu=True)
    return logits.reshape(B, T, V)


# ---------------------------------------------------------------------------
# Pure-JAX reference (same bf16-operand / f32-accumulate / bf16-gx1 contract)
# ---------------------------------------------------------------------------
def forward_ref(tokens, params):
    emb = params["embedding"]
    B, T = tokens.shape
    H = params["w_hh1"].shape[0]

    def mm(a, w):
        return jnp.dot(a.astype(jnp.bfloat16), w,
                       preferred_element_type=jnp.float32)

    x = emb[tokens.T]                                         # (T, B, E)
    gx1 = (mm(x.reshape(T * B, -1), params["w_ih1"]) + params["b1"]
           ).astype(jnp.bfloat16)
    gx1 = gx1.reshape(T, B, 4 * H)

    def cell(gates, c_prev):
        i = jax.nn.sigmoid(gates[:, 0 * H:1 * H])
        f = jax.nn.sigmoid(gates[:, 1 * H:2 * H])
        g = jnp.tanh(gates[:, 2 * H:3 * H])
        o = jax.nn.sigmoid(gates[:, 3 * H:4 * H])
        c = f * c_prev + i * g
        return o * jnp.tanh(c), c

    def step(carry, gx_t):
        h1, c1, h2, c2 = carry
        g1 = gx_t.astype(jnp.float32) + mm(h1, params["w_hh1"])
        h1, c1 = cell(g1, c1)
        g2 = mm(h1, params["w_ih2"]) + mm(h2, params["w_hh2"]) + params["b2"]
        h2, c2 = cell(g2, c2)
        return (h1, c1, h2, c2), h2

    z = jnp.zeros((B, H), jnp.float32)
    _, hs = jax.lax.scan(step, (z, z, z, z), gx1)             # (T, B, H) f32
    h_bt = jnp.transpose(hs, (1, 0, 2)).reshape(B * T, H)
    logits = mm(jnp.maximum(h_bt, 0.0), params["w_cls"]) + params["b_cls"]
    return logits.reshape(B, T, -1)


# ---------------------------------------------------------------------------
# Deterministic parameter init (PackedLSTMLM with num_layers=2); MXU weights
# stored pre-transposed in bf16, biases in f32.
# ---------------------------------------------------------------------------
def init_params(key, num_embeddings, embedding_dim, hidden):
    ks = jax.random.split(key, 11)
    bound = float(hidden) ** -0.5

    def unif(k, shape):
        return jax.random.uniform(k, shape, jnp.float32, -bound, bound)

    emb = jax.random.normal(ks[0], (num_embeddings, embedding_dim), jnp.float32)

    w_ih1 = unif(ks[1], (4 * hidden, embedding_dim))
    w_hh1 = unif(ks[2], (4 * hidden, hidden))
    b1 = unif(ks[3], (4 * hidden,)) + unif(ks[4], (4 * hidden,))
    w_ih2 = unif(ks[5], (4 * hidden, hidden))
    w_hh2 = unif(ks[6], (4 * hidden, hidden))
    b2 = unif(ks[7], (4 * hidden,)) + unif(ks[8], (4 * hidden,))
    w_c = unif(ks[9], (num_embeddings, hidden))
    b_c = unif(ks[10], (num_embeddings,))

    return {
        "embedding": emb,                                     # (V, E)
        "w_ih1": w_ih1.T.astype(jnp.bfloat16),                # (E, 4H)
        "w_hh1": w_hh1.T.astype(jnp.bfloat16),                # (H, 4H)
        "b1": b1[None, :],                                    # (1, 4H)
        "w_ih2": w_ih2.T.astype(jnp.bfloat16),                # (H, 4H)
        "w_hh2": w_hh2.T.astype(jnp.bfloat16),                # (H, 4H)
        "b2": b2[None, :],                                    # (1, 4H)
        "w_cls": w_c.T.astype(jnp.bfloat16),                  # (H, V)
        "b_cls": b_c[None, :],                                # (1, V)
    }


if __name__ == "__main__":
    NUM_EMBEDDINGS = 256    # vocab
    EMBEDDING_DIM = 128
    HIDDEN = 128
    BATCH = 4               # exercises sublane padding to 8
    SEQ = 8

    root = jax.random.PRNGKey(0)
    k_params, k_tok = jax.random.split(root)
    params = init_params(k_params, NUM_EMBEDDINGS, EMBEDDING_DIM, HIDDEN)
    tokens = jax.random.randint(k_tok, (BATCH, SEQ), 0, NUM_EMBEDDINGS,
                                dtype=jnp.int32)

    logits = jax.block_until_ready(packed_lstm_lm_forward(tokens, params))
    assert logits.shape == (BATCH, SEQ, NUM_EMBEDDINGS)

    ref = jax.block_until_ready(forward_ref(tokens, params))
    max_err = float(jnp.max(jnp.abs(logits - ref)))
    assert jnp.allclose(logits, ref, atol=2e-3, rtol=2e-3), \
        f"Pallas output mismatch vs reference (max abs err {max_err})"

    print("KERNEL_OK")
</pallas_src>

<mosaic_0001>
module attributes {stable_mosaic.version = 11 : i64} {
  func.func @_linear_kernel(%arg0: i32, %arg1: i32, %arg2: memref<64x128xf32, #tpu.memory_space<vmem>>, %arg3: memref<128x512xbf16, #tpu.memory_space<vmem>>, %arg4: memref<1x512xf32, #tpu.memory_space<vmem>>, %arg5: memref<64x512xbf16, #tpu.memory_space<vmem>>) attributes {dimension_semantics = [#tpu.dimension_semantics<parallel>, #tpu.dimension_semantics<parallel>], iteration_bounds = array<i64: 1, 1>, scalar_prefetch = 0 : i64, scratch_operands = 0 : i64, tpu.core_type = #tpu.core_type<tc>, window_params = [{transform_indices = @transform_0, window_bounds = array<i64: 64, 128>}, {transform_indices = @transform_1, window_bounds = array<i64: 128, 512>}, {transform_indices = @transform_2, window_bounds = array<i64: 1, 512>}, {transform_indices = @transform_3, window_bounds = array<i64: 64, 512>}]} {
    %c0 = arith.constant 0 : index
    %c0_0 = arith.constant 0 : index
    %0 = vector.load %arg2[%c0, %c0_0] : memref<64x128xf32, #tpu.memory_space<vmem>>, vector<64x128xf32>
    %1 = arith.truncf %0 : vector<64x128xf32> to vector<64x128xbf16>
    %c0_1 = arith.constant 0 : index
    %c0_2 = arith.constant 0 : index
    %2 = vector.load %arg3[%c0_1, %c0_2] : memref<128x512xbf16, #tpu.memory_space<vmem>>, vector<128x512xbf16>
    %cst = arith.constant dense<0.000000e+00> : vector<64x512xf32>
    %3 = tpu.matmul %1, %2, %cst {dimension_numbers = #tpu.dot_dimension_numbers<[1], [0], [0], [1], [0, 0, 1, 1], [], []>} : vector<64x128xbf16>, vector<128x512xbf16>, vector<64x512xf32> -> vector<64x512xf32>
    %c0_3 = arith.constant 0 : index
    %c0_4 = arith.constant 0 : index
    %4 = vector.load %arg4[%c0_3, %c0_4] : memref<1x512xf32, #tpu.memory_space<vmem>>, vector<1x512xf32>
    %5 = vector.broadcast %4 : vector<1x512xf32> to vector<64x512xf32>
    %6 = arith.addf %3, %5 : vector<64x512xf32>
    %7 = arith.truncf %6 : vector<64x512xf32> to vector<64x512xbf16>
    %c0_5 = arith.constant 0 : index
    %c0_6 = arith.constant 0 : index
    %8 = vector.load %arg5[%c0_5, %c0_6] : memref<64x512xbf16, #tpu.memory_space<vmem>>, vector<64x512xbf16>
    tpu.vector_store %arg5[%c0_5, %c0_6], %7 {strides = array<i32>} : memref<64x512xbf16, #tpu.memory_space<vmem>>, vector<64x512xbf16>,
    return
  }
  func.func @transform_0(%arg0: i32, %arg1: i32) -> (i32, i32) {
    %c0_i32 = arith.constant 0 : i32
    %c0_i32_0 = arith.constant 0 : i32
    return %arg0, %c0_i32 : i32, i32
  }
  func.func @transform_1(%arg0: i32, %arg1: i32) -> (i32, i32) {
    %c0_i32 = arith.constant 0 : i32
    %c0_i32_0 = arith.constant 0 : i32
    return %c0_i32, %arg1 : i32, i32
  }
  func.func @transform_2(%arg0: i32, %arg1: i32) -> (i32, i32) {
    %c0_i32 = arith.constant 0 : i32
    %c0_i32_0 = arith.constant 0 : i32
    return %c0_i32, %arg1 : i32, i32
  }
  func.func @transform_3(%arg0: i32, %arg1: i32) -> (i32, i32) {
    %c0_i32 = arith.constant 0 : i32
    return %arg0, %arg1 : i32, i32
  }
}

module attributes {stable_mosaic.version = 11 : i64} {
  func.func @_linear_kernel(%arg0: i32, %arg1: i32, %arg2: memref<32x128xf32, #tpu.memory_space<vmem>>, %arg3: memref<128x256xbf16, #tpu.memory_space<vmem>>, %arg4: memref<1x256xf32, #tpu.memory_space<vmem>>, %arg5: memref<32x256xf32, #tpu.memory_space<vmem>>) attributes {dimension_semantics = [#tpu.dimension_semantics<parallel>, #tpu.dimension_semantics<parallel>], iteration_bounds = array<i64: 1, 1>, scalar_prefetch = 0 : i64, scratch_operands = 0 : i64, tpu.core_type = #tpu.core_type<tc>, window_params = [{transform_indices = @transform_0, window_bounds = array<i64: 32, 128>}, {transform_indices = @transform_1, window_bounds = array<i64: 128, 256>}, {transform_indices = @transform_2, window_bounds = array<i64: 1, 256>}, {transform_indices = @transform_3, window_bounds = array<i64: 32, 256>}]} {
    %c0 = arith.constant 0 : index
    %c0_0 = arith.constant 0 : index
    %0 = vector.load %arg2[%c0, %c0_0] : memref<32x128xf32, #tpu.memory_space<vmem>>, vector<32x128xf32>
    %cst = arith.constant 0.000000e+00 : f32
    %1 = vector.broadcast %cst : f32 to vector<32x128xf32>
    %2 = arith.maximumf %0, %1 : vector<32x128xf32>
    %3 = arith.truncf %2 : vector<32x128xf32> to vector<32x128xbf16>
    %c0_1 = arith.constant 0 : index
    %c0_2 = arith.constant 0 : index
    %4 = vector.load %arg3[%c0_1, %c0_2] : memref<128x256xbf16, #tpu.memory_space<vmem>>, vector<128x256xbf16>
    %cst_3 = arith.constant dense<0.000000e+00> : vector<32x256xf32>
    %5 = tpu.matmul %3, %4, %cst_3 {dimension_numbers = #tpu.dot_dimension_numbers<[1], [0], [0], [1], [0, 0, 1, 1], [], []>} : vector<32x128xbf16>, vector<128x256xbf16>, vector<32x256xf32> -> vector<32x256xf32>
    %c0_4 = arith.constant 0 : index
    %c0_5 = arith.constant 0 : index
    %6 = vector.load %arg4[%c0_4, %c0_5] : memref<1x256xf32, #tpu.memory_space<vmem>>, vector<1x256xf32>
    %7 = vector.broadcast %6 : vector<1x256xf32> to vector<32x256xf32>
    %8 = arith.addf %5, %7 : vector<32x256xf32>
    %c0_6 = arith.constant 0 : index
    %c0_7 = arith.constant 0 : index
    %9 = vector.load %arg5[%c0_6, %c0_7] : memref<32x256xf32, #tpu.memory_space<vmem>>, vector<32x256xf32>
    tpu.vector_store %arg5[%c0_6, %c0_7], %8 {strides = array<i32>} : memref<32x256xf32, #tpu.memory_space<vmem>>, vector<32x256xf32>,
    return
  }
  func.func @transform_0(%arg0: i32, %arg1: i32) -> (i32, i32) {
    %c0_i32 = arith.constant 0 : i32
    %c0_i32_0 = arith.constant 0 : i32
    return %arg0, %c0_i32 : i32, i32
  }
  func.func @transform_1(%arg0: i32, %arg1: i32) -> (i32, i32) {
    %c0_i32 = arith.constant 0 : i32
    %c0_i32_0 = arith.constant 0 : i32
    return %c0_i32, %arg1 : i32, i32
  }
  func.func @transform_2(%arg0: i32, %arg1: i32) -> (i32, i32) {
    %c0_i32 = arith.constant 0 : i32
    %c0_i32_0 = arith.constant 0 : i32
    return %c0_i32, %arg1 : i32, i32
  }
  func.func @transform_3(%arg0: i32, %arg1: i32) -> (i32, i32) {
    %c0_i32 = arith.constant 0 : i32
    return %arg0, %arg1 : i32, i32
  }
}

module attributes {stable_mosaic.version = 11 : i64} {
  func.func @_lstm2_kernel(%arg0: i32, %arg1: i32, %arg2: memref<8x8x512xbf16, #tpu.memory_space<vmem>>, %arg3: memref<128x512xbf16, #tpu.memory_space<vmem>>, %arg4: memref<128x512xbf16, #tpu.memory_space<vmem>>, %arg5: memref<128x512xbf16, #tpu.memory_space<vmem>>, %arg6: memref<1x512xf32, #tpu.memory_space<vmem>>, %arg7: memref<8x8x128xf32, #tpu.memory_space<vmem>>, %arg8: memref<8x128xf32, #tpu.memory_space<vmem>>, %arg9: memref<8x128xf32, #tpu.memory_space<vmem>>, %arg10: memref<8x128xf32, #tpu.memory_space<vmem>>, %arg11: memref<8x128xf32, #tpu.memory_space<vmem>>) attributes {dimension_semantics = [#tpu.dimension_semantics<parallel>, #tpu.dimension_semantics<arbitrary>], iteration_bounds = array<i64: 1, 1>, scalar_prefetch = 0 : i64, scratch_operands = 4 : i64, tpu.core_type = #tpu.core_type<tc>, window_params = [{transform_indices = @transform_0, window_bounds = array<i64: 8, 8, 512>}, {pipeline_mode = #tpu.pipeline_mode<synchronous>, transform_indices = @transform_1, window_bounds = array<i64: 128, 512>}, {pipeline_mode = #tpu.pipeline_mode<synchronous>, transform_indices = @transform_2, window_bounds = array<i64: 128, 512>}, {pipeline_mode = #tpu.pipeline_mode<synchronous>, transform_indices = @transform_3, window_bounds = array<i64: 128, 512>}, {pipeline_mode = #tpu.pipeline_mode<synchronous>, transform_indices = @transform_4, window_bounds = array<i64: 1, 512>}, {transform_indices = @transform_5, window_bounds = array<i64: 8, 8, 128>}]} {
    %c0_i32 = arith.constant 0 : i32
    %0 = arith.cmpi eq, %arg1, %c0_i32 : i32
    %1 = arith.extui %0 : i1 to i32
    %c0_i32_0 = arith.constant 0 : i32
    %2 = arith.cmpi ne, %1, %c0_i32_0 : i32
    scf.if %2 {
      %cst_136 = arith.constant 0.000000e+00 : f32
      %543 = vector.broadcast %cst_136 : f32 to vector<8x128xf32>
      %c0_137 = arith.constant 0 : index
      %c0_138 = arith.constant 0 : index
      %544 = vector.load %arg8[%c0_137, %c0_138] : memref<8x128xf32, #tpu.memory_space<vmem>>, vector<8x128xf32>
      tpu.vector_store %arg8[%c0_137, %c0_138], %543 {strides = array<i32>} : memref<8x128xf32, #tpu.memory_space<vmem>>, vector<8x128xf32>,
      %cst_139 = arith.constant 0.000000e+00 : f32
      %545 = vector.broadcast %cst_139 : f32 to vector<8x128xf32>
      %c0_140 = arith.constant 0 : index
      %c0_141 = arith.constant 0 : index
      %546 = vector.load %arg9[%c0_140, %c0_141] : memref<8x128xf32, #tpu.memory_space<vmem>>, vector<8x128xf32>
      tpu.vector_store %arg9[%c0_140, %c0_141], %545 {strides = array<i32>} : memref<8x128xf32, #tpu.memory_space<vmem>>, vector<8x128xf32>,
      %cst_142 = arith.constant 0.000000e+00 : f32
      %547 = vector.broadcast %cst_142 : f32 to vector<8x128xf32>
      %c0_143 = arith.constant 0 : index
      %c0_144 = arith.constant 0 : index
      %548 = vector.load %arg10[%c0_143, %c0_144] : memref<8x128xf32, #tpu.memory_space<vmem>>, vector<8x128xf32>
      tpu.vector_store %arg10[%c0_143, %c0_144], %547 {strides = array<i32>} : memref<8x128xf32, #tpu.memory_space<vmem>>, vector<8x128xf32>,
      %cst_145 = arith.constant 0.000000e+00 : f32
      %549 = vector.broadcast %cst_145 : f32 to vector<8x128xf32>
      %c0_146 = arith.constant 0 : index
      %c0_147 = arith.constant 0 : index
      %550 = vector.load %arg11[%c0_146, %c0_147] : memref<8x128xf32, #tpu.memory_space<vmem>>, vector<8x128xf32>
      tpu.vector_store %arg11[%c0_146, %c0_147], %549 {strides = array<i32>} : memref<8x128xf32, #tpu.memory_space<vmem>>, vector<8x128xf32>,
    } else {
    }
    %c0 = arith.constant 0 : index
    %c0_1 = arith.constant 0 : index
    %3 = vector.load %arg3[%c0, %c0_1] : memref<128x512xbf16, #tpu.memory_space<vmem>>, vector<128x512xbf16>
    %c0_2 = arith.constant 0 : index
    %c0_3 = arith.constant 0 : index
    %4 = vector.load %arg4[%c0_2, %c0_3] : memref<128x512xbf16, #tpu.memory_space<vmem>>, vector<128x512xbf16>
    %c0_4 = arith.constant 0 : index
    %c0_5 = arith.constant 0 : index
    %5 = vector.load %arg5[%c0_4, %c0_5] : memref<128x512xbf16, #tpu.memory_space<vmem>>, vector<128x512xbf16>
    %c0_6 = arith.constant 0 : index
    %c0_7 = arith.constant 0 : index
    %6 = vector.load %arg6[%c0_6, %c0_7] : memref<1x512xf32, #tpu.memory_space<vmem>>, vector<1x512xf32>
    %c0_8 = arith.constant 0 : index
    %c0_9 = arith.constant 0 : index
    %7 = vector.load %arg8[%c0_8, %c0_9] : memref<8x128xf32, #tpu.memory_space<vmem>>, vector<8x128xf32>
    %c0_10 = arith.constant 0 : index
    %c0_11 = arith.constant 0 : index
    %8 = vector.load %arg9[%c0_10, %c0_11] : memref<8x128xf32, #tpu.memory_space<vmem>>, vector<8x128xf32>
    %c0_12 = arith.constant 0 : index
    %c0_13 = arith.constant 0 : index
    %9 = vector.load %arg10[%c0_12, %c0_13] : memref<8x128xf32, #tpu.memory_space<vmem>>, vector<8x128xf32>
    %c0_14 = arith.constant 0 : index
    %c0_15 = arith.constant 0 : index
    %10 = vector.load %arg11[%c0_14, %c0_15] : memref<8x128xf32, #tpu.memory_space<vmem>>, vector<8x128xf32>
    %11 = arith.truncf %9 : vector<8x128xf32> to vector<8x128xbf16>
    %cst = arith.constant dense<0.000000e+00> : vector<8x512xf32>
    %12 = tpu.matmul %11, %5, %cst {dimension_numbers = #tpu.dot_dimension_numbers<[1], [0], [0], [1], [0, 0, 1, 1], [], []>} : vector<8x128xbf16>, vector<128x512xbf16>, vector<8x512xf32> -> vector<8x512xf32>
    %c0_16 = arith.constant 0 : index
    %c0_17 = arith.constant 0 : index
    %c0_18 = arith.constant 0 : index
    %13 = vector.load %arg2[%c0_16, %c0_17, %c0_18] : memref<8x8x512xbf16, #tpu.memory_space<vmem>>, vector<1x8x512xbf16>
    %14 = vector.shape_cast %13 : vector<1x8x512xbf16> to vector<8x512xbf16>
    %15 = arith.extf %14 : vector<8x512xbf16> to vector<8x512xf32>
    %16 = arith.truncf %7 : vector<8x128xf32> to vector<8x128xbf16>
    %cst_19 = arith.constant dense<0.000000e+00> : vector<8x512xf32>
    %17 = tpu.matmul %16, %3, %cst_19 {dimension_numbers = #tpu.dot_dimension_numbers<[1], [0], [0], [1], [0, 0, 1, 1], [], []>} : vector<8x128xbf16>, vector<128x512xbf16>, vector<8x512xf32> -> vector<8x512xf32>
    %18 = arith.addf %15, %17 : vector<8x512xf32>
    %19 = vector.extract_strided_slice %18 {offsets = [0, 0], sizes = [8, 128], strides = [1, 1]} : vector<8x512xf32> to vector<8x128xf32>
    %20 = arith.negf %19 : vector<8x128xf32>
    %21 = math.exp %20 : vector<8x128xf32>
    %cst_20 = arith.constant 1.000000e+00 : f32
    %22 = vector.broadcast %cst_20 : f32 to vector<8x128xf32>
    %23 = arith.addf %22, %21 : vector<8x128xf32>
    %24 = arith.divf %22, %23 : vector<8x128xf32>
    %25 = vector.extract_strided_slice %18 {offsets = [0, 128], sizes = [8, 128], strides = [1, 1]} : vector<8x512xf32> to vector<8x128xf32>
    %26 = arith.negf %25 : vector<8x128xf32>
    %27 = math.exp %26 : vector<8x128xf32>
    %cst_21 = arith.constant 1.000000e+00 : f32
    %28 = vector.broadcast %cst_21 : f32 to vector<8x128xf32>
    %29 = arith.addf %28, %27 : vector<8x128xf32>
    %30 = arith.divf %28, %29 : vector<8x128xf32>
    %31 = vector.extract_strided_slice %18 {offsets = [0, 256], sizes = [8, 128], strides = [1, 1]} : vector<8x512xf32> to vector<8x128xf32>
    %32 = math.tanh %31 : vector<8x128xf32>
    %33 = vector.extract_strided_slice %18 {offsets = [0, 384], sizes = [8, 128], strides = [1, 1]} : vector<8x512xf32> to vector<8x128xf32>
    %34 = arith.negf %33 : vector<8x128xf32>
    %35 = math.exp %34 : vector<8x128xf32>
    %cst_22 = arith.constant 1.000000e+00 : f32
    %36 = vector.broadcast %cst_22 : f32 to vector<8x128xf32>
    %37 = arith.addf %36, %35 : vector<8x128xf32>
    %38 = arith.divf %36, %37 : vector<8x128xf32>
    %39 = arith.mulf %30, %8 : vector<8x128xf32>
    %40 = arith.mulf %24, %32 : vector<8x128xf32>
    %41 = arith.addf %39, %40 : vector<8x128xf32>
    %42 = math.tanh %41 : vector<8x128xf32>
    %43 = arith.mulf %38, %42 : vector<8x128xf32>
    %44 = arith.truncf %43 : vector<8x128xf32> to vector<8x128xbf16>
    %cst_23 = arith.constant dense<0.000000e+00> : vector<8x512xf32>
    %45 = tpu.matmul %44, %4, %cst_23 {dimension_numbers = #tpu.dot_dimension_numbers<[1], [0], [0], [1], [0, 0, 1, 1], [], []>} : vector<8x128xbf16>, vector<128x512xbf16>, vector<8x512xf32> -> vector<8x512xf32>
    %46 = arith.addf %45, %12 : vector<8x512xf32>
    %47 = vector.broadcast %6 : vector<1x512xf32> to vector<8x512xf32>
    %48 = arith.addf %46, %47 : vector<8x512xf32>
    %49 = vector.extract_strided_slice %48 {offsets = [0, 0], sizes = [8, 128], strides = [1, 1]} : vector<8x512xf32> to vector<8x128xf32>
    %50 = arith.negf %49 : vector<8x128xf32>
    %51 = math.exp %50 : vector<8x128xf32>
    %cst_24 = arith.constant 1.000000e+00 : f32
    %52 = vector.broadcast %cst_24 : f32 to vector<8x128xf32>
    %53 = arith.addf %52, %51 : vector<8x128xf32>
    %54 = arith.divf %52, %53 : vector<8x128xf32>
    %55 = vector.extract_strided_slice %48 {offsets = [0, 128], sizes = [8, 128], strides = [1, 1]} : vector<8x512xf32> to vector<8x128xf32>
    %56 = arith.negf %55 : vector<8x128xf32>
    %57 = math.exp %56 : vector<8x128xf32>
    %cst_25 = arith.constant 1.000000e+00 : f32
    %58 = vector.broadcast %cst_25 : f32 to vector<8x128xf32>
    %59 = arith.addf %58, %57 : vector<8x128xf32>
    %60 = arith.divf %58, %59 : vector<8x128xf32>
    %61 = vector.extract_strided_slice %48 {offsets = [0, 256], sizes = [8, 128], strides = [1, 1]} : vector<8x512xf32> to vector<8x128xf32>
    %62 = math.tanh %61 : vector<8x128xf32>
    %63 = vector.extract_strided_slice %48 {offsets = [0, 384], sizes = [8, 128], strides = [1, 1]} : vector<8x512xf32> to vector<8x128xf32>
    %64 = arith.negf %63 : vector<8x128xf32>
    %65 = math.exp %64 : vector<8x128xf32>
    %cst_26 = arith.constant 1.000000e+00 : f32
    %66 = vector.broadcast %cst_26 : f32 to vector<8x128xf32>
    %67 = arith.addf %66, %65 : vector<8x128xf32>
    %68 = arith.divf %66, %67 : vector<8x128xf32>
    %69 = arith.mulf %60, %10 : vector<8x128xf32>
    %70 = arith.mulf %54, %62 : vector<8x128xf32>
    %71 = arith.addf %69, %70 : vector<8x128xf32>
    %72 = math.tanh %71 : vector<8x128xf32>
    %73 = arith.mulf %68, %72 : vector<8x128xf32>
    %c0_27 = arith.constant 0 : index
    %c0_28 = arith.constant 0 : index
    %c0_29 = arith.constant 0 : index
    %74 = vector.load %arg7[%c0_27, %c0_28, %c0_29] : memref<8x8x128xf32, #tpu.memory_space<vmem>>, vector<1x8x128xf32>
    %75 = vector.shape_cast %74 : vector<1x8x128xf32> to vector<8x128xf32>
    %76 = vector.shape_cast %73 : vector<8x128xf32> to vector<1x8x128xf32>
    tpu.vector_store %arg7[%c0_27, %c0_28, %c0_29], %76 {strides = array<i32>} : memref<8x8x128xf32, #tpu.memory_space<vmem>>, vector<1x8x128xf32>,
    %77 = arith.truncf %73 : vector<8x128xf32> to vector<8x128xbf16>
    %cst_30 = arith.constant dense<0.000000e+00> : vector<8x512xf32>
    %78 = tpu.matmul %77, %5, %cst_30 {dimension_numbers = #tpu.dot_dimension_numbers<[1], [0], [0], [1], [0, 0, 1, 1], [], []>} : vector<8x128xbf16>, vector<128x512xbf16>, vector<8x512xf32> -> vector<8x512xf32>
    %c1 = arith.constant 1 : index
    %c0_31 = arith.constant 0 : index
    %c0_32 = arith.constant 0 : index
    %79 = vector.load %arg2[%c1, %c0_31, %c0_32] : memref<8x8x512xbf16, #tpu.memory_space<vmem>>, vector<1x8x512xbf16>
    %80 = vector.shape_cast %79 : vector<1x8x512xbf16> to vector<8x512xbf16>
    %81 = arith.extf %80 : vector<8x512xbf16> to vector<8x512xf32>
    %82 = arith.truncf %43 : vector<8x128xf32> to vector<8x128xbf16>
    %cst_33 = arith.constant dense<0.000000e+00> : vector<8x512xf32>
    %83 = tpu.matmul %82, %3, %cst_33 {dimension_numbers = #tpu.dot_dimension_numbers<[1], [0], [0], [1], [0, 0, 1, 1], [], []>} : vector<8x128xbf16>, vector<128x512xbf16>, vector<8x512xf32> -> vector<8x512xf32>
    %84 = arith.addf %81, %83 : vector<8x512xf32>
    %85 = vector.extract_strided_slice %84 {offsets = [0, 0], sizes = [8, 128], strides = [1, 1]} : vector<8x512xf32> to vector<8x128xf32>
    %86 = arith.negf %85 : vector<8x128xf32>
    %87 = math.exp %86 : vector<8x128xf32>
    %cst_34 = arith.constant 1.000000e+00 : f32
    %88 = vector.broadcast %cst_34 : f32 to vector<8x128xf32>
    %89 = arith.addf %88, %87 : vector<8x128xf32>
    %90 = arith.divf %88, %89 : vector<8x128xf32>
    %91 = vector.extract_strided_slice %84 {offsets = [0, 128], sizes = [8, 128], strides = [1, 1]} : vector<8x512xf32> to vector<8x128xf32>
    %92 = arith.negf %91 : vector<8x128xf32>
    %93 = math.exp %92 : vector<8x128xf32>
    %cst_35 = arith.constant 1.000000e+00 : f32
    %94 = vector.broadcast %cst_35 : f32 to vector<8x128xf32>
    %95 = arith.addf %94, %93 : vector<8x128xf32>
    %96 = arith.divf %94, %95 : vector<8x128xf32>
    %97 = vector.extract_strided_slice %84 {offsets = [0, 256], sizes = [8, 128], strides = [1, 1]} : vector<8x512xf32> to vector<8x128xf32>
    %98 = math.tanh %97 : vector<8x128xf32>
    %99 = vector.extract_strided_slice %84 {offsets = [0, 384], sizes = [8, 128], strides = [1, 1]} : vector<8x512xf32> to vector<8x128xf32>
    %100 = arith.negf %99 : vector<8x128xf32>
    %101 = math.exp %100 : vector<8x128xf32>
    %cst_36 = arith.constant 1.000000e+00 : f32
    %102 = vector.broadcast %cst_36 : f32 to vector<8x128xf32>
    %103 = arith.addf %102, %101 : vector<8x128xf32>
    %104 = arith.divf %102, %103 : vector<8x128xf32>
    %105 = arith.mulf %96, %41 : vector<8x128xf32>
    %106 = arith.mulf %90, %98 : vector<8x128xf32>
    %107 = arith.addf %105, %106 : vector<8x128xf32>
    %108 = math.tanh %107 : vector<8x128xf32>
    %109 = arith.mulf %104, %108 : vector<8x128xf32>
    %110 = arith.truncf %109 : vector<8x128xf32> to vector<8x128xbf16>
    %cst_37 = arith.constant dense<0.000000e+00> : vector<8x512xf32>
    %111 = tpu.matmul %110, %4, %cst_37 {dimension_numbers = #tpu.dot_dimension_numbers<[1], [0], [0], [1], [0, 0, 1, 1], [], []>} : vector<8x128xbf16>, vector<128x512xbf16>, vector<8x512xf32> -> vector<8x512xf32>
    %112 = arith.addf %111, %78 : vector<8x512xf32>
    %113 = vector.broadcast %6 : vector<1x512xf32> to vector<8x512xf32>
    %114 = arith.addf %112, %113 : vector<8x512xf32>
    %115 = vector.extract_strided_slice %114 {offsets = [0, 0], sizes = [8, 128], strides = [1, 1]} : vector<8x512xf32> to vector<8x128xf32>
    %116 = arith.negf %115 : vector<8x128xf32>
    %117 = math.exp %116 : vector<8x128xf32>
    %cst_38 = arith.constant 1.000000e+00 : f32
    %118 = vector.broadcast %cst_38 : f32 to vector<8x128xf32>
    %119 = arith.addf %118, %117 : vector<8x128xf32>
    %120 = arith.divf %118, %119 : vector<8x128xf32>
    %121 = vector.extract_strided_slice %114 {offsets = [0, 128], sizes = [8, 128], strides = [1, 1]} : vector<8x512xf32> to vector<8x128xf32>
    %122 = arith.negf %121 : vector<8x128xf32>
    %123 = math.exp %122 : vector<8x128xf32>
    %cst_39 = arith.constant 1.000000e+00 : f32
    %124 = vector.broadcast %cst_39 : f32 to vector<8x128xf32>
    %125 = arith.addf %124, %123 : vector<8x128xf32>
    %126 = arith.divf %124, %125 : vector<8x128xf32>
    %127 = vector.extract_strided_slice %114 {offsets = [0, 256], sizes = [8, 128], strides = [1, 1]} : vector<8x512xf32> to vector<8x128xf32>
    %128 = math.tanh %127 : vector<8x128xf32>
    %129 = vector.extract_strided_slice %114 {offsets = [0, 384], sizes = [8, 128], strides = [1, 1]} : vector<8x512xf32> to vector<8x128xf32>
    %130 = arith.negf %129 : vector<8x128xf32>
    %131 = math.exp %130 : vector<8x128xf32>
    %cst_40 = arith.constant 1.000000e+00 : f32
    %132 = vector.broadcast %cst_40 : f32 to vector<8x128xf32>
    %133 = arith.addf %132, %131 : vector<8x128xf32>
    %134 = arith.divf %132, %133 : vector<8x128xf32>
    %135 = arith.mulf %126, %71 : vector<8x128xf32>
    %136 = arith.mulf %120, %128 : vector<8x128xf32>
    %137 = arith.addf %135, %136 : vector<8x128xf32>
    %138 = math.tanh %137 : vector<8x128xf32>
    %139 = arith.mulf %134, %138 : vector<8x128xf32>
    %c1_41 = arith.constant 1 : index
    %c0_42 = arith.constant 0 : index
    %c0_43 = arith.constant 0 : index
    %140 = vector.load %arg7[%c1_41, %c0_42, %c0_43] : memref<8x8x128xf32, #tpu.memory_space<vmem>>, vector<1x8x128xf32>
    %141 = vector.shape_cast %140 : vector<1x8x128xf32> to vector<8x128xf32>
    %142 = vector.shape_cast %139 : vector<8x128xf32> to vector<1x8x128xf32>
    tpu.vector_store %arg7[%c1_41, %c0_42, %c0_43], %142 {strides = array<i32>} : memref<8x8x128xf32, #tpu.memory_space<vmem>>, vector<1x8x128xf32>,
    %143 = arith.truncf %139 : vector<8x128xf32> to vector<8x128xbf16>
    %cst_44 = arith.constant dense<0.000000e+00> : vector<8x512xf32>
    %144 = tpu.matmul %143, %5, %cst_44 {dimension_numbers = #tpu.dot_dimension_numbers<[1], [0], [0], [1], [0, 0, 1, 1], [], []>} : vector<8x128xbf16>, vector<128x512xbf16>, vector<8x512xf32> -> vector<8x512xf32>
    %c2 = arith.constant 2 : index
    %c0_45 = arith.constant 0 : index
    %c0_46 = arith.constant 0 : index
    %145 = vector.load %arg2[%c2, %c0_45, %c0_46] : memref<8x8x512xbf16, #tpu.memory_space<vmem>>, vector<1x8x512xbf16>
    %146 = vector.shape_cast %145 : vector<1x8x512xbf16> to vector<8x512xbf16>
    %147 = arith.extf %146 : vector<8x512xbf16> to vector<8x512xf32>
    %148 = arith.truncf %109 : vector<8x128xf32> to vector<8x128xbf16>
    %cst_47 = arith.constant dense<0.000000e+00> : vector<8x512xf32>
    %149 = tpu.matmul %148, %3, %cst_47 {dimension_numbers = #tpu.dot_dimension_numbers<[1], [0], [0], [1], [0, 0, 1, 1], [], []>} : vector<8x128xbf16>, vector<128x512xbf16>, vector<8x512xf32> -> vector<8x512xf32>
    %150 = arith.addf %147, %149 : vector<8x512xf32>
    %151 = vector.extract_strided_slice %150 {offsets = [0, 0], sizes = [8, 128], strides = [1, 1]} : vector<8x512xf32> to vector<8x128xf32>
    %152 = arith.negf %151 : vector<8x128xf32>
    %153 = math.exp %152 : vector<8x128xf32>
    %cst_48 = arith.constant 1.000000e+00 : f32
    %154 = vector.broadcast %cst_48 : f32 to vector<8x128xf32>
    %155 = arith.addf %154, %153 : vector<8x128xf32>
    %156 = arith.divf %154, %155 : vector<8x128xf32>
    %157 = vector.extract_strided_slice %150 {offsets = [0, 128], sizes = [8, 128], strides = [1, 1]} : vector<8x512xf32> to vector<8x128xf32>
    %158 = arith.negf %157 : vector<8x128xf32>
    %159 = math.exp %158 : vector<8x128xf32>
    %cst_49 = arith.constant 1.000000e+00 : f32
    %160 = vector.broadcast %cst_49 : f32 to vector<8x128xf32>
    %161 = arith.addf %160, %159 : vector<8x128xf32>
    %162 = arith.divf %160, %161 : vector<8x128xf32>
    %163 = vector.extract_strided_slice %150 {offsets = [0, 256], sizes = [8, 128], strides = [1, 1]} : vector<8x512xf32> to vector<8x128xf32>
    %164 = math.tanh %163 : vector<8x128xf32>
    %165 = vector.extract_strided_slice %150 {offsets = [0, 384], sizes = [8, 128], strides = [1, 1]} : vector<8x512xf32> to vector<8x128xf32>
    %166 = arith.negf %165 : vector<8x128xf32>
    %167 = math.exp %166 : vector<8x128xf32>
    %cst_50 = arith.constant 1.000000e+00 : f32
    %168 = vector.broadcast %cst_50 : f32 to vector<8x128xf32>
    %169 = arith.addf %168, %167 : vector<8x128xf32>
    %170 = arith.divf %168, %169 : vector<8x128xf32>
    %171 = arith.mulf %162, %107 : vector<8x128xf32>
    %172 = arith.mulf %156, %164 : vector<8x128xf32>
    %173 = arith.addf %171, %172 : vector<8x128xf32>
    %174 = math.tanh %173 : vector<8x128xf32>
    %175 = arith.mulf %170, %174 : vector<8x128xf32>
    %176 = arith.truncf %175 : vector<8x128xf32> to vector<8x128xbf16>
    %cst_51 = arith.constant dense<0.000000e+00> : vector<8x512xf32>
    %177 = tpu.matmul %176, %4, %cst_51 {dimension_numbers = #tpu.dot_dimension_numbers<[1], [0], [0], [1], [0, 0, 1, 1], [], []>} : vector<8x128xbf16>, vector<128x512xbf16>, vector<8x512xf32> -> vector<8x512xf32>
    %178 = arith.addf %177, %144 : vector<8x512xf32>
    %179 = vector.broadcast %6 : vector<1x512xf32> to vector<8x512xf32>
    %180 = arith.addf %178, %179 : vector<8x512xf32>
    %181 = vector.extract_strided_slice %180 {offsets = [0, 0], sizes = [8, 128], strides = [1, 1]} : vector<8x512xf32> to vector<8x128xf32>
    %182 = arith.negf %181 : vector<8x128xf32>
    %183 = math.exp %182 : vector<8x128xf32>
    %cst_52 = arith.constant 1.000000e+00 : f32
    %184 = vector.broadcast %cst_52 : f32 to vector<8x128xf32>
    %185 = arith.addf %184, %183 : vector<8x128xf32>
    %186 = arith.divf %184, %185 : vector<8x128xf32>
    %187 = vector.extract_strided_slice %180 {offsets = [0, 128], sizes = [8, 128], strides = [1, 1]} : vector<8x512xf32> to vector<8x128xf32>
    %188 = arith.negf %187 : vector<8x128xf32>
    %189 = math.exp %188 : vector<8x128xf32>
    %cst_53 = arith.constant 1.000000e+00 : f32
    %190 = vector.broadcast %cst_53 : f32 to vector<8x128xf32>
    %191 = arith.addf %190, %189 : vector<8x128xf32>
    %192 = arith.divf %190, %191 : vector<8x128xf32>
    %193 = vector.extract_strided_slice %180 {offsets = [0, 256], sizes = [8, 128], strides = [1, 1]} : vector<8x512xf32> to vector<8x128xf32>
    %194 = math.tanh %193 : vector<8x128xf32>
    %195 = vector.extract_strided_slice %180 {offsets = [0, 384], sizes = [8, 128], strides = [1, 1]} : vector<8x512xf32> to vector<8x128xf32>
    %196 = arith.negf %195 : vector<8x128xf32>
    %197 = math.exp %196 : vector<8x128xf32>
    %cst_54 = arith.constant 1.000000e+00 : f32
    %198 = vector.broadcast %cst_54 : f32 to vector<8x128xf32>
    %199 = arith.addf %198, %197 : vector<8x128xf32>
    %200 = arith.divf %198, %199 : vector<8x128xf32>
    %201 = arith.mulf %192, %137 : vector<8x128xf32>
    %202 = arith.mulf %186, %194 : vector<8x128xf32>
    %203 = arith.addf %201, %202 : vector<8x128xf32>
    %204 = math.tanh %203 : vector<8x128xf32>
    %205 = arith.mulf %200, %204 : vector<8x128xf32>
    %c2_55 = arith.constant 2 : index
    %c0_56 = arith.constant 0 : index
    %c0_57 = arith.constant 0 : index
    %206 = vector.load %arg7[%c2_55, %c0_56, %c0_57] : memref<8x8x128xf32, #tpu.memory_space<vmem>>, vector<1x8x128xf32>
    %207 = vector.shape_cast %206 : vector<1x8x128xf32> to vector<8x128xf32>
    %208 = vector.shape_cast %205 : vector<8x128xf32> to vector<1x8x128xf32>
    tpu.vector_store %arg7[%c2_55, %c0_56, %c0_57], %208 {strides = array<i32>} : memref<8x8x128xf32, #tpu.memory_space<vmem>>, vector<1x8x128xf32>,
    %209 = arith.truncf %205 : vector<8x128xf32> to vector<8x128xbf16>
    %cst_58 = arith.constant dense<0.000000e+00> : vector<8x512xf32>
    %210 = tpu.matmul %209, %5, %cst_58 {dimension_numbers = #tpu.dot_dimension_numbers<[1], [0], [0], [1], [0, 0, 1, 1], [], []>} : vector<8x128xbf16>, vector<128x512xbf16>, vector<8x512xf32> -> vector<8x512xf32>
    %c3 = arith.constant 3 : index
    %c0_59 = arith.constant 0 : index
    %c0_60 = arith.constant 0 : index
    %211 = vector.load %arg2[%c3, %c0_59, %c0_60] : memref<8x8x512xbf16, #tpu.memory_space<vmem>>, vector<1x8x512xbf16>
    %212 = vector.shape_cast %211 : vector<1x8x512xbf16> to vector<8x512xbf16>
    %213 = arith.extf %212 : vector<8x512xbf16> to vector<8x512xf32>
    %214 = arith.truncf %175 : vector<8x128xf32> to vector<8x128xbf16>
    %cst_61 = arith.constant dense<0.000000e+00> : vector<8x512xf32>
    %215 = tpu.matmul %214, %3, %cst_61 {dimension_numbers = #tpu.dot_dimension_numbers<[1], [0], [0], [1], [0, 0, 1, 1], [], []>} : vector<8x128xbf16>, vector<128x512xbf16>, vector<8x512xf32> -> vector<8x512xf32>
    %216 = arith.addf %213, %215 : vector<8x512xf32>
    %217 = vector.extract_strided_slice %216 {offsets = [0, 0], sizes = [8, 128], strides = [1, 1]} : vector<8x512xf32> to vector<8x128xf32>
    %218 = arith.negf %217 : vector<8x128xf32>
    %219 = math.exp %218 : vector<8x128xf32>
    %cst_62 = arith.constant 1.000000e+00 : f32
    %220 = vector.broadcast %cst_62 : f32 to vector<8x128xf32>
    %221 = arith.addf %220, %219 : vector<8x128xf32>
    %222 = arith.divf %220, %221 : vector<8x128xf32>
    %223 = vector.extract_strided_slice %216 {offsets = [0, 128], sizes = [8, 128], strides = [1, 1]} : vector<8x512xf32> to vector<8x128xf32>
    %224 = arith.negf %223 : vector<8x128xf32>
    %225 = math.exp %224 : vector<8x128xf32>
    %cst_63 = arith.constant 1.000000e+00 : f32
    %226 = vector.broadcast %cst_63 : f32 to vector<8x128xf32>
    %227 = arith.addf %226, %225 : vector<8x128xf32>
    %228 = arith.divf %226, %227 : vector<8x128xf32>
    %229 = vector.extract_strided_slice %216 {offsets = [0, 256], sizes = [8, 128], strides = [1, 1]} : vector<8x512xf32> to vector<8x128xf32>
    %230 = math.tanh %229 : vector<8x128xf32>
    %231 = vector.extract_strided_slice %216 {offsets = [0, 384], sizes = [8, 128], strides = [1, 1]} : vector<8x512xf32> to vector<8x128xf32>
    %232 = arith.negf %231 : vector<8x128xf32>
    %233 = math.exp %232 : vector<8x128xf32>
    %cst_64 = arith.constant 1.000000e+00 : f32
    %234 = vector.broadcast %cst_64 : f32 to vector<8x128xf32>
    %235 = arith.addf %234, %233 : vector<8x128xf32>
    %236 = arith.divf %234, %235 : vector<8x128xf32>
    %237 = arith.mulf %228, %173 : vector<8x128xf32>
    %238 = arith.mulf %222, %230 : vector<8x128xf32>
    %239 = arith.addf %237, %238 : vector<8x128xf32>
    %240 = math.tanh %239 : vector<8x128xf32>
    %241 = arith.mulf %236, %240 : vector<8x128xf32>
    %242 = arith.truncf %241 : vector<8x128xf32> to vector<8x128xbf16>
    %cst_65 = arith.constant dense<0.000000e+00> : vector<8x512xf32>
    %243 = tpu.matmul %242, %4, %cst_65 {dimension_numbers = #tpu.dot_dimension_numbers<[1], [0], [0], [1], [0, 0, 1, 1], [], []>} : vector<8x128xbf16>, vector<128x512xbf16>, vector<8x512xf32> -> vector<8x512xf32>
    %244 = arith.addf %243, %210 : vector<8x512xf32>
    %245 = vector.broadcast %6 : vector<1x512xf32> to vector<8x512xf32>
    %246 = arith.addf %244, %245 : vector<8x512xf32>
    %247 = vector.extract_strided_slice %246 {offsets = [0, 0], sizes = [8, 128], strides = [1, 1]} : vector<8x512xf32> to vector<8x128xf32>
    %248 = arith.negf %247 : vector<8x128xf32>
    %249 = math.exp %248 : vector<8x128xf32>
    %cst_66 = arith.constant 1.000000e+00 : f32
    %250 = vector.broadcast %cst_66 : f32 to vector<8x128xf32>
    %251 = arith.addf %250, %249 : vector<8x128xf32>
    %252 = arith.divf %250, %251 : vector<8x128xf32>
    %253 = vector.extract_strided_slice %246 {offsets = [0, 128], sizes = [8, 128], strides = [1, 1]} : vector<8x512xf32> to vector<8x128xf32>
    %254 = arith.negf %253 : vector<8x128xf32>
    %255 = math.exp %254 : vector<8x128xf32>
    %cst_67 = arith.constant 1.000000e+00 : f32
    %256 = vector.broadcast %cst_67 : f32 to vector<8x128xf32>
    %257 = arith.addf %256, %255 : vector<8x128xf32>
    %258 = arith.divf %256, %257 : vector<8x128xf32>
    %259 = vector.extract_strided_slice %246 {offsets = [0, 256], sizes = [8, 128], strides = [1, 1]} : vector<8x512xf32> to vector<8x128xf32>
    %260 = math.tanh %259 : vector<8x128xf32>
    %261 = vector.extract_strided_slice %246 {offsets = [0, 384], sizes = [8, 128], strides = [1, 1]} : vector<8x512xf32> to vector<8x128xf32>
    %262 = arith.negf %261 : vector<8x128xf32>
    %263 = math.exp %262 : vector<8x128xf32>
    %cst_68 = arith.constant 1.000000e+00 : f32
    %264 = vector.broadcast %cst_68 : f32 to vector<8x128xf32>
    %265 = arith.addf %264, %263 : vector<8x128xf32>
    %266 = arith.divf %264, %265 : vector<8x128xf32>
    %267 = arith.mulf %258, %203 : vector<8x128xf32>
    %268 = arith.mulf %252, %260 : vector<8x128xf32>
    %269 = arith.addf %267, %268 : vector<8x128xf32>
    %270 = math.tanh %269 : vector<8x128xf32>
    %271 = arith.mulf %266, %270 : vector<8x128xf32>
    %c3_69 = arith.constant 3 : index
    %c0_70 = arith.constant 0 : index
    %c0_71 = arith.constant 0 : index
    %272 = vector.load %arg7[%c3_69, %c0_70, %c0_71] : memref<8x8x128xf32, #tpu.memory_space<vmem>>, vector<1x8x128xf32>
    %273 = vector.shape_cast %272 : vector<1x8x128xf32> to vector<8x128xf32>
    %274 = vector.shape_cast %271 : vector<8x128xf32> to vector<1x8x128xf32>
    tpu.vector_store %arg7[%c3_69, %c0_70, %c0_71], %274 {strides = array<i32>} : memref<8x8x128xf32, #tpu.memory_space<vmem>>, vector<1x8x128xf32>,
    %275 = arith.truncf %271 : vector<8x128xf32> to vector<8x128xbf16>
    %cst_72 = arith.constant dense<0.000000e+00> : vector<8x512xf32>
    %276 = tpu.matmul %275, %5, %cst_72 {dimension_numbers = #tpu.dot_dimension_numbers<[1], [0], [0], [1], [0, 0, 1, 1], [], []>} : vector<8x128xbf16>, vector<128x512xbf16>, vector<8x512xf32> -> vector<8x512xf32>
    %c4 = arith.constant 4 : index
    %c0_73 = arith.constant 0 : index
    %c0_74 = arith.constant 0 : index
    %277 = vector.load %arg2[%c4, %c0_73, %c0_74] : memref<8x8x512xbf16, #tpu.memory_space<vmem>>, vector<1x8x512xbf16>
    %278 = vector.shape_cast %277 : vector<1x8x512xbf16> to vector<8x512xbf16>
    %279 = arith.extf %278 : vector<8x512xbf16> to vector<8x512xf32>
    %280 = arith.truncf %241 : vector<8x128xf32> to vector<8x128xbf16>
    %cst_75 = arith.constant dense<0.000000e+00> : vector<8x512xf32>
    %281 = tpu.matmul %280, %3, %cst_75 {dimension_numbers = #tpu.dot_dimension_numbers<[1], [0], [0], [1], [0, 0, 1, 1], [], []>} : vector<8x128xbf16>, vector<128x512xbf16>, vector<8x512xf32> -> vector<8x512xf32>
    %282 = arith.addf %279, %281 : vector<8x512xf32>
    %283 = vector.extract_strided_slice %282 {offsets = [0, 0], sizes = [8, 128], strides = [1, 1]} : vector<8x512xf32> to vector<8x128xf32>
    %284 = arith.negf %283 : vector<8x128xf32>
    %285 = math.exp %284 : vector<8x128xf32>
    %cst_76 = arith.constant 1.000000e+00 : f32
    %286 = vector.broadcast %cst_76 : f32 to vector<8x128xf32>
    %287 = arith.addf %286, %285 : vector<8x128xf32>
    %288 = arith.divf %286, %287 : vector<8x128xf32>
    %289 = vector.extract_strided_slice %282 {offsets = [0, 128], sizes = [8, 128], strides = [1, 1]} : vector<8x512xf32> to vector<8x128xf32>
    %290 = arith.negf %289 : vector<8x128xf32>
    %291 = math.exp %290 : vector<8x128xf32>
    %cst_77 = arith.constant 1.000000e+00 : f32
    %292 = vector.broadcast %cst_77 : f32 to vector<8x128xf32>
    %293 = arith.addf %292, %291 : vector<8x128xf32>
    %294 = arith.divf %292, %293 : vector<8x128xf32>
    %295 = vector.extract_strided_slice %282 {offsets = [0, 256], sizes = [8, 128], strides = [1, 1]} : vector<8x512xf32> to vector<8x128xf32>
    %296 = math.tanh %295 : vector<8x128xf32>
    %297 = vector.extract_strided_slice %282 {offsets = [0, 384], sizes = [8, 128], strides = [1, 1]} : vector<8x512xf32> to vector<8x128xf32>
    %298 = arith.negf %297 : vector<8x128xf32>
    %299 = math.exp %298 : vector<8x128xf32>
    %cst_78 = arith.constant 1.000000e+00 : f32
    %300 = vector.broadcast %cst_78 : f32 to vector<8x128xf32>
    %301 = arith.addf %300, %299 : vector<8x128xf32>
    %302 = arith.divf %300, %301 : vector<8x128xf32>
    %303 = arith.mulf %294, %239 : vector<8x128xf32>
    %304 = arith.mulf %288, %296 : vector<8x128xf32>
    %305 = arith.addf %303, %304 : vector<8x128xf32>
    %306 = math.tanh %305 : vector<8x128xf32>
    %307 = arith.mulf %302, %306 : vector<8x128xf32>
    %308 = arith.truncf %307 : vector<8x128xf32> to vector<8x128xbf16>
    %cst_79 = arith.constant dense<0.000000e+00> : vector<8x512xf32>
    %309 = tpu.matmul %308, %4, %cst_79 {dimension_numbers = #tpu.dot_dimension_numbers<[1], [0], [0], [1], [0, 0, 1, 1], [], []>} : vector<8x128xbf16>, vector<128x512xbf16>, vector<8x512xf32> -> vector<8x512xf32>
    %310 = arith.addf %309, %276 : vector<8x512xf32>
    %311 = vector.broadcast %6 : vector<1x512xf32> to vector<8x512xf32>
    %312 = arith.addf %310, %311 : vector<8x512xf32>
    %313 = vector.extract_strided_slice %312 {offsets = [0, 0], sizes = [8, 128], strides = [1, 1]} : vector<8x512xf32> to vector<8x128xf32>
    %314 = arith.negf %313 : vector<8x128xf32>
    %315 = math.exp %314 : vector<8x128xf32>
    %cst_80 = arith.constant 1.000000e+00 : f32
    %316 = vector.broadcast %cst_80 : f32 to vector<8x128xf32>
    %317 = arith.addf %316, %315 : vector<8x128xf32>
    %318 = arith.divf %316, %317 : vector<8x128xf32>
    %319 = vector.extract_strided_slice %312 {offsets = [0, 128], sizes = [8, 128], strides = [1, 1]} : vector<8x512xf32> to vector<8x128xf32>
    %320 = arith.negf %319 : vector<8x128xf32>
    %321 = math.exp %320 : vector<8x128xf32>
    %cst_81 = arith.constant 1.000000e+00 : f32
    %322 = vector.broadcast %cst_81 : f32 to vector<8x128xf32>
    %323 = arith.addf %322, %321 : vector<8x128xf32>
    %324 = arith.divf %322, %323 : vector<8x128xf32>
    %325 = vector.extract_strided_slice %312 {offsets = [0, 256], sizes = [8, 128], strides = [1, 1]} : vector<8x512xf32> to vector<8x128xf32>
    %326 = math.tanh %325 : vector<8x128xf32>
    %327 = vector.extract_strided_slice %312 {offsets = [0, 384], sizes = [8, 128], strides = [1, 1]} : vector<8x512xf32> to vector<8x128xf32>
    %328 = arith.negf %327 : vector<8x128xf32>
    %329 = math.exp %328 : vector<8x128xf32>
    %cst_82 = arith.constant 1.000000e+00 : f32
    %330 = vector.broadcast %cst_82 : f32 to vector<8x128xf32>
    %331 = arith.addf %330, %329 : vector<8x128xf32>
    %332 = arith.divf %330, %331 : vector<8x128xf32>
    %333 = arith.mulf %324, %269 : vector<8x128xf32>
    %334 = arith.mulf %318, %326 : vector<8x128xf32>
    %335 = arith.addf %333, %334 : vector<8x128xf32>
    %336 = math.tanh %335 : vector<8x128xf32>
    %337 = arith.mulf %332, %336 : vector<8x128xf32>
    %c4_83 = arith.constant 4 : index
    %c0_84 = arith.constant 0 : index
    %c0_85 = arith.constant 0 : index
    %338 = vector.load %arg7[%c4_83, %c0_84, %c0_85] : memref<8x8x128xf32, #tpu.memory_space<vmem>>, vector<1x8x128xf32>
    %339 = vector.shape_cast %338 : vector<1x8x128xf32> to vector<8x128xf32>
    %340 = vector.shape_cast %337 : vector<8x128xf32> to vector<1x8x128xf32>
    tpu.vector_store %arg7[%c4_83, %c0_84, %c0_85], %340 {strides = array<i32>} : memref<8x8x128xf32, #tpu.memory_space<vmem>>, vector<1x8x128xf32>,
    %341 = arith.truncf %337 : vector<8x128xf32> to vector<8x128xbf16>
    %cst_86 = arith.constant dense<0.000000e+00> : vector<8x512xf32>
    %342 = tpu.matmul %341, %5, %cst_86 {dimension_numbers = #tpu.dot_dimension_numbers<[1], [0], [0], [1], [0, 0, 1, 1], [], []>} : vector<8x128xbf16>, vector<128x512xbf16>, vector<8x512xf32> -> vector<8x512xf32>
    %c5 = arith.constant 5 : index
    %c0_87 = arith.constant 0 : index
    %c0_88 = arith.constant 0 : index
    %343 = vector.load %arg2[%c5, %c0_87, %c0_88] : memref<8x8x512xbf16, #tpu.memory_space<vmem>>, vector<1x8x512xbf16>
    %344 = vector.shape_cast %343 : vector<1x8x512xbf16> to vector<8x512xbf16>
    %345 = arith.extf %344 : vector<8x512xbf16> to vector<8x512xf32>
    %346 = arith.truncf %307 : vector<8x128xf32> to vector<8x128xbf16>
    %cst_89 = arith.constant dense<0.000000e+00> : vector<8x512xf32>
    %347 = tpu.matmul %346, %3, %cst_89 {dimension_numbers = #tpu.dot_dimension_numbers<[1], [0], [0], [1], [0, 0, 1, 1], [], []>} : vector<8x128xbf16>, vector<128x512xbf16>, vector<8x512xf32> -> vector<8x512xf32>
    %348 = arith.addf %345, %347 : vector<8x512xf32>
    %349 = vector.extract_strided_slice %348 {offsets = [0, 0], sizes = [8, 128], strides = [1, 1]} : vector<8x512xf32> to vector<8x128xf32>
    %350 = arith.negf %349 : vector<8x128xf32>
    %351 = math.exp %350 : vector<8x128xf32>
    %cst_90 = arith.constant 1.000000e+00 : f32
    %352 = vector.broadcast %cst_90 : f32 to vector<8x128xf32>
    %353 = arith.addf %352, %351 : vector<8x128xf32>
    %354 = arith.divf %352, %353 : vector<8x128xf32>
    %355 = vector.extract_strided_slice %348 {offsets = [0, 128], sizes = [8, 128], strides = [1, 1]} : vector<8x512xf32> to vector<8x128xf32>
    %356 = arith.negf %355 : vector<8x128xf32>
    %357 = math.exp %356 : vector<8x128xf32>
    %cst_91 = arith.constant 1.000000e+00 : f32
    %358 = vector.broadcast %cst_91 : f32 to vector<8x128xf32>
    %359 = arith.addf %358, %357 : vector<8x128xf32>
    %360 = arith.divf %358, %359 : vector<8x128xf32>
    %361 = vector.extract_strided_slice %348 {offsets = [0, 256], sizes = [8, 128], strides = [1, 1]} : vector<8x512xf32> to vector<8x128xf32>
    %362 = math.tanh %361 : vector<8x128xf32>
    %363 = vector.extract_strided_slice %348 {offsets = [0, 384], sizes = [8, 128], strides = [1, 1]} : vector<8x512xf32> to vector<8x128xf32>
    %364 = arith.negf %363 : vector<8x128xf32>
    %365 = math.exp %364 : vector<8x128xf32>
    %cst_92 = arith.constant 1.000000e+00 : f32
    %366 = vector.broadcast %cst_92 : f32 to vector<8x128xf32>
    %367 = arith.addf %366, %365 : vector<8x128xf32>
    %368 = arith.divf %366, %367 : vector<8x128xf32>
    %369 = arith.mulf %360, %305 : vector<8x128xf32>
    %370 = arith.mulf %354, %362 : vector<8x128xf32>
    %371 = arith.addf %369, %370 : vector<8x128xf32>
    %372 = math.tanh %371 : vector<8x128xf32>
    %373 = arith.mulf %368, %372 : vector<8x128xf32>
    %374 = arith.truncf %373 : vector<8x128xf32> to vector<8x128xbf16>
    %cst_93 = arith.constant dense<0.000000e+00> : vector<8x512xf32>
    %375 = tpu.matmul %374, %4, %cst_93 {dimension_numbers = #tpu.dot_dimension_numbers<[1], [0], [0], [1], [0, 0, 1, 1], [], []>} : vector<8x128xbf16>, vector<128x512xbf16>, vector<8x512xf32> -> vector<8x512xf32>
    %376 = arith.addf %375, %342 : vector<8x512xf32>
    %377 = vector.broadcast %6 : vector<1x512xf32> to vector<8x512xf32>
    %378 = arith.addf %376, %377 : vector<8x512xf32>
    %379 = vector.extract_strided_slice %378 {offsets = [0, 0], sizes = [8, 128], strides = [1, 1]} : vector<8x512xf32> to vector<8x128xf32>
    %380 = arith.negf %379 : vector<8x128xf32>
    %381 = math.exp %380 : vector<8x128xf32>
    %cst_94 = arith.constant 1.000000e+00 : f32
    %382 = vector.broadcast %cst_94 : f32 to vector<8x128xf32>
    %383 = arith.addf %382, %381 : vector<8x128xf32>
    %384 = arith.divf %382, %383 : vector<8x128xf32>
    %385 = vector.extract_strided_slice %378 {offsets = [0, 128], sizes = [8, 128], strides = [1, 1]} : vector<8x512xf32> to vector<8x128xf32>
    %386 = arith.negf %385 : vector<8x128xf32>
    %387 = math.exp %386 : vector<8x128xf32>
    %cst_95 = arith.constant 1.000000e+00 : f32
    %388 = vector.broadcast %cst_95 : f32 to vector<8x128xf32>
    %389 = arith.addf %388, %387 : vector<8x128xf32>
    %390 = arith.divf %388, %389 : vector<8x128xf32>
    %391 = vector.extract_strided_slice %378 {offsets = [0, 256], sizes = [8, 128], strides = [1, 1]} : vector<8x512xf32> to vector<8x128xf32>
    %392 = math.tanh %391 : vector<8x128xf32>
    %393 = vector.extract_strided_slice %378 {offsets = [0, 384], sizes = [8, 128], strides = [1, 1]} : vector<8x512xf32> to vector<8x128xf32>
    %394 = arith.negf %393 : vector<8x128xf32>
    %395 = math.exp %394 : vector<8x128xf32>
    %cst_96 = arith.constant 1.000000e+00 : f32
    %396 = vector.broadcast %cst_96 : f32 to vector<8x128xf32>
    %397 = arith.addf %396, %395 : vector<8x128xf32>
    %398 = arith.divf %396, %397 : vector<8x128xf32>
    %399 = arith.mulf %390, %335 : vector<8x128xf32>
    %400 = arith.mulf %384, %392 : vector<8x128xf32>
    %401 = arith.addf %399, %400 : vector<8x128xf32>
    %402 = math.tanh %401 : vector<8x128xf32>
    %403 = arith.mulf %398, %402 : vector<8x128xf32>
    %c5_97 = arith.constant 5 : index
    %c0_98 = arith.constant 0 : index
    %c0_99 = arith.constant 0 : index
    %404 = vector.load %arg7[%c5_97, %c0_98, %c0_99] : memref<8x8x128xf32, #tpu.memory_space<vmem>>, vector<1x8x128xf32>
    %405 = vector.shape_cast %404 : vector<1x8x128xf32> to vector<8x128xf32>
    %406 = vector.shape_cast %403 : vector<8x128xf32> to vector<1x8x128xf32>
    tpu.vector_store %arg7[%c5_97, %c0_98, %c0_99], %406 {strides = array<i32>} : memref<8x8x128xf32, #tpu.memory_space<vmem>>, vector<1x8x128xf32>,
    %407 = arith.truncf %403 : vector<8x128xf32> to vector<8x128xbf16>
    %cst_100 = arith.constant dense<0.000000e+00> : vector<8x512xf32>
    %408 = tpu.matmul %407, %5, %cst_100 {dimension_numbers = #tpu.dot_dimension_numbers<[1], [0], [0], [1], [0, 0, 1, 1], [], []>} : vector<8x128xbf16>, vector<128x512xbf16>, vector<8x512xf32> -> vector<8x512xf32>
    %c6 = arith.constant 6 : index
    %c0_101 = arith.constant 0 : index
    %c0_102 = arith.constant 0 : index
    %409 = vector.load %arg2[%c6, %c0_101, %c0_102] : memref<8x8x512xbf16, #tpu.memory_space<vmem>>, vector<1x8x512xbf16>
    %410 = vector.shape_cast %409 : vector<1x8x512xbf16> to vector<8x512xbf16>
    %411 = arith.extf %410 : vector<8x512xbf16> to vector<8x512xf32>
    %412 = arith.truncf %373 : vector<8x128xf32> to vector<8x128xbf16>
    %cst_103 = arith.constant dense<0.000000e+00> : vector<8x512xf32>
    %413 = tpu.matmul %412, %3, %cst_103 {dimension_numbers = #tpu.dot_dimension_numbers<[1], [0], [0], [1], [0, 0, 1, 1], [], []>} : vector<8x128xbf16>, vector<128x512xbf16>, vector<8x512xf32> -> vector<8x512xf32>
    %414 = arith.addf %411, %413 : vector<8x512xf32>
    %415 = vector.extract_strided_slice %414 {offsets = [0, 0], sizes = [8, 128], strides = [1, 1]} : vector<8x512xf32> to vector<8x128xf32>
    %416 = arith.negf %415 : vector<8x128xf32>
    %417 = math.exp %416 : vector<8x128xf32>
    %cst_104 = arith.constant 1.000000e+00 : f32
    %418 = vector.broadcast %cst_104 : f32 to vector<8x128xf32>
    %419 = arith.addf %418, %417 : vector<8x128xf32>
    %420 = arith.divf %418, %419 : vector<8x128xf32>
    %421 = vector.extract_strided_slice %414 {offsets = [0, 128], sizes = [8, 128], strides = [1, 1]} : vector<8x512xf32> to vector<8x128xf32>
    %422 = arith.negf %421 : vector<8x128xf32>
    %423 = math.exp %422 : vector<8x128xf32>
    %cst_105 = arith.constant 1.000000e+00 : f32
    %424 = vector.broadcast %cst_105 : f32 to vector<8x128xf32>
    %425 = arith.addf %424, %423 : vector<8x128xf32>
    %426 = arith.divf %424, %425 : vector<8x128xf32>
    %427 = vector.extract_strided_slice %414 {offsets = [0, 256], sizes = [8, 128], strides = [1, 1]} : vector<8x512xf32> to vector<8x128xf32>
    %428 = math.tanh %427 : vector<8x128xf32>
    %429 = vector.extract_strided_slice %414 {offsets = [0, 384], sizes = [8, 128], strides = [1, 1]} : vector<8x512xf32> to vector<8x128xf32>
    %430 = arith.negf %429 : vector<8x128xf32>
    %431 = math.exp %430 : vector<8x128xf32>
    %cst_106 = arith.constant 1.000000e+00 : f32
    %432 = vector.broadcast %cst_106 : f32 to vector<8x128xf32>
    %433 = arith.addf %432, %431 : vector<8x128xf32>
    %434 = arith.divf %432, %433 : vector<8x128xf32>
    %435 = arith.mulf %426, %371 : vector<8x128xf32>
    %436 = arith.mulf %420, %428 : vector<8x128xf32>
    %437 = arith.addf %435, %436 : vector<8x128xf32>
    %438 = math.tanh %437 : vector<8x128xf32>
    %439 = arith.mulf %434, %438 : vector<8x128xf32>
    %440 = arith.truncf %439 : vector<8x128xf32> to vector<8x128xbf16>
    %cst_107 = arith.constant dense<0.000000e+00> : vector<8x512xf32>
    %441 = tpu.matmul %440, %4, %cst_107 {dimension_numbers = #tpu.dot_dimension_numbers<[1], [0], [0], [1], [0, 0, 1, 1], [], []>} : vector<8x128xbf16>, vector<128x512xbf16>, vector<8x512xf32> -> vector<8x512xf32>
    %442 = arith.addf %441, %408 : vector<8x512xf32>
    %443 = vector.broadcast %6 : vector<1x512xf32> to vector<8x512xf32>
    %444 = arith.addf %442, %443 : vector<8x512xf32>
    %445 = vector.extract_strided_slice %444 {offsets = [0, 0], sizes = [8, 128], strides = [1, 1]} : vector<8x512xf32> to vector<8x128xf32>
    %446 = arith.negf %445 : vector<8x128xf32>
    %447 = math.exp %446 : vector<8x128xf32>
    %cst_108 = arith.constant 1.000000e+00 : f32
    %448 = vector.broadcast %cst_108 : f32 to vector<8x128xf32>
    %449 = arith.addf %448, %447 : vector<8x128xf32>
    %450 = arith.divf %448, %449 : vector<8x128xf32>
    %451 = vector.extract_strided_slice %444 {offsets = [0, 128], sizes = [8, 128], strides = [1, 1]} : vector<8x512xf32> to vector<8x128xf32>
    %452 = arith.negf %451 : vector<8x128xf32>
    %453 = math.exp %452 : vector<8x128xf32>
    %cst_109 = arith.constant 1.000000e+00 : f32
    %454 = vector.broadcast %cst_109 : f32 to vector<8x128xf32>
    %455 = arith.addf %454, %453 : vector<8x128xf32>
    %456 = arith.divf %454, %455 : vector<8x128xf32>
    %457 = vector.extract_strided_slice %444 {offsets = [0, 256], sizes = [8, 128], strides = [1, 1]} : vector<8x512xf32> to vector<8x128xf32>
    %458 = math.tanh %457 : vector<8x128xf32>
    %459 = vector.extract_strided_slice %444 {offsets = [0, 384], sizes = [8, 128], strides = [1, 1]} : vector<8x512xf32> to vector<8x128xf32>
    %460 = arith.negf %459 : vector<8x128xf32>
    %461 = math.exp %460 : vector<8x128xf32>
    %cst_110 = arith.constant 1.000000e+00 : f32
    %462 = vector.broadcast %cst_110 : f32 to vector<8x128xf32>
    %463 = arith.addf %462, %461 : vector<8x128xf32>
    %464 = arith.divf %462, %463 : vector<8x128xf32>
    %465 = arith.mulf %456, %401 : vector<8x128xf32>
    %466 = arith.mulf %450, %458 : vector<8x128xf32>
    %467 = arith.addf %465, %466 : vector<8x128xf32>
    %468 = math.tanh %467 : vector<8x128xf32>
    %469 = arith.mulf %464, %468 : vector<8x128xf32>
    %c6_111 = arith.constant 6 : index
    %c0_112 = arith.constant 0 : index
    %c0_113 = arith.constant 0 : index
    %470 = vector.load %arg7[%c6_111, %c0_112, %c0_113] : memref<8x8x128xf32, #tpu.memory_space<vmem>>, vector<1x8x128xf32>
    %471 = vector.shape_cast %470 : vector<1x8x128xf32> to vector<8x128xf32>
    %472 = vector.shape_cast %469 : vector<8x128xf32> to vector<1x8x128xf32>
    tpu.vector_store %arg7[%c6_111, %c0_112, %c0_113], %472 {strides = array<i32>} : memref<8x8x128xf32, #tpu.memory_space<vmem>>, vector<1x8x128xf32>,
    %473 = arith.truncf %469 : vector<8x128xf32> to vector<8x128xbf16>
    %cst_114 = arith.constant dense<0.000000e+00> : vector<8x512xf32>
    %474 = tpu.matmul %473, %5, %cst_114 {dimension_numbers = #tpu.dot_dimension_numbers<[1], [0], [0], [1], [0, 0, 1, 1], [], []>} : vector<8x128xbf16>, vector<128x512xbf16>, vector<8x512xf32> -> vector<8x512xf32>
    %c7 = arith.constant 7 : index
    %c0_115 = arith.constant 0 : index
    %c0_116 = arith.constant 0 : index
    %475 = vector.load %arg2[%c7, %c0_115, %c0_116] : memref<8x8x512xbf16, #tpu.memory_space<vmem>>, vector<1x8x512xbf16>
    %476 = vector.shape_cast %475 : vector<1x8x512xbf16> to vector<8x512xbf16>
    %477 = arith.extf %476 : vector<8x512xbf16> to vector<8x512xf32>
    %478 = arith.truncf %439 : vector<8x128xf32> to vector<8x128xbf16>
    %cst_117 = arith.constant dense<0.000000e+00> : vector<8x512xf32>
    %479 = tpu.matmul %478, %3, %cst_117 {dimension_numbers = #tpu.dot_dimension_numbers<[1], [0], [0], [1], [0, 0, 1, 1], [], []>} : vector<8x128xbf16>, vector<128x512xbf16>, vector<8x512xf32> -> vector<8x512xf32>
    %480 = arith.addf %477, %479 : vector<8x512xf32>
    %481 = vector.extract_strided_slice %480 {offsets = [0, 0], sizes = [8, 128], strides = [1, 1]} : vector<8x512xf32> to vector<8x128xf32>
    %482 = arith.negf %481 : vector<8x128xf32>
    %483 = math.exp %482 : vector<8x128xf32>
    %cst_118 = arith.constant 1.000000e+00 : f32
    %484 = vector.broadcast %cst_118 : f32 to vector<8x128xf32>
    %485 = arith.addf %484, %483 : vector<8x128xf32>
    %486 = arith.divf %484, %485 : vector<8x128xf32>
    %487 = vector.extract_strided_slice %480 {offsets = [0, 128], sizes = [8, 128], strides = [1, 1]} : vector<8x512xf32> to vector<8x128xf32>
    %488 = arith.negf %487 : vector<8x128xf32>
    %489 = math.exp %488 : vector<8x128xf32>
    %cst_119 = arith.constant 1.000000e+00 : f32
    %490 = vector.broadcast %cst_119 : f32 to vector<8x128xf32>
    %491 = arith.addf %490, %489 : vector<8x128xf32>
    %492 = arith.divf %490, %491 : vector<8x128xf32>
    %493 = vector.extract_strided_slice %480 {offsets = [0, 256], sizes = [8, 128], strides = [1, 1]} : vector<8x512xf32> to vector<8x128xf32>
    %494 = math.tanh %493 : vector<8x128xf32>
    %495 = vector.extract_strided_slice %480 {offsets = [0, 384], sizes = [8, 128], strides = [1, 1]} : vector<8x512xf32> to vector<8x128xf32>
    %496 = arith.negf %495 : vector<8x128xf32>
    %497 = math.exp %496 : vector<8x128xf32>
    %cst_120 = arith.constant 1.000000e+00 : f32
    %498 = vector.broadcast %cst_120 : f32 to vector<8x128xf32>
    %499 = arith.addf %498, %497 : vector<8x128xf32>
    %500 = arith.divf %498, %499 : vector<8x128xf32>
    %501 = arith.mulf %492, %437 : vector<8x128xf32>
    %502 = arith.mulf %486, %494 : vector<8x128xf32>
    %503 = arith.addf %501, %502 : vector<8x128xf32>
    %504 = math.tanh %503 : vector<8x128xf32>
    %505 = arith.mulf %500, %504 : vector<8x128xf32>
    %506 = arith.truncf %505 : vector<8x128xf32> to vector<8x128xbf16>
    %cst_121 = arith.constant dense<0.000000e+00> : vector<8x512xf32>
    %507 = tpu.matmul %506, %4, %cst_121 {dimension_numbers = #tpu.dot_dimension_numbers<[1], [0], [0], [1], [0, 0, 1, 1], [], []>} : vector<8x128xbf16>, vector<128x512xbf16>, vector<8x512xf32> -> vector<8x512xf32>
    %508 = arith.addf %507, %474 : vector<8x512xf32>
    %509 = vector.broadcast %6 : vector<1x512xf32> to vector<8x512xf32>
    %510 = arith.addf %508, %509 : vector<8x512xf32>
    %511 = vector.extract_strided_slice %510 {offsets = [0, 0], sizes = [8, 128], strides = [1, 1]} : vector<8x512xf32> to vector<8x128xf32>
    %512 = arith.negf %511 : vector<8x128xf32>
    %513 = math.exp %512 : vector<8x128xf32>
    %cst_122 = arith.constant 1.000000e+00 : f32
    %514 = vector.broadcast %cst_122 : f32 to vector<8x128xf32>
    %515 = arith.addf %514, %513 : vector<8x128xf32>
    %516 = arith.divf %514, %515 : vector<8x128xf32>
    %517 = vector.extract_strided_slice %510 {offsets = [0, 128], sizes = [8, 128], strides = [1, 1]} : vector<8x512xf32> to vector<8x128xf32>
    %518 = arith.negf %517 : vector<8x128xf32>
    %519 = math.exp %518 : vector<8x128xf32>
    %cst_123 = arith.constant 1.000000e+00 : f32
    %520 = vector.broadcast %cst_123 : f32 to vector<8x128xf32>
    %521 = arith.addf %520, %519 : vector<8x128xf32>
    %522 = arith.divf %520, %521 : vector<8x128xf32>
    %523 = vector.extract_strided_slice %510 {offsets = [0, 256], sizes = [8, 128], strides = [1, 1]} : vector<8x512xf32> to vector<8x128xf32>
    %524 = math.tanh %523 : vector<8x128xf32>
    %525 = vector.extract_strided_slice %510 {offsets = [0, 384], sizes = [8, 128], strides = [1, 1]} : vector<8x512xf32> to vector<8x128xf32>
    %526 = arith.negf %525 : vector<8x128xf32>
    %527 = math.exp %526 : vector<8x128xf32>
    %cst_124 = arith.constant 1.000000e+00 : f32
    %528 = vector.broadcast %cst_124 : f32 to vector<8x128xf32>
    %529 = arith.addf %528, %527 : vector<8x128xf32>
    %530 = arith.divf %528, %529 : vector<8x128xf32>
    %531 = arith.mulf %522, %467 : vector<8x128xf32>
    %532 = arith.mulf %516, %524 : vector<8x128xf32>
    %533 = arith.addf %531, %532 : vector<8x128xf32>
    %534 = math.tanh %533 : vector<8x128xf32>
    %535 = arith.mulf %530, %534 : vector<8x128xf32>
    %c7_125 = arith.constant 7 : index
    %c0_126 = arith.constant 0 : index
    %c0_127 = arith.constant 0 : index
    %536 = vector.load %arg7[%c7_125, %c0_126, %c0_127] : memref<8x8x128xf32, #tpu.memory_space<vmem>>, vector<1x8x128xf32>
    %537 = vector.shape_cast %536 : vector<1x8x128xf32> to vector<8x128xf32>
    %538 = vector.shape_cast %535 : vector<8x128xf32> to vector<1x8x128xf32>
    tpu.vector_store %arg7[%c7_125, %c0_126, %c0_127], %538 {strides = array<i32>} : memref<8x8x128xf32, #tpu.memory_space<vmem>>, vector<1x8x128xf32>,
    %c0_128 = arith.constant 0 : index
    %c0_129 = arith.constant 0 : index
    %539 = vector.load %arg8[%c0_128, %c0_129] : memref<8x128xf32, #tpu.memory_space<vmem>>, vector<8x128xf32>
    tpu.vector_store %arg8[%c0_128, %c0_129], %505 {strides = array<i32>} : memref<8x128xf32, #tpu.memory_space<vmem>>, vector<8x128xf32>,
    %c0_130 = arith.constant 0 : index
    %c0_131 = arith.constant 0 : index
    %540 = vector.load %arg9[%c0_130, %c0_131] : memref<8x128xf32, #tpu.memory_space<vmem>>, vector<8x128xf32>
    tpu.vector_store %arg9[%c0_130, %c0_131], %503 {strides = array<i32>} : memref<8x128xf32, #tpu.memory_space<vmem>>, vector<8x128xf32>,
    %c0_132 = arith.constant 0 : index
    %c0_133 = arith.constant 0 : index
    %541 = vector.load %arg10[%c0_132, %c0_133] : memref<8x128xf32, #tpu.memory_space<vmem>>, vector<8x128xf32>
    tpu.vector_store %arg10[%c0_132, %c0_133], %535 {strides = array<i32>} : memref<8x128xf32, #tpu.memory_space<vmem>>, vector<8x128xf32>,
    %c0_134 = arith.constant 0 : index
    %c0_135 = arith.constant 0 : index
    %542 = vector.load %arg11[%c0_134, %c0_135] : memref<8x128xf32, #tpu.memory_space<vmem>>, vector<8x128xf32>
    tpu.vector_store %arg11[%c0_134, %c0_135], %533 {strides = array<i32>} : memref<8x128xf32, #tpu.memory_space<vmem>>, vector<8x128xf32>,
    return
  }
  func.func @transform_0(%arg0: i32, %arg1: i32) -> (i32, i32, i32) {
    %c0_i32 = arith.constant 0 : i32
    %c0_i32_0 = arith.constant 0 : i32
    return %arg1, %arg0, %c0_i32 : i32, i32, i32
  }
  func.func @transform_1(%arg0: i32, %arg1: i32) -> (i32, i32) {
    %c0_i32 = arith.constant 0 : i32
    %c0_i32_0 = arith.constant 0 : i32
    %c0_i32_1 = arith.constant 0 : i32
    return %c0_i32, %c0_i32_0 : i32, i32
  }
  func.func @transform_2(%arg0: i32, %arg1: i32) -> (i32, i32) {
    %c0_i32 = arith.constant 0 : i32
    %c0_i32_0 = arith.constant 0 : i32
    %c0_i32_1 = arith.constant 0 : i32
    return %c0_i32, %c0_i32_0 : i32, i32
  }
  func.func @transform_3(%arg0: i32, %arg1: i32) -> (i32, i32) {
    %c0_i32 = arith.constant 0 : i32
    %c0_i32_0 = arith.constant 0 : i32
    %c0_i32_1 = arith.constant 0 : i32
    return %c0_i32, %c0_i32_0 : i32, i32
  }
  func.func @transform_4(%arg0: i32, %arg1: i32) -> (i32, i32) {
    %c0_i32 = arith.constant 0 : i32
    %c0_i32_0 = arith.constant 0 : i32
    %c0_i32_1 = arith.constant 0 : i32
    return %c0_i32, %c0_i32_0 : i32, i32
  }
  func.func @transform_5(%arg0: i32, %arg1: i32) -> (i32, i32, i32) {
    %c0_i32 = arith.constant 0 : i32
    %c0_i32_0 = arith.constant 0 : i32
    return %arg1, %arg0, %c0_i32 : i32, i32, i32
  }
}

</mosaic_0001>

<bundles_post_ra>
// kernel: packed_lstm_lm_forward.5
= control target key start
LH: loop header
LB: loop body
LE: loop exit
PB: predicated region body
PF: predicated region fallthrough
CT: control target
= control target key end

     0   :  { %v295_v2 = vmov 0   ;;  %s394_s0 = inlined_call_operand.vmem [shape: f32[32,128], index: 0, kind: input, shape index: {}]   ;;  %s395_s1 = inlined_call_operand.vmem [shape: bf16[128,256], index: 1, kind: input, shape index: {}]   ;;  %s396_s2 = inlined_call_operand.vmem [shape: f32[1,256], index: 2, kind: input, shape index: {}]   ;;  %s397_s3 = inlined_call_operand.hbm [shape: f32[32,256], index: 3, kind: output, shape index: {}]  }
   0x1   :  { %v247_v0 = vld [vmem:[%s395_s1 + $0x4] ss:$8 sps:$4 sm:$0xff]   ;;  %v249_v1 = vld [vmem:[%s395_s1] ss:$8 sps:$4 sm:$0xff]   ;;  %166 = vmatprep.mubr.bf16.mxu0 %v295_v2  ;;  %176 = vmatprep.mubr.bf16.mxu1 %v295_v2  ;;  %v250_v3 = vld [vmem:[%s395_s1 + $0x14] ss:$8 sps:$4 sm:$0xff]  }
   0x2   :  { %134 = vmatprep.subr.bf16.mxu0 %v247_v0  ;;  %227 = vmatprep.subr.bf16.mxu1 %v247_v0  ;;  %v252_v4 = vld [vmem:[%s395_s1 + $0x10] ss:$8 sps:$4 sm:$0xff]   ;;  %v253_v5 = vld [vmem:[%s395_s1 + $0x24] ss:$8 sps:$4 sm:$0xff]   ;;  %v255_v6 = vld [vmem:[%s395_s1 + $0x20] ss:$8 sps:$4 sm:$0xff]  }
   0x3   :  { %135 = vmatpush1.bf16.msra.mxu0 %v249_v1  ;;  %235 = vmatpush1.bf16.msra.mxu1 %v249_v1  ;;  %v256_v7 = vld [vmem:[%s395_s1 + $0x34] ss:$8 sps:$4 sm:$0xff]   ;;  %v258_v8 = vld [vmem:[%s395_s1 + $0x30] ss:$8 sps:$4 sm:$0xff]   ;;  %v259_v9 = vld [vmem:[%s395_s1 + $0x44] ss:$8 sps:$4 sm:$0xff]  }
   0x4   :  { %136 = vmatprep.subr.bf16.mxu0 %v250_v3  ;;  %228 = vmatprep.subr.bf16.mxu1 %v250_v3 }
   0x7   :  { %137 = vmatpush1.bf16.msra.mxu0 %v252_v4  ;;  %236 = vmatpush1.bf16.msra.mxu1 %v252_v4 }
   0x8   :  { %138 = vmatprep.subr.bf16.mxu0 %v253_v5  ;;  %229 = vmatprep.subr.bf16.mxu1 %v253_v5 }
   0xb   :  { %139 = vmatpush1.bf16.msra.mxu0 %v255_v6  ;;  %237 = vmatpush1.bf16.msra.mxu1 %v255_v6 }
   0xc   :  { %140 = vmatprep.subr.bf16.mxu0 %v256_v7  ;;  %230 = vmatprep.subr.bf16.mxu1 %v256_v7 }
   0xd   :  { %8 = vsyncpa [#allocation3], 0  ;;  %v261_v10 = vld [vmem:[%s395_s1 + $0x40] ss:$8 sps:$4 sm:$0xff]   ;;  %v262_v11 = vld [vmem:[%s395_s1 + $0x54] ss:$8 sps:$4 sm:$0xff]   ;;  %v44_v27 = vlaneseq }
   0xe   :  { %v264_v12 = vld [vmem:[%s395_s1 + $0x50] ss:$8 sps:$4 sm:$0xff]   ;;  %v265_v13 = vld [vmem:[%s395_s1 + $0x64] ss:$8 sps:$4 sm:$0xff]   ;;  %v267_v14 = vld [vmem:[%s395_s1 + $0x60] ss:$8 sps:$4 sm:$0xff]  }
   0xf   :  { %141 = vmatpush1.bf16.msra.mxu0 %v258_v8  ;;  %238 = vmatpush1.bf16.msra.mxu1 %v258_v8  ;;  %v16_v15 = vld [vmem:[%s394_s0] sm:$0xff]  ;;  %v17_v16 = vld [vmem:[%s394_s0 + $0x8] sm:$0xff]  ;;  %v18_v17 = vld [vmem:[%s394_s0 + $0x10] sm:$0xff]  ;;  %v45_v28 = vshrl.u32 %v44_v27, 7 }
  0x10   :  { %142 = vmatprep.subr.bf16.mxu0 %v259_v9  ;;  %231 = vmatprep.subr.bf16.mxu1 %v259_v9  ;;  %v19_v18 = vld [vmem:[%s394_s0 + $0x18] sm:$0xff]  ;;  %v20_v20 = vmax.f32 %v16_v15, 0.0  ;;  %v21_v21 = vmax.f32 %v17_v16, 0.0  ;;  %v22_v22 = vmax.f32 %v18_v17, 0.0  ;;  %v42_v30 = vld [vmem:[%s396_s2] sm:$0x3] }
  0x11   :  { %v268_v19 = vld [vmem:[%s395_s1 + $0x74] ss:$8 sps:$4 sm:$0xff]   ;;  %v23_v23 = vmax.f32 %v19_v18, 0.0  ;;  %v270_v24 = vld [vmem:[%s395_s1 + $0x70] ss:$8 sps:$4 sm:$0xff]   ;;  %v46_v29 = vsub.s32 0, %v45_v28 }
  0x12   :  { %v24_v25 = vpack.c.bf16 %v21_v21, %v20_v20  ;;  %v50_v31 = vsub.s32 1, %v45_v28  ;;  %s296_s1 = smov [#allocation2]  }
  0x13   :  { %143 = vmatpush1.bf16.msra.mxu0 %v261_v10  ;;  %239 = vmatpush1.bf16.msra.mxu1 %v261_v10  ;;  %v25_v26 = vpack.c.bf16 %v23_v23, %v22_v22  ;;  %v47_v32 = vrot.slane %v42_v30, %v46_v29  ;;  %s200_s26 = sshll.u32 %s296_s1, 4  ;;  %s201_s26 = int_to_ptr.vmem [resolvable:$true] %s200_s26 }
  0x14   :  { %144 = vmatprep.subr.bf16.mxu0 %v262_v11  ;;  %232 = vmatprep.subr.bf16.mxu1 %v262_v11  ;;  %v51_v33 = vrot.slane %v42_v30, %v50_v31  ;;  %s271_s2 = scalar_lea.vmem %s201_s26, 1024  ;;  %p276_p1 = scmp.lt.s32.totalorder %s201_s26, %s201_s26 }
  0x15   :  { %p272_p0 = scmp.ne.s32.totalorder %s201_s26, %s271_s2  ;;  %p277_p2 = scmp.lt.s32.totalorder %s271_s2, %s271_s2 }
  0x17   :  { %145 = vmatpush1.bf16.msra.mxu0 %v264_v12  ;;  %240 = vmatpush1.bf16.msra.mxu1 %v264_v12  ;;  %p278_p3 = por %p277_p2, %p276_p1 }
  0x18   :  { %146 = vmatprep.subr.bf16.mxu0 %v265_v13  ;;  %233 = vmatprep.subr.bf16.mxu1 %v265_v13 }
  0x19   :  { %p279_p4 = pnand %p278_p3, %p272_p0 }
  0x1b   :  { %147 = vmatpush1.bf16.msra.mxu0 %v267_v14  ;;  %241 = vmatpush1.bf16.msra.mxu1 %v267_v14 }
  0x1c   :  { %148 = vmatprep.subr.bf16.mxu0 %v268_v19  ;;  %234 = vmatprep.subr.bf16.mxu1 %v268_v19 }
  0x1f   :  { %149 = vmatpush1.bf16.msra.mxu0 %v270_v24  ;;  %242 = vmatpush1.bf16.msra.mxu1 %v270_v24 }
  0x22   :  { %167 = vmatmul.mubr.bf16.vlgmr.msra.gmra.mrb[0].mxu0 %v24_v25  ;;  %177 = vmatmul.mubr.bf16.vlgmr.msra.gmra.mrb[0].mxu1 %v25_v26 }
  0xf5   :  { %v168_v34 = vpop.f32.mrb[0].mxu0  ;;  %v178_v35 = vpop.f32.mrb[0].mxu1 }
  0xf6   :  { %v169_v36 = vadd.f32 %v168_v34, %v47_v32  ;;  %v179_v37 = vadd.f32 %v178_v35, %v47_v32  ;;  %v170_v38 = vpop.f32.mrb[1].mxu0  ;;  %v180_v39 = vpop.f32.mrb[1].mxu1 }
  0xf7   :  { %v171_v40 = vadd.f32 %v170_v38, %v51_v33  ;;  %v181_v41 = vadd.f32 %v180_v39, %v51_v33  ;;  %v172_v42 = vpop.f32.mrb[2].mxu0  ;;  %v182_v43 = vpop.f32.mrb[2].mxu1 }
  0xf8   :  { %187 = vst [vmem:[#allocation2] sm:$0xff] %v169_v36  ;;  %191 = vst [vmem:[#allocation2 + $0x20] sm:$0xff] %v179_v37  ;;  %v173_v44 = vadd.f32 %v172_v42, %v47_v32  ;;  %v183_v45 = vadd.f32 %v182_v43, %v47_v32  ;;  %v174_v46 = vpop.f32.mrb[3].mxu0  ;;  %v184_v47 = vpop.f32.mrb[3].mxu1 }
  0xf9   :  { %188 = vst [vmem:[#allocation2 + $0x8] sm:$0xff] %v171_v40  ;;  %192 = vst [vmem:[#allocation2 + $0x28] sm:$0xff] %v181_v41  ;;  %v175_v48 = vadd.f32 %v174_v46, %v51_v33  ;;  %v185_v49 = vadd.f32 %v184_v47, %v51_v33 }
  0xfa   :  { %189 = vst [vmem:[#allocation2 + $0x10] sm:$0xff] %v173_v44  ;;  %193 = vst [vmem:[#allocation2 + $0x30] sm:$0xff] %v183_v45 }
  0xfb   :  { %190 = vst [vmem:[#allocation2 + $0x18] sm:$0xff] %v175_v48  ;;  %194 = vst [vmem:[#allocation2 + $0x38] sm:$0xff] %v185_v49 }
  0xfc   :  { %282 = shalt.err (!%p279_p4)
}
  0xfd   :  { %s283_s29 = scalar_lea.hbm %s397_s3, 1024 }
  0xfe   :  { %p284_p5 = scmp.ne.s32.totalorder %s397_s3, %s283_s29  ;;  %p287_p6 = scmp.lt.u32.totalorder %s283_s29, %s397_s3 }
 0x100   :  { %p289_p7 = pnand %p287_p6, %p284_p5 }
 0x102   :  { %292 = shalt.err (!%p289_p7)
}
 0x103   :  { %s297_s7 = smov 256   ;;  %s298_s8 = smov 16  }
 0x104   :  { %206 = dma.vmem_to_hbm [thread:$0]  %s201_s26, 1024, %s397_s3, [#allocation3], %s297_s7, %s297_s7, %s298_s8  }
 0x105   :  { %293 = dma.done.wait [#allocation3], 1024  }
 0x106   :  { %294 = vsyncadd [#allocation3], 4294966272 }
 0x107   :  { %210 = vsyncpa [#allocation3], 1 }

// kernel: packed_lstm_lm_forward.3
= control target key start
LH: loop header
LB: loop body
LE: loop exit
PB: predicated region body
PF: predicated region fallthrough
CT: control target
= control target key end

     0   :  { %v616_v1 = vmov 0   ;;  %v61_v45 = vlaneseq  ;;  %s856_s1 = inlined_call_operand.vmem [shape: bf16[128,512], index: 1, kind: input, shape index: {}]   ;;  %s857_s0 = inlined_call_operand.vmem [shape: f32[64,128], index: 0, kind: input, shape index: {}]   ;;  %s858_s2 = inlined_call_operand.vmem [shape: f32[1,512], index: 2, kind: input, shape index: {}]   ;;  %s859_s3 = inlined_call_operand.vmem [shape: bf16[64,512], index: 3, kind: output, shape index: {}]  }
   0x1   :  { %v568_v0 = vld [vmem:[%s856_s1 + $0x4] ss:$16 sps:$4 sm:$0xff]   ;;  %273 = vmatprep.mubr.bf16.mxu0 %v616_v1  ;;  %346 = vmatprep.mubr.bf16.mxu1 %v616_v1  ;;  %v570_v2 = vld [vmem:[%s856_s1 + $0xc] ss:$16 sps:$4 sm:$0xff]   ;;  %v572_v3 = vld [vmem:[%s856_s1] ss:$16 sps:$4 sm:$0xff]  }
   0x2   :  { %241 = vmatprep.subr.bf16.mxu0 %v568_v0  ;;  %v573_v4 = vld [vmem:[%s856_s1 + $0x8] ss:$16 sps:$4 sm:$0xff]   ;;  %314 = vmatprep.subr.bf16.mxu1 %v570_v2  ;;  %v574_v5 = vld [vmem:[%s856_s1 + $0x24] ss:$16 sps:$4 sm:$0xff]   ;;  %v576_v6 = vld [vmem:[%s856_s1 + $0x2c] ss:$16 sps:$4 sm:$0xff]  }
   0x3   :  { %242 = vmatpush1.bf16.msra.mxu0 %v572_v3  ;;  %315 = vmatpush1.bf16.msra.mxu1 %v573_v4  ;;  %v578_v7 = vld [vmem:[%s856_s1 + $0x20] ss:$16 sps:$4 sm:$0xff]   ;;  %v579_v8 = vld [vmem:[%s856_s1 + $0x28] ss:$16 sps:$4 sm:$0xff]   ;;  %v580_v9 = vld [vmem:[%s856_s1 + $0x44] ss:$16 sps:$4 sm:$0xff]  }
   0x4   :  { %243 = vmatprep.subr.bf16.mxu0 %v574_v5  ;;  %316 = vmatprep.subr.bf16.mxu1 %v576_v6  ;;  %v582_v10 = vld [vmem:[%s856_s1 + $0x4c] ss:$16 sps:$4 sm:$0xff]   ;;  %v584_v11 = vld [vmem:[%s856_s1 + $0x40] ss:$16 sps:$4 sm:$0xff]   ;;  %v585_v12 = vld [vmem:[%s856_s1 + $0x48] ss:$16 sps:$4 sm:$0xff]  }
   0x5   :  { %v586_v13 = vld [vmem:[%s856_s1 + $0x64] ss:$16 sps:$4 sm:$0xff]   ;;  %v588_v14 = vld [vmem:[%s856_s1 + $0x6c] ss:$16 sps:$4 sm:$0xff]   ;;  %v590_v15 = vld [vmem:[%s856_s1 + $0x60] ss:$16 sps:$4 sm:$0xff]  }
   0x6   :  { %v591_v16 = vld [vmem:[%s856_s1 + $0x68] ss:$16 sps:$4 sm:$0xff]   ;;  %v592_v17 = vld [vmem:[%s856_s1 + $0x84] ss:$16 sps:$4 sm:$0xff]   ;;  %v594_v18 = vld [vmem:[%s856_s1 + $0x8c] ss:$16 sps:$4 sm:$0xff]  }
   0x7   :  { %244 = vmatpush1.bf16.msra.mxu0 %v578_v7  ;;  %317 = vmatpush1.bf16.msra.mxu1 %v579_v8  ;;  %v596_v19 = vld [vmem:[%s856_s1 + $0x80] ss:$16 sps:$4 sm:$0xff]   ;;  %v597_v20 = vld [vmem:[%s856_s1 + $0x88] ss:$16 sps:$4 sm:$0xff]   ;;  %v598_v21 = vld [vmem:[%s856_s1 + $0xa4] ss:$16 sps:$4 sm:$0xff]  }
   0x8   :  { %245 = vmatprep.subr.bf16.mxu0 %v580_v9  ;;  %318 = vmatprep.subr.bf16.mxu1 %v582_v10  ;;  %v600_v22 = vld [vmem:[%s856_s1 + $0xac] ss:$16 sps:$4 sm:$0xff]   ;;  %v602_v23 = vld [vmem:[%s856_s1 + $0xa0] ss:$16 sps:$4 sm:$0xff]   ;;  %v603_v24 = vld [vmem:[%s856_s1 + $0xa8] ss:$16 sps:$4 sm:$0xff]  }
   0x9   :  { %v604_v25 = vld [vmem:[%s856_s1 + $0xc4] ss:$16 sps:$4 sm:$0xff]   ;;  %v606_v26 = vld [vmem:[%s856_s1 + $0xcc] ss:$16 sps:$4 sm:$0xff]   ;;  %v608_v27 = vld [vmem:[%s856_s1 + $0xc0] ss:$16 sps:$4 sm:$0xff]  }
   0xa   :  { %v609_v28 = vld [vmem:[%s856_s1 + $0xc8] ss:$16 sps:$4 sm:$0xff]   ;;  %v610_v29 = vld [vmem:[%s856_s1 + $0xe4] ss:$16 sps:$4 sm:$0xff]   ;;  %v612_v30 = vld [vmem:[%s856_s1 + $0xec] ss:$16 sps:$4 sm:$0xff]  }
   0xb   :  { %246 = vmatpush1.bf16.msra.mxu0 %v584_v11  ;;  %319 = vmatpush1.bf16.msra.mxu1 %v585_v12  ;;  %v614_v31 = vld [vmem:[%s856_s1 + $0xe0] ss:$16 sps:$4 sm:$0xff]   ;;  %v615_v32 = vld [vmem:[%s856_s1 + $0xe8] ss:$16 sps:$4 sm:$0xff]   ;;  %v62_v46 = vshrl.u32 %v61_v45, 7 }
   0xc   :  { %247 = vmatprep.subr.bf16.mxu0 %v586_v13  ;;  %320 = vmatprep.subr.bf16.mxu1 %v588_v14  ;;  %v15_v33 = vld [vmem:[%s857_s0] sm:$0xff]  ;;  %v16_v34 = vld [vmem:[%s857_s0 + $0x8] sm:$0xff]  ;;  %v17_v36 = vld [vmem:[%s857_s0 + $0x10] sm:$0xff] }
   0xd   :  { %v23_v35 = vpack.c.bf16 %v16_v34, %v15_v33  ;;  %v18_v37 = vld [vmem:[%s857_s0 + $0x18] sm:$0xff]  ;;  %v19_v39 = vld [vmem:[%s857_s0 + $0x20] sm:$0xff]  ;;  %v20_v40 = vld [vmem:[%s857_s0 + $0x28] sm:$0xff]  ;;  %v63_v47 = vsub.s32 0, %v62_v46  ;;  %v71_v48 = vsub.s32 2, %v62_v46  ;;  %v67_v50 = vsub.s32 1, %v62_v46 }
   0xe   :  { %v24_v38 = vpack.c.bf16 %v18_v37, %v17_v36  ;;  %v25_v41 = vpack.c.bf16 %v20_v40, %v19_v39  ;;  %v21_v42 = vld [vmem:[%s857_s0 + $0x30] sm:$0xff]  ;;  %v22_v43 = vld [vmem:[%s857_s0 + $0x38] sm:$0xff]  ;;  %v59_v49 = vld [vmem:[%s858_s2] sm:$0xf]  ;;  %v75_v51 = vsub.s32 3, %v62_v46 }
   0xf   :  { %248 = vmatpush1.bf16.msra.mxu0 %v590_v15  ;;  %321 = vmatpush1.bf16.msra.mxu1 %v591_v16  ;;  %v26_v44 = vpack.c.bf16 %v22_v43, %v21_v42  ;;  %v768_v52 = vrot.slane %v59_v49, %v63_v47  ;;  %v770_v53 = vrot.slane %v59_v49, %v71_v48 }
  0x10   :  { %249 = vmatprep.subr.bf16.mxu0 %v592_v17  ;;  %322 = vmatprep.subr.bf16.mxu1 %v594_v18  ;;  %v772_v54 = vrot.slane %v59_v49, %v67_v50  ;;  %v774_v55 = vrot.slane %v59_v49, %v75_v51 }
  0x13   :  { %250 = vmatpush1.bf16.msra.mxu0 %v596_v19  ;;  %323 = vmatpush1.bf16.msra.mxu1 %v597_v20 }
  0x14   :  { %251 = vmatprep.subr.bf16.mxu0 %v598_v21  ;;  %324 = vmatprep.subr.bf16.mxu1 %v600_v22 }
  0x17   :  { %252 = vmatpush1.bf16.msra.mxu0 %v602_v23  ;;  %325 = vmatpush1.bf16.msra.mxu1 %v603_v24 }
  0x18   :  { %253 = vmatprep.subr.bf16.mxu0 %v604_v25  ;;  %326 = vmatprep.subr.bf16.mxu1 %v606_v26 }
  0x1b   :  { %254 = vmatpush1.bf16.msra.mxu0 %v608_v27  ;;  %327 = vmatpush1.bf16.msra.mxu1 %v609_v28 }
  0x1c   :  { %255 = vmatprep.subr.bf16.mxu0 %v610_v29  ;;  %328 = vmatprep.subr.bf16.mxu1 %v612_v30 }
  0x1f   :  { %256 = vmatpush1.bf16.msra.mxu0 %v614_v31  ;;  %329 = vmatpush1.bf16.msra.mxu1 %v615_v32 }
  0x22   :  { %274 = vmatmul.mubr.bf16.vlgmr.msra.gmra.mrb[0].mxu0 %v23_v35  ;;  %347 = vmatmul.mubr.bf16.vlgmr.msra.gmra.mrb[0].mxu1 %v23_v35 }
  0x23   :  { %283 = vmatprep.mubr.bf16.mxu0 %v616_v1  ;;  %356 = vmatprep.mubr.bf16.mxu1 %v616_v1 }
  0x2a   :  { %284 = vmatmul.mubr.bf16.gmra.mrb[4].mxu0 %v24_v38  ;;  %357 = vmatmul.mubr.bf16.gmra.mrb[4].mxu1 %v24_v38 }
  0x2b   :  { %293 = vmatprep.mubr.bf16.mxu0 %v616_v1  ;;  %366 = vmatprep.mubr.bf16.mxu1 %v616_v1 }
  0x32   :  { %294 = vmatmul.mubr.bf16.gmra.mrb[8].mxu0 %v25_v41  ;;  %367 = vmatmul.mubr.bf16.gmra.mrb[8].mxu1 %v25_v41 }
  0x33   :  { %303 = vmatprep.mubr.bf16.mxu0 %v616_v1  ;;  %376 = vmatprep.mubr.bf16.mxu1 %v616_v1 }
  0x3a   :  { %304 = vmatmul.mubr.bf16.gmra.mrb[12].mxu0 %v26_v44  ;;  %377 = vmatmul.mubr.bf16.gmra.mrb[12].mxu1 %v26_v44 }
  0xf5   :  { %v275_v56 = vpop.f32.mrb[0].mxu0  ;;  %v348_v57 = vpop.f32.mrb[0].mxu1 }
  0xf6   :  { %v276_v58 = vadd.f32 %v275_v56, %v768_v52  ;;  %v349_v59 = vadd.f32 %v348_v57, %v770_v53  ;;  %v277_v60 = vpop.f32.mrb[1].mxu0  ;;  %v350_v61 = vpop.f32.mrb[1].mxu1 }
  0xf7   :  { %v278_v62 = vadd.f32 %v277_v60, %v772_v54  ;;  %v351_v63 = vadd.f32 %v350_v61, %v774_v55  ;;  %v279_v0 = vpop.f32.mrb[2].mxu0  ;;  %v352_v1 = vpop.f32.mrb[2].mxu1 }
  0xf8   :  { %v280_v2 = vadd.f32 %v279_v0, %v768_v52  ;;  %v353_v3 = vadd.f32 %v352_v1, %v770_v53  ;;  %v281_v4 = vpop.f32.mrb[3].mxu0  ;;  %v354_v5 = vpop.f32.mrb[3].mxu1 }
  0xf9   :  { %v551_v6 = vpack.c.bf16 %v278_v62, %v276_v58  ;;  %v552_v7 = vpack.c.bf16 %v351_v63, %v349_v59  ;;  %v282_v8 = vadd.f32 %v281_v4, %v772_v54  ;;  %v355_v9 = vadd.f32 %v354_v5, %v774_v55 }
  0xfb   :  { %483 = vst [vmem:[%s859_s3] sm:$0xff] %v551_v6  ;;  %484 = vst [vmem:[%s859_s3 + $0x8] sm:$0xff] %v552_v7  ;;  %v553_v10 = vpack.c.bf16 %v282_v8, %v280_v2  ;;  %v554_v11 = vpack.c.bf16 %v355_v9, %v353_v3 }
  0xfd   :  { %485 = vst [vmem:[%s859_s3 + $0x10] sm:$0xff] %v553_v10  ;;  %486 = vst [vmem:[%s859_s3 + $0x18] sm:$0xff] %v554_v11  ;;  %v285_v12 = vpop.f32.mrb[4].mxu0  ;;  %v358_v13 = vpop.f32.mrb[4].mxu1 }
  0xfe   :  { %v286_v14 = vadd.f32 %v285_v12, %v768_v52  ;;  %v359_v15 = vadd.f32 %v358_v13, %v770_v53  ;;  %v287_v16 = vpop.f32.mrb[5].mxu0  ;;  %v360_v17 = vpop.f32.mrb[5].mxu1 }
  0xff   :  { %v288_v18 = vadd.f32 %v287_v16, %v772_v54  ;;  %v361_v19 = vadd.f32 %v360_v17, %v774_v55  ;;  %v289_v20 = vpop.f32.mrb[6].mxu0  ;;  %v362_v21 = vpop.f32.mrb[6].mxu1 }
 0x100   :  { %v290_v22 = vadd.f32 %v289_v20, %v768_v52  ;;  %v363_v23 = vadd.f32 %v362_v21, %v770_v53  ;;  %v291_v24 = vpop.f32.mrb[7].mxu0  ;;  %v364_v25 = vpop.f32.mrb[7].mxu1 }
 0x101   :  { %v555_v26 = vpack.c.bf16 %v288_v18, %v286_v14  ;;  %v556_v27 = vpack.c.bf16 %v361_v19, %v359_v15  ;;  %v292_v28 = vadd.f32 %v291_v24, %v772_v54  ;;  %v365_v29 = vadd.f32 %v364_v25, %v774_v55 }
 0x103   :  { %487 = vst [vmem:[%s859_s3 + $0x20] sm:$0xff] %v555_v26  ;;  %488 = vst [vmem:[%s859_s3 + $0x28] sm:$0xff] %v556_v27  ;;  %v557_v30 = vpack.c.bf16 %v292_v28, %v290_v22  ;;  %v558_v31 = vpack.c.bf16 %v365_v29, %v363_v23 }
 0x105   :  { %489 = vst [vmem:[%s859_s3 + $0x30] sm:$0xff] %v557_v30  ;;  %490 = vst [vmem:[%s859_s3 + $0x38] sm:$0xff] %v558_v31  ;;  %v295_v32 = vpop.f32.mrb[8].mxu0  ;;  %v368_v33 = vpop.f32.mrb[8].mxu1 }
 0x106   :  { %v296_v34 = vadd.f32 %v295_v32, %v768_v52  ;;  %v369_v35 = vadd.f32 %v368_v33, %v770_v53  ;;  %v297_v36 = vpop.f32.mrb[9].mxu0  ;;  %v370_v37 = vpop.f32.mrb[9].mxu1 }
 0x107   :  { %v298_v38 = vadd.f32 %v297_v36, %v772_v54  ;;  %v371_v39 = vadd.f32 %v370_v37, %v774_v55  ;;  %v299_v40 = vpop.f32.mrb[10].mxu0  ;;  %v372_v41 = vpop.f32.mrb[10].mxu1 }
 0x108   :  { %v300_v42 = vadd.f32 %v299_v40, %v768_v52  ;;  %v373_v43 = vadd.f32 %v372_v41, %v770_v53  ;;  %v301_v44 = vpop.f32.mrb[11].mxu0  ;;  %v374_v45 = vpop.f32.mrb[11].mxu1 }
 0x109   :  { %v559_v46 = vpack.c.bf16 %v298_v38, %v296_v34  ;;  %v560_v47 = vpack.c.bf16 %v371_v39, %v369_v35  ;;  %v302_v48 = vadd.f32 %v301_v44, %v772_v54  ;;  %v375_v49 = vadd.f32 %v374_v45, %v774_v55 }
 0x10b   :  { %491 = vst [vmem:[%s859_s3 + $0x40] sm:$0xff] %v559_v46  ;;  %492 = vst [vmem:[%s859_s3 + $0x48] sm:$0xff] %v560_v47  ;;  %v561_v50 = vpack.c.bf16 %v302_v48, %v300_v42  ;;  %v562_v51 = vpack.c.bf16 %v375_v49, %v373_v43 }
 0x10d   :  { %493 = vst [vmem:[%s859_s3 + $0x50] sm:$0xff] %v561_v50  ;;  %494 = vst [vmem:[%s859_s3 + $0x58] sm:$0xff] %v562_v51  ;;  %v305_v56 = vpop.f32.mrb[12].mxu0  ;;  %v378_v57 = vpop.f32.mrb[12].mxu1 }
 0x10e   :  { %v306_v58 = vadd.f32 %v305_v56, %v768_v52  ;;  %v379_v59 = vadd.f32 %v378_v57, %v770_v53  ;;  %v307_v60 = vpop.f32.mrb[13].mxu0  ;;  %v380_v61 = vpop.f32.mrb[13].mxu1 }
 0x10f   :  { %v308_v62 = vadd.f32 %v307_v60, %v772_v54  ;;  %v381_v63 = vadd.f32 %v380_v61, %v774_v55  ;;  %v309_v0 = vpop.f32.mrb[14].mxu0  ;;  %v382_v1 = vpop.f32.mrb[14].mxu1 }
 0x110   :  { %v310_v2 = vadd.f32 %v309_v0, %v768_v52  ;;  %v383_v3 = vadd.f32 %v382_v1, %v770_v53  ;;  %v311_v4 = vpop.f32.mrb[15].mxu0  ;;  %v384_v5 = vpop.f32.mrb[15].mxu1 }
 0x111   :  { %v563_v6 = vpack.c.bf16 %v308_v62, %v306_v58  ;;  %v564_v7 = vpack.c.bf16 %v381_v63, %v379_v59  ;;  %v312_v8 = vadd.f32 %v311_v4, %v772_v54  ;;  %v385_v9 = vadd.f32 %v384_v5, %v774_v55 }
 0x113   :  { %495 = vst [vmem:[%s859_s3 + $0x60] sm:$0xff] %v563_v6  ;;  %496 = vst [vmem:[%s859_s3 + $0x68] sm:$0xff] %v564_v7  ;;  %v565_v10 = vpack.c.bf16 %v312_v8, %v310_v2  ;;  %v566_v52 = vpack.c.bf16 %v385_v9, %v383_v3 }
 0x115   :  { %497 = vst [vmem:[%s859_s3 + $0x70] sm:$0xff] %v565_v10  ;;  %498 = vst [vmem:[%s859_s3 + $0x78] sm:$0xff] %v566_v52 }

// kernel: packed_lstm_lm_forward.4
= control target key start
LH: loop header
LB: loop body
LE: loop exit
PB: predicated region body
PF: predicated region fallthrough
CT: control target
= control target key end

     0   :  { %10 = vsyncpa [#allocation7], 0  ;;  %s3943_s18 = smov [#allocation6]   ;;  %s6259_s0 = inlined_call_operand.vmem [shape: bf16[8,8,512], index: 0, kind: input, shape index: {}]   ;;  %s6260_s1 = inlined_call_operand.vmem [shape: bf16[128,512], index: 1, kind: input, shape index: {}]   ;;  %s6261_s2 = inlined_call_operand.vmem [shape: bf16[128,512], index: 2, kind: input, shape index: {}]   ;;  %s6262_s3 = inlined_call_operand.hbm [shape: bf16[128,512], index: 3, kind: input, shape index: {}]   ;;  %s6263_s4 = inlined_call_operand.vmem [shape: f32[1,512], index: 4, kind: input, shape index: {}]   ;;  %s6264_s5 = inlined_call_operand.vmem [shape: f32[8,8,128], index: 5, kind: output, shape index: {}]  }
   0x1   :  { %s22_s19 = sshll.u32 %s3943_s18, 4  ;;  %s3919_s22 = scalar_lea.hbm %s6262_s3, 4096  ;;  %s23_s19 = int_to_ptr.vmem [resolvable:$true] %s22_s19 }
   0x2   :  { %p3920_p0 = scmp.ne.s32.totalorder %s6262_s3, %s3919_s22  ;;  %p3923_p1 = scmp.lt.u32.totalorder %s3919_s22, %s6262_s3 }
   0x4   :  { %p3925_p2 = pnand %p3923_p1, %p3920_p0 }
   0x6   :  { %3928 = shalt.err (!%p3925_p2)
}
   0x7   :  { %s3929_s27 = scalar_lea.vmem %s23_s19, 4096  ;;  %p3934_p4 = scmp.lt.s32.totalorder %s23_s19, %s23_s19 }
   0x8   :  { %p3930_p3 = scmp.ne.s32.totalorder %s23_s19, %s3929_s27  ;;  %p3935_p5 = scmp.lt.s32.totalorder %s3929_s27, %s3929_s27 }
   0xa   :  { %p3936_p6 = por %p3935_p5, %p3934_p4 }
   0xc   :  { %p3937_p7 = pnand %p3936_p6, %p3930_p3 }
   0xe   :  { %3940 = shalt.err (!%p3937_p7)
}
   0xf   :  { %s3944_s28 = smov 256   ;;  %s3945_s29 = smov 16  }
  0x10   :  { %28 = dma.hbm_to_vmem [thread:$0]  %s6262_s3, 4096, %s23_s19, [#allocation7], %s3944_s28, %s3944_s28, %s3945_s29  }
  0x11   :  { %3941 = dma.done.wait [#allocation7], 4096  }
  0x12   :  { %3942 = vsyncadd [#allocation7], 4294963200  ;;  %v6265_v0 = vmov 0   ;;  %v3992_v1 = vld [vmem:[#allocation6 + $0x4] ss:$16 sps:$4 sm:$0xff]   ;;  %v6267_v37 = vmov 0.0|0.0  }
  0x13   :  { %337 = vmatprep.mubr.bf16.mxu0 %v6265_v0  ;;  %378 = vmatprep.mubr.bf16.mxu1 %v6265_v0  ;;  %6603 = vst [vmem:[#allocation9_spill] sm:$0xff] %v3992_v1  ;;  %v3994_v2 = vld [vmem:[#allocation6] ss:$16 sps:$4 sm:$0xff]   ;;  %v3997_v3 = vld [vmem:[#allocation6 + $0x24] ss:$16 sps:$4 sm:$0xff]  }
  0x14   :  { %305 = vmatprep.subr.bf16.mxu0 %v3992_v1  ;;  %v4000_v4 = vld [vmem:[#allocation6 + $0x20] ss:$16 sps:$4 sm:$0xff]   ;;  %v4003_v5 = vld [vmem:[#allocation6 + $0x44] ss:$16 sps:$4 sm:$0xff]   ;;  %v4005_v6 = vld [vmem:[#allocation6 + $0xc] ss:$16 sps:$4 sm:$0xff]  }
  0x15   :  { %306 = vmatpush1.bf16.msra.mxu0 %v3994_v2  ;;  %6604 = vst [vmem:[#allocation10_spill] sm:$0xff] %v4005_v6  ;;  %v4007_v7 = vld [vmem:[#allocation6 + $0x8] ss:$16 sps:$4 sm:$0xff]   ;;  %v4010_v8 = vld [vmem:[#allocation6 + $0x40] ss:$16 sps:$4 sm:$0xff]   ;;  %346 = vmatprep.subr.bf16.mxu1 %v4005_v6 }
  0x16   :  { %307 = vmatprep.subr.bf16.mxu0 %v3997_v3  ;;  %v4014_v9 = vld [vmem:[#allocation6 + $0x64] ss:$16 sps:$4 sm:$0xff]   ;;  %347 = vmatpush1.bf16.msra.mxu1 %v4007_v7  ;;  %v4017_v10 = vld [vmem:[#allocation6 + $0x2c] ss:$16 sps:$4 sm:$0xff]   ;;  %v4019_v11 = vld [vmem:[#allocation6 + $0x28] ss:$16 sps:$4 sm:$0xff]  }
  0x17   :  { %348 = vmatprep.subr.bf16.mxu1 %v4017_v10  ;;  %v4023_v12 = vld [vmem:[#allocation6 + $0x60] ss:$16 sps:$4 sm:$0xff]   ;;  %v4025_v13 = vld [vmem:[#allocation6 + $0x84] ss:$16 sps:$4 sm:$0xff]   ;;  %v4027_v14 = vld [vmem:[#allocation6 + $0x4c] ss:$16 sps:$4 sm:$0xff]  }
  0x18   :  { %v4031_v15 = vld [vmem:[#allocation6 + $0x48] ss:$16 sps:$4 sm:$0xff]   ;;  %v4034_v16 = vld [vmem:[#allocation6 + $0x6c] ss:$16 sps:$4 sm:$0xff]   ;;  %v4037_v17 = vld [vmem:[#allocation6 + $0x80] ss:$16 sps:$4 sm:$0xff]  }
  0x19   :  { %308 = vmatpush1.bf16.msra.mxu0 %v4000_v4  ;;  %v4040_v18 = vld [vmem:[#allocation6 + $0xa4] ss:$16 sps:$4 sm:$0xff]   ;;  %v4043_v19 = vld [vmem:[#allocation6 + $0x68] ss:$16 sps:$4 sm:$0xff]   ;;  %v4046_v20 = vld [vmem:[#allocation6 + $0x8c] ss:$16 sps:$4 sm:$0xff]  }
  0x1a   :  { %309 = vmatprep.subr.bf16.mxu0 %v4003_v5  ;;  %349 = vmatpush1.bf16.msra.mxu1 %v4019_v11  ;;  %v4049_v21 = vld [vmem:[#allocation6 + $0xa0] ss:$16 sps:$4 sm:$0xff]   ;;  %v4051_v22 = vld [vmem:[#allocation6 + $0xc4] ss:$16 sps:$4 sm:$0xff]   ;;  %v4055_v23 = vld [vmem:[#allocation6 + $0x88] ss:$16 sps:$4 sm:$0xff]  }
  0x1b   :  { %350 = vmatprep.subr.bf16.mxu1 %v4027_v14  ;;  %v4058_v24 = vld [vmem:[#allocation6 + $0xac] ss:$16 sps:$4 sm:$0xff]   ;;  %v4061_v25 = vld [vmem:[#allocation6 + $0xc0] ss:$16 sps:$4 sm:$0xff]   ;;  %v4064_v26 = vld [vmem:[#allocation6 + $0xe4] ss:$16 sps:$4 sm:$0xff]  }
  0x1c   :  { %v4067_v27 = vld [vmem:[#allocation6 + $0xa8] ss:$16 sps:$4 sm:$0xff]   ;;  %v4070_v28 = vld [vmem:[#allocation6 + $0xcc] ss:$16 sps:$4 sm:$0xff]   ;;  %v4073_v29 = vld [vmem:[#allocation6 + $0xe0] ss:$16 sps:$4 sm:$0xff]  }
  0x1d   :  { %310 = vmatpush1.bf16.msra.mxu0 %v4010_v8  ;;  %v4078_v30 = vld [vmem:[%s6260_s1 + $0x4] ss:$16 sps:$4 sm:$0xff]   ;;  %v4082_v31 = vld [vmem:[#allocation6 + $0xc8] ss:$16 sps:$4 sm:$0xff]   ;;  %v4085_v32 = vld [vmem:[#allocation6 + $0xec] ss:$16 sps:$4 sm:$0xff]  }
  0x1e   :  { %311 = vmatprep.subr.bf16.mxu0 %v4014_v9  ;;  %351 = vmatpush1.bf16.msra.mxu1 %v4031_v15  ;;  %v4091_v33 = vld [vmem:[%s6260_s1] ss:$16 sps:$4 sm:$0xff]   ;;  %v4097_v34 = vld [vmem:[%s6260_s1 + $0x24] ss:$16 sps:$4 sm:$0xff]   ;;  %v4100_v35 = vld [vmem:[#allocation6 + $0xe8] ss:$16 sps:$4 sm:$0xff]  }
  0x1f   :  { %352 = vmatprep.subr.bf16.mxu1 %v4034_v16  ;;  %v4106_v36 = vld [vmem:[%s6260_s1 + $0xc] ss:$16 sps:$4 sm:$0xff]   ;;  %v4113_v38 = vld [vmem:[%s6260_s1 + $0x20] ss:$16 sps:$4 sm:$0xff]   ;;  %v4118_v39 = vld [vmem:[%s6260_s1 + $0x44] ss:$16 sps:$4 sm:$0xff]  }
  0x20   :  { %6605 = vst [vmem:[#allocation11_spill] sm:$0xff] %v4118_v39  ;;  %v4126_v40 = vld [vmem:[%s6260_s1 + $0x8] ss:$16 sps:$4 sm:$0xff]   ;;  %v4132_v41 = vld [vmem:[%s6260_s1 + $0x2c] ss:$16 sps:$4 sm:$0xff]  }
  0x21   :  { %312 = vmatpush1.bf16.msra.mxu0 %v4023_v12  ;;  %v4138_v42 = vld [vmem:[%s6260_s1 + $0x40] ss:$16 sps:$4 sm:$0xff]   ;;  %v4143_v43 = vld [vmem:[%s6260_s1 + $0x64] ss:$16 sps:$4 sm:$0xff]   ;;  %v4151_v44 = vld [vmem:[%s6260_s1 + $0x28] ss:$16 sps:$4 sm:$0xff]  }
  0x22   :  { %313 = vmatprep.subr.bf16.mxu0 %v4025_v13  ;;  %353 = vmatpush1.bf16.msra.mxu1 %v4043_v19  ;;  %6606 = vst [vmem:[#allocation12_spill] sm:$0xff] %v4138_v42  ;;  %6607 = vst [vmem:[#allocation13_spill] sm:$0xff] %v4143_v43  ;;  %v4156_v45 = vld [vmem:[%s6260_s1 + $0x60] ss:$16 sps:$4 sm:$0xff]   ;;  %v4162_v46 = vld [vmem:[%s6260_s1 + $0x4c] ss:$16 sps:$4 sm:$0xff]  }
  0x23   :  { %354 = vmatprep.subr.bf16.mxu1 %v4046_v20  ;;  %6608 = vst [vmem:[#allocation14_spill] sm:$0xff] %v4156_v45  ;;  %6609 = vst [vmem:[#allocation15_spill] sm:$0xff] %v4162_v46  ;;  %v4168_v47 = vld [vmem:[%s6260_s1 + $0x84] ss:$16 sps:$4 sm:$0xff]   ;;  %v4173_v48 = vld [vmem:[%s6260_s1 + $0x48] ss:$16 sps:$4 sm:$0xff]  }
  0x24   :  { %6610 = vst [vmem:[#allocation16_spill] sm:$0xff] %v4168_v47  ;;  %6611 = vst [vmem:[#allocation17_spill] sm:$0xff] %v4173_v48  ;;  %v4179_v49 = vld [vmem:[%s6260_s1 + $0x6c] ss:$16 sps:$4 sm:$0xff]   ;;  %v4186_v50 = vld [vmem:[%s6260_s1 + $0x80] ss:$16 sps:$4 sm:$0xff]  }
  0x25   :  { %314 = vmatpush1.bf16.msra.mxu0 %v4037_v17  ;;  %6612 = vst [vmem:[#allocation18_spill] sm:$0xff] %v4179_v49  ;;  %6613 = vst [vmem:[#allocation19_spill] sm:$0xff] %v4186_v50  ;;  %v4192_v51 = vld [vmem:[%s6260_s1 + $0xa4] ss:$16 sps:$4 sm:$0xff]   ;;  %v4197_v52 = vld [vmem:[%s6260_s1 + $0x68] ss:$16 sps:$4 sm:$0xff]  }
  0x26   :  { %315 = vmatprep.subr.bf16.mxu0 %v4040_v18  ;;  %355 = vmatpush1.bf16.msra.mxu1 %v4055_v23  ;;  %6614 = vst [vmem:[#allocation20_spill] sm:$0xff] %v4192_v51  ;;  %6615 = vst [vmem:[#allocation21_spill] sm:$0xff] %v4197_v52  ;;  %v4203_v53 = vld [vmem:[%s6260_s1 + $0x8c] ss:$16 sps:$4 sm:$0xff]   ;;  %v4210_v54 = vld [vmem:[%s6260_s1 + $0xa0] ss:$16 sps:$4 sm:$0xff]  }
  0x27   :  { %356 = vmatprep.subr.bf16.mxu1 %v4058_v24  ;;  %6616 = vst [vmem:[#allocation22_spill] sm:$0xff] %v4203_v53  ;;  %6617 = vst [vmem:[#allocation23_spill] sm:$0xff] %v4210_v54  ;;  %v4216_v55 = vld [vmem:[%s6260_s1 + $0xc4] ss:$16 sps:$4 sm:$0xff]   ;;  %v4221_v56 = vld [vmem:[%s6260_s1 + $0x88] ss:$16 sps:$4 sm:$0xff]  }
  0x28   :  { %6618 = vst [vmem:[#allocation24_spill] sm:$0xff] %v4216_v55  ;;  %6619 = vst [vmem:[#allocation25_spill] sm:$0xff] %v4221_v56  ;;  %v4230_v57 = vld [vmem:[%s6260_s1 + $0xac] ss:$16 sps:$4 sm:$0xff]   ;;  %v4236_v58 = vld [vmem:[%s6260_s1 + $0xc0] ss:$16 sps:$4 sm:$0xff]  }
  0x29   :  { %316 = vmatpush1.bf16.msra.mxu0 %v4049_v21  ;;  %6620 = vst [vmem:[#allocation26_spill] sm:$0xff] %v4230_v57  ;;  %6621 = vst [vmem:[#allocation27_spill] sm:$0xff] %v4236_v58  ;;  %v4242_v59 = vld [vmem:[%s6260_s1 + $0xe4] ss:$16 sps:$4 sm:$0xff]   ;;  %v4248_v60 = vld [vmem:[%s6260_s1 + $0xa8] ss:$16 sps:$4 sm:$0xff]  }
  0x2a   :  { %317 = vmatprep.subr.bf16.mxu0 %v4051_v22  ;;  %357 = vmatpush1.bf16.msra.mxu1 %v4067_v27  ;;  %6622 = vst [vmem:[#allocation28_spill] sm:$0xff] %v4242_v59  ;;  %6623 = vst [vmem:[#allocation29_spill] sm:$0xff] %v4248_v60  ;;  %v4254_v61 = vld [vmem:[%s6260_s1 + $0xcc] ss:$16 sps:$4 sm:$0xff]   ;;  %v4260_v62 = vld [vmem:[%s6260_s1 + $0xe0] ss:$16 sps:$4 sm:$0xff]  }
  0x2b   :  { %358 = vmatprep.subr.bf16.mxu1 %v4070_v28  ;;  %6624 = vst [vmem:[#allocation30_spill] sm:$0xff] %v4254_v61  ;;  %6625 = vst [vmem:[#allocation31_spill] sm:$0xff] %v4260_v62  ;;  %v4267_v63 = vld [vmem:[%s6260_s1 + $0xc8] ss:$16 sps:$4 sm:$0xff]  }
  0x2c   :  { %6626 = vst [vmem:[#allocation32_spill] sm:$0xff] %v4267_v63 }
  0x2d   :  { %318 = vmatpush1.bf16.msra.mxu0 %v4061_v25 }
  0x2e   :  { %319 = vmatprep.subr.bf16.mxu0 %v4064_v26  ;;  %359 = vmatpush1.bf16.msra.mxu1 %v4082_v31 }
  0x2f   :  { %360 = vmatprep.subr.bf16.mxu1 %v4085_v32 }
  0x31   :  { %320 = vmatpush1.bf16.msra.mxu0 %v4073_v29 }
  0x32   :  { %554 = vmatprep.subr.bf16.mxu0 %v4078_v30  ;;  %361 = vmatpush1.bf16.msra.mxu1 %v4100_v35 }
  0x33   :  { %595 = vmatprep.subr.bf16.mxu1 %v4106_v36 }
  0x34   :  { %338 = vmatmul.mubr.bf16.vlgmr.msra.gmra.mrb[0].mxu0 %v6267_v37 }
  0x35   :  { %555 = vmatpush1.bf16.msra.mxu0 %v4091_v33  ;;  %586 = vmatprep.mubr.bf16.mxu0 %v6265_v0 }
  0x36   :  { %556 = vmatprep.subr.bf16.mxu0 %v4097_v34  ;;  %379 = vmatmul.mubr.bf16.vlgmr.msra.gmra.mrb[0].mxu1 %v6267_v37  ;;  %v4280_v37 = vld [vmem:[%s6260_s1 + $0xe8] ss:$16 sps:$4 sm:$0xff]  }
  0x37   :  { %596 = vmatpush1.bf16.msra.mxu1 %v4126_v40  ;;  %627 = vmatprep.mubr.bf16.mxu1 %v6265_v0  ;;  %v4273_v0 = vld [vmem:[%s6260_s1 + $0xec] ss:$16 sps:$4 sm:$0xff]   ;;  %6628 = vst [vmem:[#allocation34_spill] sm:$0xff] %v4280_v37 }
  0x38   :  { %597 = vmatprep.subr.bf16.mxu1 %v4132_v41  ;;  %6627 = vst [vmem:[#allocation33_spill] sm:$0xff] %v4273_v0 }
  0x39   :  { %557 = vmatpush1.bf16.msra.mxu0 %v4113_v38 }
  0x3a   :  { %558 = vmatprep.subr.bf16.mxu0 %v4118_v39 }
  0x3b   :  { %598 = vmatpush1.bf16.msra.mxu1 %v4151_v44 }
  0x3c   :  { %599 = vmatprep.subr.bf16.mxu1 %v4162_v46 }
  0x3d   :  { %559 = vmatpush1.bf16.msra.mxu0 %v4138_v42 }
  0x3e   :  { %560 = vmatprep.subr.bf16.mxu0 %v4143_v43 }
  0x3f   :  { %600 = vmatpush1.bf16.msra.mxu1 %v4173_v48 }
  0x40   :  { %601 = vmatprep.subr.bf16.mxu1 %v4179_v49 }
  0x41   :  { %561 = vmatpush1.bf16.msra.mxu0 %v4156_v45 }
  0x42   :  { %562 = vmatprep.subr.bf16.mxu0 %v4168_v47 }
  0x43   :  { %602 = vmatpush1.bf16.msra.mxu1 %v4197_v52 }
  0x44   :  { %603 = vmatprep.subr.bf16.mxu1 %v4203_v53 }
  0x45   :  { %563 = vmatpush1.bf16.msra.mxu0 %v4186_v50 }
  0x46   :  { %564 = vmatprep.subr.bf16.mxu0 %v4192_v51 }
  0x47   :  { %604 = vmatpush1.bf16.msra.mxu1 %v4221_v56 }
  0x48   :  { %605 = vmatprep.subr.bf16.mxu1 %v4230_v57 }
  0x49   :  { %565 = vmatpush1.bf16.msra.mxu0 %v4210_v54 }
  0x4a   :  { %566 = vmatprep.subr.bf16.mxu0 %v4216_v55  ;;  %v4445_v55 = vld [vmem:[%s6261_s2 + $0xc0] ss:$16 sps:$4 sm:$0xff]  }
  0x4b   :  { %606 = vmatpush1.bf16.msra.mxu1 %v4248_v60  ;;  %6657 = vst [vmem:[#allocation61_spill] sm:$0xff] %v4445_v55  ;;  %v4450_v60 = vld [vmem:[%s6261_s2 + $0xc8] ss:$16 sps:$4 sm:$0xff]  }
  0x4c   :  { %607 = vmatprep.subr.bf16.mxu1 %v4254_v61  ;;  %v4320_v61 = vld [vmem:[%s6261_s2 + $0x2c] ss:$16 sps:$4 sm:$0xff]   ;;  %6658 = vst [vmem:[#allocation62_spill] sm:$0xff] %v4450_v60 }
  0x4d   :  { %567 = vmatpush1.bf16.msra.mxu0 %v4236_v58  ;;  %v6630_v58 = vmov 0   ;;  %6636 = vst [vmem:[#allocation40_spill] sm:$0xff] %v4320_v61 }
  0x4e   :  { %568 = vmatprep.subr.bf16.mxu0 %v4242_v59  ;;  %v6629_v59 = vmov 0.0|0.0  }
  0x4f   :  { %608 = vmatpush1.bf16.msra.mxu1 %v4267_v63  ;;  %v4296_v63 = vld [vmem:[%s6261_s2 + $0xc] ss:$16 sps:$4 sm:$0xff]  }
  0x50   :  { %609 = vmatprep.subr.bf16.mxu1 %v4273_v0  ;;  %6632 = vst [vmem:[#allocation36_spill] sm:$0xff] %v4296_v63  ;;  %v4301_v0 = vld [vmem:[%s6261_s2] ss:$16 sps:$4 sm:$0xff]  }
  0x51   :  { %569 = vmatpush1.bf16.msra.mxu0 %v4260_v62  ;;  %v4291_v62 = vld [vmem:[%s6261_s2 + $0x4] ss:$16 sps:$4 sm:$0xff]   ;;  %6633 = vst [vmem:[#allocation37_spill] sm:$0xff] %v4301_v0 }
  0x52   :  { %6631 = vst [vmem:[#allocation35_spill] sm:$0xff] %v4291_v62  ;;  %825 = vmatprep.subr.bf16.mxu0 %v4291_v62  ;;  %v4325_v62 = vld [vmem:[%s6261_s2 + $0x20] ss:$16 sps:$4 sm:$0xff]  }
  0x53   :  { %610 = vmatpush1.bf16.msra.mxu1 %v4280_v37  ;;  %v4315_v37 = vld [vmem:[%s6261_s2 + $0x24] ss:$16 sps:$4 sm:$0xff]   ;;  %6637 = vst [vmem:[#allocation41_spill] sm:$0xff] %v4325_v62 }
  0x54   :  { %587 = vmatmul.mubr.bf16.vlgmr.msra.gmra.mrb[4].mxu0 %v6629_v59  ;;  %866 = vmatprep.subr.bf16.mxu1 %v4296_v63  ;;  %6635 = vst [vmem:[#allocation39_spill] sm:$0xff] %v4315_v37  ;;  %v4344_v63 = vld [vmem:[%s6261_s2 + $0x4c] ss:$16 sps:$4 sm:$0xff]  }
  0x55   :  { %857 = vmatprep.mubr.bf16.mxu0 %v6630_v58  ;;  %826 = vmatpush1.bf16.msra.mxu0 %v4301_v0  ;;  %v4330_v0 = vld [vmem:[%s6261_s2 + $0x28] ss:$16 sps:$4 sm:$0xff]   ;;  %6640 = vst [vmem:[#allocation44_spill] sm:$0xff] %v4344_v63 }
  0x56   :  { %628 = vmatmul.mubr.bf16.vlgmr.msra.gmra.mrb[4].mxu1 %v6629_v59  ;;  %v4306_v59 = vld [vmem:[%s6261_s2 + $0x8] ss:$16 sps:$4 sm:$0xff]   ;;  %6638 = vst [vmem:[#allocation42_spill] sm:$0xff] %v4330_v0  ;;  %827 = vmatprep.subr.bf16.mxu0 %v4315_v37  ;;  %v4349_v37 = vld [vmem:[%s6261_s2 + $0x40] ss:$16 sps:$4 sm:$0xff]  }
  0x57   :  { %898 = vmatprep.mubr.bf16.mxu1 %v6630_v58  ;;  %6634 = vst [vmem:[#allocation38_spill] sm:$0xff] %v4306_v59  ;;  %867 = vmatpush1.bf16.msra.mxu1 %v4306_v59  ;;  %v4339_v59 = vld [vmem:[%s6261_s2 + $0x44] ss:$16 sps:$4 sm:$0xff]   ;;  %6641 = vst [vmem:[#allocation45_spill] sm:$0xff] %v4349_v37 }
  0x58   :  { %868 = vmatprep.subr.bf16.mxu1 %v4320_v61  ;;  %6639 = vst [vmem:[#allocation43_spill] sm:$0xff] %v4339_v59  ;;  %v4368_v61 = vld [vmem:[%s6261_s2 + $0x6c] ss:$16 sps:$4 sm:$0xff]  }
  0x59   :  { %828 = vmatpush1.bf16.msra.mxu0 %v4325_v62  ;;  %v4354_v62 = vld [vmem:[%s6261_s2 + $0x48] ss:$16 sps:$4 sm:$0xff]   ;;  %6644 = vst [vmem:[#allocation48_spill] sm:$0xff] %v4368_v61 }
  0x5a   :  { %6642 = vst [vmem:[#allocation46_spill] sm:$0xff] %v4354_v62  ;;  %829 = vmatprep.subr.bf16.mxu0 %v4339_v59  ;;  %v4373_v59 = vld [vmem:[%s6261_s2 + $0x60] ss:$16 sps:$4 sm:$0xff]  }
  0x5b   :  { %869 = vmatpush1.bf16.msra.mxu1 %v4330_v0  ;;  %v4363_v0 = vld [vmem:[%s6261_s2 + $0x64] ss:$16 sps:$4 sm:$0xff]   ;;  %6645 = vst [vmem:[#allocation49_spill] sm:$0xff] %v4373_v59 }
  0x5c   :  { %870 = vmatprep.subr.bf16.mxu1 %v4344_v63  ;;  %6643 = vst [vmem:[#allocation47_spill] sm:$0xff] %v4363_v0  ;;  %v4392_v63 = vld [vmem:[%s6261_s2 + $0x8c] ss:$16 sps:$4 sm:$0xff]  }
  0x5d   :  { %830 = vmatpush1.bf16.msra.mxu0 %v4349_v37  ;;  %v4378_v37 = vld [vmem:[%s6261_s2 + $0x68] ss:$16 sps:$4 sm:$0xff]   ;;  %6648 = vst [vmem:[#allocation52_spill] sm:$0xff] %v4392_v63 }
  0x5e   :  { %6646 = vst [vmem:[#allocation50_spill] sm:$0xff] %v4378_v37  ;;  %831 = vmatprep.subr.bf16.mxu0 %v4363_v0  ;;  %v4397_v0 = vld [vmem:[%s6261_s2 + $0x80] ss:$16 sps:$4 sm:$0xff]  }
  0x5f   :  { %871 = vmatpush1.bf16.msra.mxu1 %v4354_v62  ;;  %v4387_v62 = vld [vmem:[%s6261_s2 + $0x84] ss:$16 sps:$4 sm:$0xff]   ;;  %6649 = vst [vmem:[#allocation53_spill] sm:$0xff] %v4397_v0 }
  0x60   :  { %872 = vmatprep.subr.bf16.mxu1 %v4368_v61  ;;  %6647 = vst [vmem:[#allocation51_spill] sm:$0xff] %v4387_v62  ;;  %v4416_v61 = vld [vmem:[%s6261_s2 + $0xac] ss:$16 sps:$4 sm:$0xff]  }
  0x61   :  { %832 = vmatpush1.bf16.msra.mxu0 %v4373_v59  ;;  %v4402_v59 = vld [vmem:[%s6261_s2 + $0x88] ss:$16 sps:$4 sm:$0xff]   ;;  %6652 = vst [vmem:[#allocation56_spill] sm:$0xff] %v4416_v61 }
  0x62   :  { %6650 = vst [vmem:[#allocation54_spill] sm:$0xff] %v4402_v59  ;;  %833 = vmatprep.subr.bf16.mxu0 %v4387_v62  ;;  %v4421_v62 = vld [vmem:[%s6261_s2 + $0xa0] ss:$16 sps:$4 sm:$0xff]  }
  0x63   :  { %873 = vmatpush1.bf16.msra.mxu1 %v4378_v37  ;;  %v4411_v37 = vld [vmem:[%s6261_s2 + $0xa4] ss:$16 sps:$4 sm:$0xff]   ;;  %6653 = vst [vmem:[#allocation57_spill] sm:$0xff] %v4421_v62 }
  0x64   :  { %874 = vmatprep.subr.bf16.mxu1 %v4392_v63  ;;  %6651 = vst [vmem:[#allocation55_spill] sm:$0xff] %v4411_v37  ;;  %v4436_v63 = vld [vmem:[%s6261_s2 + $0xcc] ss:$16 sps:$4 sm:$0xff]  }
  0x65   :  { %834 = vmatpush1.bf16.msra.mxu0 %v4397_v0  ;;  %v4426_v0 = vld [vmem:[%s6261_s2 + $0xa8] ss:$16 sps:$4 sm:$0xff]   ;;  %6656 = vst [vmem:[#allocation60_spill] sm:$0xff] %v4436_v63 }
  0x66   :  { %6654 = vst [vmem:[#allocation58_spill] sm:$0xff] %v4426_v0  ;;  %835 = vmatprep.subr.bf16.mxu0 %v4411_v37 }
  0x67   :  { %875 = vmatpush1.bf16.msra.mxu1 %v4402_v59  ;;  %v4431_v59 = vld [vmem:[%s6261_s2 + $0xc4] ss:$16 sps:$4 sm:$0xff]  }
  0x68   :  { %6655 = vst [vmem:[#allocation59_spill] sm:$0xff] %v4431_v59  ;;  %876 = vmatprep.subr.bf16.mxu1 %v4416_v61 }
  0x69   :  { %836 = vmatpush1.bf16.msra.mxu0 %v4421_v62  ;;  %v4457_v62 = vld [vmem:[%s6261_s2 + $0xe4] ss:$16 sps:$4 sm:$0xff]  }
  0x6a   :  { %837 = vmatprep.subr.bf16.mxu0 %v4431_v59  ;;  %6659 = vst [vmem:[#allocation63_spill] sm:$0xff] %v4457_v62  ;;  %v4469_v59 = vld [vmem:[%s6261_s2 + $0xe0] ss:$16 sps:$4 sm:$0xff]  }
  0x6b   :  { %877 = vmatpush1.bf16.msra.mxu1 %v4426_v0  ;;  %v4462_v0 = vld [vmem:[%s6261_s2 + $0xec] ss:$16 sps:$4 sm:$0xff]   ;;  %6661 = vst [vmem:[#allocation65_spill] sm:$0xff] %v4469_v59 }
  0x6c   :  { %878 = vmatprep.subr.bf16.mxu1 %v4436_v63  ;;  %6660 = vst [vmem:[#allocation64_spill] sm:$0xff] %v4462_v0  ;;  %v4474_v63 = vld [vmem:[%s6261_s2 + $0xe8] ss:$16 sps:$4 sm:$0xff]  }
  0x6d   :  { %838 = vmatpush1.bf16.msra.mxu0 %v4445_v55  ;;  %6662 = vst [vmem:[#allocation66_spill] sm:$0xff] %v4474_v63 }
  0x6e   :  { %839 = vmatprep.subr.bf16.mxu0 %v4457_v62 }
  0x6f   :  { %879 = vmatpush1.bf16.msra.mxu1 %v4450_v60 }
  0x70   :  { %880 = vmatprep.subr.bf16.mxu1 %v4462_v0 }
  0x71   :  { %840 = vmatpush1.bf16.msra.mxu0 %v4469_v59 }
  0x72   :  { %958 = vmatprep.subr.bf16.mxu0 %v3992_v1 }
  0x73   :  { %881 = vmatpush1.bf16.msra.mxu1 %v4474_v63  ;;  %v387_v63 = vld [vmem:[%s6259_s0] sm:$0xff] }
  0x74   :  { %999 = vmatprep.subr.bf16.mxu1 %v4005_v6  ;;  %v389_v59 = vunpack.c.l.bf16 %v387_v63  ;;  %v390_v1 = vunpack.c.h.bf16 %v387_v63  ;;  %v388_v6 = vld [vmem:[%s6259_s0 + $0x8] sm:$0xff] }
  0x75   :  { %v392_v52 = vunpack.c.h.bf16 %v388_v6  ;;  %v391_v63 = vunpack.c.l.bf16 %v388_v6 }
 0x107   :  { %v4482_v60 = vpop.f32.mrb[0].mxu0 }
 0x108   :  { %v4484_v55 = vpop.f32.mrb[1].mxu0 }
 0x109   :  { %v343_v61 = vpop.f32.mrb[2].mxu0  ;;  %v4486_v54 = vpop.f32.mrb[0].mxu1 }
 0x10a   :  { %v344_v37 = vpop.f32.mrb[3].mxu0  ;;  %v4488_v57 = vpop.f32.mrb[1].mxu1 }
 0x10b   :  { %v384_v62 = vpop.f32.mrb[2].mxu1 }
 0x10c   :  { %v385_v0 = vpop.f32.mrb[3].mxu1 }
 0x127   :  { %v588_v51 = vpop.f32.mrb[4].mxu0 }
 0x128   :  { %v636_v56 = vadd.f32 %v588_v51, %v389_v59  ;;  %v590_v61 = vpop.f32.mrb[5].mxu0 }
 0x129   :  { %v637_v37 = vadd.f32 %v590_v61, %v390_v1  ;;  %v592_v50 = vpop.f32.mrb[6].mxu0  ;;  %v629_v0 = vpop.f32.mrb[4].mxu1 }
 0x12a   :  { %v3221_v53 = vmul.f32 -1.442695, %v636_v56  ;;  %v593_v47 = vpop.f32.mrb[7].mxu0  ;;  %v631_v45 = vpop.f32.mrb[5].mxu1  ;;  %v638_v46 = vadd.f32 %v629_v0, %v391_v63 }
 0x12b   :  { %v3222_v62 = vmul.f32 -1.442695, %v637_v37  ;;  %v639_v49 = vadd.f32 %v631_v45, %v392_v52  ;;  %v633_v43 = vpop.f32.mrb[6].mxu1 }
 0x12c   :  { %3471 = vpow2.f32 %v3221_v53  ;;  %v634_v48 = vpop.f32.mrb[7].mxu1 }
 0x12d   :  { %3473 = vpow2.f32 %v3222_v62  ;;  %v3223_v42 = vmul.f32 -1.442695, %v639_v49 }
 0x12f   :  { %3475 = vpow2.f32 %v3223_v42 }
 0x130   :  { %3477 = vtanh.f32 %v638_v46 }
 0x136   :  { %v3472_v39 = vpop.eup %3471 }
 0x137   :  { %v3474_v51 = vpop.eup %3473  ;;  %v643_v59 = vadd.f32 1.0, %v3472_v39 }
 0x138   :  { %v649_v1 = vadd.f32 1.0, %v3474_v51 }
 0x139   :  { %3479 = vrcp.f32 %v643_v59  ;;  %v3476_v47 = vpop.eup %3475 }
 0x13a   :  { %3481 = vrcp.f32 %v649_v1  ;;  %v3478_v50 = vpop.eup %3477  ;;  %v656_v56 = vadd.f32 1.0, %v3476_v47 }
 0x13c   :  { %3483 = vrcp.f32 %v656_v56 }
 0x143   :  { %v3480_v53 = vpop.eup %3479 }
 0x144   :  { %v3482_v61 = vpop.eup %3481  ;;  %v660_v37 = vmul.f32 %v3480_v53, %v3478_v50 }
 0x145   :  { %v659_v45 = vmul.f32 0.0, %v3482_v61 }
 0x146   :  { %v3484_v6 = vpop.eup %3483 }
 0x147   :  { %v4496_v43 = vadd.f32 %v660_v37, %v659_v45 }
 0x149   :  { %3485 = vtanh.f32 %v4496_v43 }
 0x153   :  { %v3486_v42 = vpop.eup %3485 }
 0x154   :  { %v663_v48 = vmul.f32 %v3486_v42, %v3484_v6 }
 0x156   :  { %v4499_v39 = vpack.c.bf16 %v663_v48, %v663_v48  ;;  %v6663_v48 = vld [vmem:[#allocation11_spill] sm:$0xff] }
 0x158   :  { %858 = vmatmul.mubr.bf16.vlgmr.msra.gmra.mrb[8].mxu0 %v4499_v39  ;;  %899 = vmatmul.mubr.bf16.vlgmr.msra.gmra.mrb[8].mxu1 %v4499_v39 }
 0x159   :  { %959 = vmatpush1.bf16.msra.mxu0 %v3994_v2  ;;  %1000 = vmatpush1.bf16.msra.mxu1 %v4007_v7  ;;  %v908_v2 = vlaneseq }
 0x15a   :  { %960 = vmatprep.subr.bf16.mxu0 %v3997_v3  ;;  %1001 = vmatprep.subr.bf16.mxu1 %v4017_v10 }
 0x15b   :  { %990 = vmatprep.mubr.bf16.mxu0 %v6630_v58  ;;  %1031 = vmatprep.mubr.bf16.mxu1 %v6630_v58  ;;  %v909_v3 = vshrl.u32 %v908_v2, 7  ;;  %v6664_v2 = vld [vmem:[#allocation15_spill] sm:$0xff] }
 0x15d   :  { %961 = vmatpush1.bf16.msra.mxu0 %v4000_v4  ;;  %1002 = vmatpush1.bf16.msra.mxu1 %v4019_v11  ;;  %v910_v4 = vsub.s32 0, %v909_v3  ;;  %v914_v7 = vsub.s32 1, %v909_v3  ;;  %v918_v49 = vsub.s32 2, %v909_v3 }
 0x15e   :  { %962 = vmatprep.subr.bf16.mxu0 %v4003_v5  ;;  %1003 = vmatprep.subr.bf16.mxu1 %v4027_v14  ;;  %v139_v5 = vld [vmem:[%s6263_s4] sm:$0xf] }
 0x15f   :  { %v4542_v11 = vrot.slane %v139_v5, %v914_v7  ;;  %v6674_v7 = vld [vmem:[#allocation25_spill] sm:$0xff] }
 0x161   :  { %963 = vmatpush1.bf16.msra.mxu0 %v4010_v8  ;;  %1004 = vmatpush1.bf16.msra.mxu1 %v4031_v15  ;;  %v4540_v8 = vrot.slane %v139_v5, %v910_v4  ;;  %v6670_v4 = vld [vmem:[#allocation21_spill] sm:$0xff] }
 0x162   :  { %964 = vmatprep.subr.bf16.mxu0 %v4014_v9  ;;  %1005 = vmatprep.subr.bf16.mxu1 %v4034_v16 }
 0x165   :  { %965 = vmatpush1.bf16.msra.mxu0 %v4023_v12  ;;  %1006 = vmatpush1.bf16.msra.mxu1 %v4043_v19 }
 0x166   :  { %966 = vmatprep.subr.bf16.mxu0 %v4025_v13  ;;  %1007 = vmatprep.subr.bf16.mxu1 %v4046_v20 }
 0x169   :  { %967 = vmatpush1.bf16.msra.mxu0 %v4037_v17  ;;  %1008 = vmatpush1.bf16.msra.mxu1 %v4055_v23 }
 0x16a   :  { %968 = vmatprep.subr.bf16.mxu0 %v4040_v18  ;;  %1009 = vmatprep.subr.bf16.mxu1 %v4058_v24  ;;  %v922_v18 = vsub.s32 3, %v909_v3  ;;  %v6665_v3 = vld [vmem:[#allocation12_spill] sm:$0xff] }
 0x16c   :  { %v4550_v46 = vrot.slane %v139_v5, %v922_v18  ;;  %v6683_v18 = vld [vmem:[#allocation28_spill] sm:$0xff] }
 0x16d   :  { %969 = vmatpush1.bf16.msra.mxu0 %v4049_v21  ;;  %1010 = vmatpush1.bf16.msra.mxu1 %v4067_v27 }
 0x16e   :  { %970 = vmatprep.subr.bf16.mxu0 %v4051_v22  ;;  %1011 = vmatprep.subr.bf16.mxu1 %v4070_v28 }
 0x171   :  { %971 = vmatpush1.bf16.msra.mxu0 %v4061_v25  ;;  %1012 = vmatpush1.bf16.msra.mxu1 %v4082_v31 }
 0x172   :  { %972 = vmatprep.subr.bf16.mxu0 %v4064_v26  ;;  %1013 = vmatprep.subr.bf16.mxu1 %v4085_v32 }
 0x175   :  { %973 = vmatpush1.bf16.msra.mxu0 %v4073_v29  ;;  %1014 = vmatpush1.bf16.msra.mxu1 %v4100_v35 }
 0x176   :  { %1047 = vmatprep.subr.bf16.mxu0 %v4078_v30  ;;  %1088 = vmatprep.subr.bf16.mxu1 %v4106_v36 }
 0x22b   :  { %v859_v9 = vpop.f32.mrb[8].mxu0  ;;  %v900_v10 = vpop.f32.mrb[8].mxu1 }
 0x22c   :  { %v860_v12 = vadd.f32 %v859_v9, %v4482_v60  ;;  %v901_v13 = vadd.f32 %v900_v10, %v4486_v54  ;;  %v861_v14 = vpop.f32.mrb[9].mxu0  ;;  %v902_v15 = vpop.f32.mrb[9].mxu1  ;;  %v4553_v54 = vrot.slane %v139_v5, %v918_v49  ;;  %v6671_v5 = vld [vmem:[#allocation16_spill] sm:$0xff]  ;;  %v6676_v10 = vld [vmem:[#allocation26_spill] sm:$0xff] }
 0x22d   :  { %v862_v16 = vadd.f32 %v861_v14, %v4484_v55  ;;  %v903_v17 = vadd.f32 %v902_v15, %v4488_v57  ;;  %v863_v19 = vpop.f32.mrb[10].mxu0  ;;  %v904_v20 = vpop.f32.mrb[10].mxu1  ;;  %v6675_v9 = vld [vmem:[#allocation20_spill] sm:$0xff]  ;;  %v6680_v15 = vld [vmem:[#allocation30_spill] sm:$0xff] }
 0x22e   :  { %v928_v21 = vadd.f32 %v4540_v8, %v860_v12  ;;  %v864_v22 = vpop.f32.mrb[11].mxu0  ;;  %v905_v23 = vpop.f32.mrb[11].mxu1  ;;  %v930_v57 = vadd.f32 %v4553_v54, %v901_v13  ;;  %v6677_v12 = vld [vmem:[#allocation23_spill] sm:$0xff]  ;;  %v6678_v13 = vld [vmem:[#allocation29_spill] sm:$0xff]  ;;  %v6679_v14 = vld [vmem:[#allocation24_spill] sm:$0xff] }
 0x22f   :  { %v929_v24 = vadd.f32 %v4542_v11, %v862_v16  ;;  %v931_v52 = vadd.f32 %v4550_v46, %v903_v17  ;;  %v6681_v16 = vld [vmem:[#allocation27_spill] sm:$0xff]  ;;  %v6682_v17 = vld [vmem:[#allocation32_spill] sm:$0xff]  ;;  %v6684_v19 = vld [vmem:[#allocation33_spill] sm:$0xff] }
 0x230   :  { %v3256_v25 = vmul.f32 -1.442695, %v928_v21  ;;  %v6685_v20 = vld [vmem:[#allocation31_spill] sm:$0xff]  ;;  %v6686_v21 = vld [vmem:[#allocation34_spill] sm:$0xff]  ;;  %v6688_v23 = vld [vmem:[#allocation36_spill] sm:$0xff] }
 0x231   :  { %v3257_v26 = vmul.f32 -1.442695, %v929_v24  ;;  %v3258_v55 = vmul.f32 -1.442695, %v931_v52  ;;  %v6687_v22 = vld [vmem:[#allocation35_spill] sm:$0xff]  ;;  %v6689_v24 = vld [vmem:[#allocation37_spill] sm:$0xff] }
 0x232   :  { %3487 = vpow2.f32 %v3256_v25  ;;  %v6690_v25 = vld [vmem:[#allocation38_spill] sm:$0xff]  ;;  %v6692_v49 = vld [vmem:[#allocation40_spill] sm:$0xff]  ;;  %v6693_v52 = vld [vmem:[#allocation41_spill] sm:$0xff] }
 0x233   :  { %3489 = vpow2.f32 %v3257_v26  ;;  %v6691_v26 = vld [vmem:[#allocation39_spill] sm:$0xff] }
 0x234   :  { %3491 = vpow2.f32 %v3258_v55  ;;  %v6694_v55 = vld [vmem:[#allocation42_spill] sm:$0xff] }
 0x235   :  { %3493 = vtanh.f32 %v930_v57  ;;  %v6695_v57 = vld [vmem:[#allocation43_spill] sm:$0xff] }
 0x23c   :  { %v3488_v60 = vpop.eup %3487 }
 0x23d   :  { %v3490_v62 = vpop.eup %3489  ;;  %v935_v0 = vadd.f32 1.0, %v3488_v60  ;;  %v6696_v60 = vld [vmem:[#allocation44_spill] sm:$0xff] }
 0x23e   :  { %v941_v63 = vadd.f32 1.0, %v3490_v62  ;;  %v3492_v51 = vpop.eup %3491  ;;  %v6698_v62 = vld [vmem:[#allocation46_spill] sm:$0xff] }
 0x23f   :  { %3495 = vrcp.f32 %v935_v0  ;;  %v3494_v59 = vpop.eup %3493  ;;  %v948_v53 = vadd.f32 1.0, %v3492_v51  ;;  %v6699_v0 = vld [vmem:[#allocation47_spill] sm:$0xff]  ;;  %v6701_v51 = vld [vmem:[#allocation49_spill] sm:$0xff] }
 0x240   :  { %3497 = vrcp.f32 %v941_v63  ;;  %v6700_v63 = vld [vmem:[#allocation48_spill] sm:$0xff] }
 0x241   :  { %3499 = vrcp.f32 %v948_v53  ;;  %v6706_v53 = vld [vmem:[#allocation54_spill] sm:$0xff] }
 0x249   :  { %v3496_v1 = vpop.eup %3495 }
 0x24a   :  { %v3498_v47 = vpop.eup %3497  ;;  %v952_v50 = vmul.f32 %v3496_v1, %v3494_v59  ;;  %v6702_v59 = vld [vmem:[#allocation50_spill] sm:$0xff]  ;;  %v6703_v1 = vld [vmem:[#allocation51_spill] sm:$0xff] }
 0x24b   :  { %v951_v56 = vmul.f32 0.0, %v3498_v47  ;;  %v3500_v37 = vpop.eup %3499  ;;  %v6704_v47 = vld [vmem:[#allocation52_spill] sm:$0xff] }
 0x24d   :  { %v4556_v61 = vadd.f32 %v952_v50, %v951_v56  ;;  %v6705_v50 = vld [vmem:[#allocation53_spill] sm:$0xff]  ;;  %v6707_v56 = vld [vmem:[#allocation55_spill] sm:$0xff] }
 0x24f   :  { %3501 = vtanh.f32 %v4556_v61 }
 0x259   :  { %v3502_v45 = vpop.eup %3501 }
 0x25a   :  { %v955_v6 = vmul.f32 %v3502_v45, %v3500_v37  ;;  %v6708_v37 = vld [vmem:[#allocation56_spill] sm:$0xff]  ;;  %v6709_v45 = vld [vmem:[#allocation57_spill] sm:$0xff] }
 0x25c   :  { %956 = vst [vmem:[%s6264_s5] sm:$0xff] %v955_v6  ;;  %v957_v42 = vpack.c.bf16 %v955_v6, %v955_v6  ;;  %v6710_v6 = vld [vmem:[#allocation58_spill] sm:$0xff] }
 0x25e   :  { %991 = vmatmul.mubr.bf16.vlgmr.msra.gmra.mrb[12].mxu0 %v957_v42  ;;  %1032 = vmatmul.mubr.bf16.vlgmr.msra.gmra.mrb[12].mxu1 %v957_v42  ;;  %v6711_v42 = vld [vmem:[#allocation59_spill] sm:$0xff] }
 0x25f   :  { %1048 = vmatpush1.bf16.msra.mxu0 %v4091_v33  ;;  %1089 = vmatpush1.bf16.msra.mxu1 %v4126_v40  ;;  %v6666_v33 = vld [vmem:[#allocation17_spill] sm:$0xff] }
 0x260   :  { %1049 = vmatprep.subr.bf16.mxu0 %v4097_v34  ;;  %1090 = vmatprep.subr.bf16.mxu1 %v4132_v41  ;;  %v6667_v40 = vld [vmem:[#allocation13_spill] sm:$0xff]  ;;  %v6668_v34 = vld [vmem:[#allocation18_spill] sm:$0xff] }
 0x261   :  { %1079 = vmatprep.mubr.bf16.mxu0 %v6630_v58  ;;  %1120 = vmatprep.mubr.bf16.mxu1 %v6630_v58  ;;  %v6669_v41 = vld [vmem:[#allocation14_spill] sm:$0xff] }
 0x263   :  { %1050 = vmatpush1.bf16.msra.mxu0 %v4113_v38  ;;  %1091 = vmatpush1.bf16.msra.mxu1 %v4151_v44  ;;  %v6672_v38 = vld [vmem:[#allocation22_spill] sm:$0xff]  ;;  %v6673_v44 = vld [vmem:[#allocation19_spill] sm:$0xff] }
 0x264   :  { %1051 = vmatprep.subr.bf16.mxu0 %v6663_v48  ;;  %1092 = vmatprep.subr.bf16.mxu1 %v6664_v2  ;;  %v6712_v48 = vld [vmem:[#allocation60_spill] sm:$0xff] }
 0x267   :  { %1052 = vmatpush1.bf16.msra.mxu0 %v6665_v3  ;;  %1093 = vmatpush1.bf16.msra.mxu1 %v6666_v33  ;;  %v6713_v3 = vld [vmem:[#allocation61_spill] sm:$0xff] }
 0x268   :  { %1053 = vmatprep.subr.bf16.mxu0 %v6667_v40  ;;  %1094 = vmatprep.subr.bf16.mxu1 %v6668_v34  ;;  %v6714_v40 = vld [vmem:[#allocation62_spill] sm:$0xff] }
 0x26b   :  { %1054 = vmatpush1.bf16.msra.mxu0 %v6669_v41  ;;  %1095 = vmatpush1.bf16.msra.mxu1 %v6670_v4  ;;  %v6715_v41 = vld [vmem:[#allocation63_spill] sm:$0xff] }
 0x26c   :  { %1055 = vmatprep.subr.bf16.mxu0 %v6671_v5  ;;  %1096 = vmatprep.subr.bf16.mxu1 %v6672_v38  ;;  %v6716_v5 = vld [vmem:[#allocation64_spill] sm:$0xff] }
 0x26f   :  { %1056 = vmatpush1.bf16.msra.mxu0 %v6673_v44  ;;  %1097 = vmatpush1.bf16.msra.mxu1 %v6674_v7 }
 0x270   :  { %1057 = vmatprep.subr.bf16.mxu0 %v6675_v9  ;;  %1098 = vmatprep.subr.bf16.mxu1 %v6676_v10 }
 0x273   :  { %1058 = vmatpush1.bf16.msra.mxu0 %v6677_v12  ;;  %1099 = vmatpush1.bf16.msra.mxu1 %v6678_v13 }
 0x274   :  { %1059 = vmatprep.subr.bf16.mxu0 %v6679_v14  ;;  %1100 = vmatprep.subr.bf16.mxu1 %v6680_v15 }
 0x277   :  { %1060 = vmatpush1.bf16.msra.mxu0 %v6681_v16  ;;  %1101 = vmatpush1.bf16.msra.mxu1 %v6682_v17 }
 0x278   :  { %1061 = vmatprep.subr.bf16.mxu0 %v6683_v18  ;;  %1102 = vmatprep.subr.bf16.mxu1 %v6684_v19 }
 0x27b   :  { %1062 = vmatpush1.bf16.msra.mxu0 %v6685_v20  ;;  %1103 = vmatpush1.bf16.msra.mxu1 %v6686_v21 }
 0x27c   :  { %1158 = vmatprep.subr.bf16.mxu0 %v6687_v22  ;;  %1199 = vmatprep.subr.bf16.mxu1 %v6688_v23 }
 0x27e   :  { %1080 = vmatmul.mubr.bf16.vlgmr.msra.gmra.mrb[16].mxu0 %v4499_v39  ;;  %1121 = vmatmul.mubr.bf16.vlgmr.msra.gmra.mrb[16].mxu1 %v4499_v39  ;;  %v6697_v39 = vld [vmem:[#allocation45_spill] sm:$0xff] }
 0x27f   :  { %1159 = vmatpush1.bf16.msra.mxu0 %v6689_v24  ;;  %1200 = vmatpush1.bf16.msra.mxu1 %v6690_v25 }
 0x280   :  { %1160 = vmatprep.subr.bf16.mxu0 %v6691_v26  ;;  %1201 = vmatprep.subr.bf16.mxu1 %v6692_v49 }
 0x281   :  { %1190 = vmatprep.mubr.bf16.mxu0 %v6630_v58  ;;  %1231 = vmatprep.mubr.bf16.mxu1 %v6630_v58 }
 0x283   :  { %1161 = vmatpush1.bf16.msra.mxu0 %v6693_v52  ;;  %1202 = vmatpush1.bf16.msra.mxu1 %v6694_v55 }
 0x284   :  { %1162 = vmatprep.subr.bf16.mxu0 %v6695_v57  ;;  %1203 = vmatprep.subr.bf16.mxu1 %v6696_v60 }
 0x287   :  { %1163 = vmatpush1.bf16.msra.mxu0 %v6697_v39  ;;  %1204 = vmatpush1.bf16.msra.mxu1 %v6698_v62 }
 0x288   :  { %1164 = vmatprep.subr.bf16.mxu0 %v6699_v0  ;;  %1205 = vmatprep.subr.bf16.mxu1 %v6700_v63 }
 0x28b   :  { %1165 = vmatpush1.bf16.msra.mxu0 %v6701_v51  ;;  %1206 = vmatpush1.bf16.msra.mxu1 %v6702_v59  ;;  %v3260_v59 = vld [vmem:[%s6259_s0 + $0x18] sm:$0xff] }
 0x28c   :  { %1166 = vmatprep.subr.bf16.mxu0 %v6703_v1  ;;  %1207 = vmatprep.subr.bf16.mxu1 %v6704_v47  ;;  %v1046_v60 = vunpack.c.h.bf16 %v3260_v59  ;;  %v1045_v57 = vunpack.c.l.bf16 %v3260_v59 }
 0x28f   :  { %1167 = vmatpush1.bf16.msra.mxu0 %v6705_v50  ;;  %1208 = vmatpush1.bf16.msra.mxu1 %v6706_v53  ;;  %v6717_v53 = vld [vmem:[#allocation65_spill] sm:$0xff] }
 0x290   :  { %1168 = vmatprep.subr.bf16.mxu0 %v6707_v56  ;;  %1209 = vmatprep.subr.bf16.mxu1 %v6708_v37  ;;  %v6718_v56 = vld [vmem:[#allocation66_spill] sm:$0xff]  ;;  %v6719_v37 = vld [vmem:[#allocation9_spill] sm:$0xff] }
 0x293   :  { %1169 = vmatpush1.bf16.msra.mxu0 %v6709_v45  ;;  %1210 = vmatpush1.bf16.msra.mxu1 %v6710_v6  ;;  %v6720_v45 = vld [vmem:[#allocation10_spill] sm:$0xff] }
 0x294   :  { %1170 = vmatprep.subr.bf16.mxu0 %v6711_v42  ;;  %1211 = vmatprep.subr.bf16.mxu1 %v6712_v48 }
 0x297   :  { %1171 = vmatpush1.bf16.msra.mxu0 %v6713_v3  ;;  %1212 = vmatpush1.bf16.msra.mxu1 %v6714_v40 }
 0x298   :  { %1172 = vmatprep.subr.bf16.mxu0 %v6715_v41  ;;  %1213 = vmatprep.subr.bf16.mxu1 %v6716_v5 }
 0x29b   :  { %1173 = vmatpush1.bf16.msra.mxu0 %v6717_v53  ;;  %1214 = vmatpush1.bf16.msra.mxu1 %v6718_v56  ;;  %v3259_v56 = vld [vmem:[%s6259_s0 + $0x10] sm:$0xff] }
 0x29c   :  { %1271 = vmatprep.subr.bf16.mxu0 %v6719_v37  ;;  %1312 = vmatprep.subr.bf16.mxu1 %v6720_v45  ;;  %v1043_v53 = vunpack.c.l.bf16 %v3259_v56  ;;  %v1044_v37 = vunpack.c.h.bf16 %v3259_v56 }
 0x331   :  { %v4632_v6 = vpop.f32.mrb[12].mxu0  ;;  %v4634_v42 = vpop.f32.mrb[12].mxu1 }
 0x332   :  { %v4636_v48 = vpop.f32.mrb[13].mxu0  ;;  %v4638_v3 = vpop.f32.mrb[13].mxu1 }
 0x333   :  { %v996_v40 = vpop.f32.mrb[14].mxu0  ;;  %v1037_v41 = vpop.f32.mrb[14].mxu1 }
 0x334   :  { %v997_v50 = vpop.f32.mrb[15].mxu0  ;;  %v1038_v5 = vpop.f32.mrb[15].mxu1 }
 0x351   :  { %v1081_v47 = vpop.f32.mrb[16].mxu0  ;;  %v1122_v45 = vpop.f32.mrb[16].mxu1 }
 0x352   :  { %v1129_v1 = vadd.f32 %v1081_v47, %v1043_v53  ;;  %v1083_v51 = vpop.f32.mrb[17].mxu0  ;;  %v1124_v63 = vpop.f32.mrb[17].mxu1  ;;  %v1131_v47 = vadd.f32 %v1122_v45, %v1045_v57  ;;  %v4668_v45 = vld [vmem:[#allocation6 + $0x20] ss:$16 sps:$4 sm:$0xff]  }
 0x353   :  { %v1130_v0 = vadd.f32 %v1083_v51, %v1044_v37  ;;  %v1085_v40 = vpop.f32.mrb[18].mxu0  ;;  %v1126_v41 = vpop.f32.mrb[18].mxu1  ;;  %v1132_v56 = vadd.f32 %v1124_v63, %v1046_v60 }
 0x354   :  { %v3261_v50 = vmul.f32 -1.442695, %v1129_v1  ;;  %v1086_v5 = vpop.f32.mrb[19].mxu0  ;;  %v1127_v62 = vpop.f32.mrb[19].mxu1  ;;  %v4671_v41 = vld [vmem:[#allocation6 + $0x28] ss:$16 sps:$4 sm:$0xff]  }
 0x355   :  { %v3262_v39 = vmul.f32 -1.442695, %v1130_v0  ;;  %v3263_v55 = vmul.f32 -1.442695, %v1132_v56  ;;  %v4677_v5 = vld [vmem:[#allocation6 + $0x4c] ss:$16 sps:$4 sm:$0xff]  }
 0x356   :  { %3503 = vpow2.f32 %v3261_v50  ;;  %v4674_v50 = vld [vmem:[#allocation6 + $0x44] ss:$16 sps:$4 sm:$0xff]   ;;  %v4680_v56 = vld [vmem:[#allocation6 + $0x40] ss:$16 sps:$4 sm:$0xff]  }
 0x357   :  { %3505 = vpow2.f32 %v3262_v39 }
 0x358   :  { %3507 = vpow2.f32 %v3263_v55 }
 0x359   :  { %3509 = vtanh.f32 %v1131_v47  ;;  %v4683_v47 = vld [vmem:[#allocation6 + $0x48] ss:$16 sps:$4 sm:$0xff]  }
 0x360   :  { %v3504_v53 = vpop.eup %3503 }
 0x361   :  { %v3506_v52 = vpop.eup %3505  ;;  %v1136_v49 = vadd.f32 1.0, %v3504_v53  ;;  %v4686_v53 = vld [vmem:[#allocation6 + $0x64] ss:$16 sps:$4 sm:$0xff]  }
 0x362   :  { %v1142_v26 = vadd.f32 1.0, %v3506_v52  ;;  %v3508_v51 = vpop.eup %3507  ;;  %v4663_v52 = vld [vmem:[#allocation6 + $0x2c] ss:$16 sps:$4 sm:$0xff]  }
 0x363   :  { %3511 = vrcp.f32 %v1136_v49  ;;  %v3510_v1 = vpop.eup %3509  ;;  %v1149_v40 = vadd.f32 1.0, %v3508_v51  ;;  %v4657_v49 = vld [vmem:[#allocation6 + $0x8] ss:$16 sps:$4 sm:$0xff]   ;;  %v4689_v51 = vld [vmem:[#allocation6 + $0x6c] ss:$16 sps:$4 sm:$0xff]  }
 0x364   :  { %3513 = vrcp.f32 %v1142_v26  ;;  %v4654_v26 = vld [vmem:[#allocation6] ss:$16 sps:$4 sm:$0xff]  }
 0x365   :  { %3515 = vrcp.f32 %v1149_v40  ;;  %v4704_v40 = vld [vmem:[#allocation6 + $0x80] ss:$16 sps:$4 sm:$0xff]  }
 0x366   :  { %6724 = vst [vmem:[#allocation17_spill] sm:$0xff] %v4704_v40 }
 0x36d   :  { %v3512_v37 = vpop.eup %3511 }
 0x36e   :  { %v3514_v62 = vpop.eup %3513  ;;  %v1153_v0 = vmul.f32 %v3512_v37, %v3510_v1  ;;  %v4692_v1 = vld [vmem:[#allocation6 + $0x60] ss:$16 sps:$4 sm:$0xff]   ;;  %v4695_v37 = vld [vmem:[#allocation6 + $0x68] ss:$16 sps:$4 sm:$0xff]  }
 0x36f   :  { %v1152_v39 = vmul.f32 %v3514_v62, %v4496_v43  ;;  %v3516_v57 = vpop.eup %3515  ;;  %v4660_v43 = vld [vmem:[#allocation6 + $0x24] ss:$16 sps:$4 sm:$0xff]   ;;  %6721 = vst [vmem:[#allocation11_spill] sm:$0xff] %v4695_v37 }
 0x370   :  { %v4698_v62 = vld [vmem:[#allocation6 + $0x84] ss:$16 sps:$4 sm:$0xff]  }
 0x371   :  { %v4647_v60 = vadd.f32 %v1153_v0, %v1152_v39  ;;  %6722 = vst [vmem:[#allocation15_spill] sm:$0xff] %v4698_v62  ;;  %v4701_v0 = vld [vmem:[#allocation6 + $0x8c] ss:$16 sps:$4 sm:$0xff]   ;;  %v4707_v39 = vld [vmem:[#allocation6 + $0x88] ss:$16 sps:$4 sm:$0xff]  }
 0x372   :  { %6723 = vst [vmem:[#allocation12_spill] sm:$0xff] %v4701_v0  ;;  %6725 = vst [vmem:[#allocation13_spill] sm:$0xff] %v4707_v39 }
 0x373   :  { %3517 = vtanh.f32 %v4647_v60 }
 0x37d   :  { %v3518_v63 = vpop.eup %3517 }
 0x37e   :  { %v1156_v55 = vmul.f32 %v3518_v63, %v3516_v57  ;;  %v4710_v57 = vld [vmem:[#allocation6 + $0xa4] ss:$16 sps:$4 sm:$0xff]   ;;  %v4713_v63 = vld [vmem:[#allocation6 + $0xac] ss:$16 sps:$4 sm:$0xff]  }
 0x37f   :  { %6726 = vst [vmem:[#allocation18_spill] sm:$0xff] %v4710_v57  ;;  %6727 = vst [vmem:[#allocation14_spill] sm:$0xff] %v4713_v63 }
 0x380   :  { %v4650_v59 = vpack.c.bf16 %v1156_v55, %v1156_v55  ;;  %v4716_v55 = vld [vmem:[#allocation6 + $0xa0] ss:$16 sps:$4 sm:$0xff]  }
 0x381   :  { %6728 = vst [vmem:[#allocation21_spill] sm:$0xff] %v4716_v55 }
 0x382   :  { %1191 = vmatmul.mubr.bf16.vlgmr.msra.gmra.mrb[20].mxu0 %v4650_v59  ;;  %1232 = vmatmul.mubr.bf16.vlgmr.msra.gmra.mrb[20].mxu1 %v4650_v59 }
 0x383   :  { %1272 = vmatpush1.bf16.msra.mxu0 %v4654_v26  ;;  %1313 = vmatpush1.bf16.msra.mxu1 %v4657_v49 }
 0x384   :  { %1273 = vmatprep.subr.bf16.mxu0 %v4660_v43  ;;  %1314 = vmatprep.subr.bf16.mxu1 %v4663_v52 }
 0x385   :  { %1303 = vmatprep.mubr.bf16.mxu0 %v6630_v58  ;;  %1344 = vmatprep.mubr.bf16.mxu1 %v6630_v58 }
 0x387   :  { %1274 = vmatpush1.bf16.msra.mxu0 %v4668_v45  ;;  %1315 = vmatpush1.bf16.msra.mxu1 %v4671_v41 }
 0x388   :  { %1275 = vmatprep.subr.bf16.mxu0 %v4674_v50  ;;  %1316 = vmatprep.subr.bf16.mxu1 %v4677_v5 }
 0x38b   :  { %1276 = vmatpush1.bf16.msra.mxu0 %v4680_v56  ;;  %1317 = vmatpush1.bf16.msra.mxu1 %v4683_v47 }
 0x38c   :  { %1277 = vmatprep.subr.bf16.mxu0 %v4686_v53  ;;  %1318 = vmatprep.subr.bf16.mxu1 %v4689_v51 }
 0x38f   :  { %1278 = vmatpush1.bf16.msra.mxu0 %v4692_v1  ;;  %1319 = vmatpush1.bf16.msra.mxu1 %v4695_v37 }
 0x390   :  { %1279 = vmatprep.subr.bf16.mxu0 %v4698_v62  ;;  %1320 = vmatprep.subr.bf16.mxu1 %v4701_v0  ;;  %v4720_v0 = vld [vmem:[#allocation6 + $0xc4] ss:$16 sps:$4 sm:$0xff]  }
 0x391   :  { %6729 = vst [vmem:[#allocation16_spill] sm:$0xff] %v4720_v0 }
 0x393   :  { %1280 = vmatpush1.bf16.msra.mxu0 %v4704_v40  ;;  %1321 = vmatpush1.bf16.msra.mxu1 %v4707_v39  ;;  %v4724_v39 = vld [vmem:[#allocation6 + $0xc0] ss:$16 sps:$4 sm:$0xff]  }
 0x394   :  { %1281 = vmatprep.subr.bf16.mxu0 %v4710_v57  ;;  %1322 = vmatprep.subr.bf16.mxu1 %v4713_v63  ;;  %6730 = vst [vmem:[#allocation22_spill] sm:$0xff] %v4724_v39  ;;  %v4728_v57 = vld [vmem:[#allocation6 + $0xe4] ss:$16 sps:$4 sm:$0xff]  }
 0x395   :  { %6731 = vst [vmem:[#allocation19_spill] sm:$0xff] %v4728_v57 }
 0x397   :  { %1282 = vmatpush1.bf16.msra.mxu0 %v4716_v55  ;;  %1323 = vmatpush1.bf16.msra.mxu1 %v4067_v27 }
 0x398   :  { %1283 = vmatprep.subr.bf16.mxu0 %v4720_v0  ;;  %1324 = vmatprep.subr.bf16.mxu1 %v4070_v28 }
 0x39b   :  { %1284 = vmatpush1.bf16.msra.mxu0 %v4724_v39  ;;  %1325 = vmatpush1.bf16.msra.mxu1 %v4082_v31 }
 0x39c   :  { %1285 = vmatprep.subr.bf16.mxu0 %v4728_v57  ;;  %1326 = vmatprep.subr.bf16.mxu1 %v4085_v32 }
 0x39f   :  { %1286 = vmatpush1.bf16.msra.mxu0 %v4073_v29  ;;  %1327 = vmatpush1.bf16.msra.mxu1 %v4100_v35 }
 0x3a0   :  { %1360 = vmatprep.subr.bf16.mxu0 %v4078_v30  ;;  %1401 = vmatprep.subr.bf16.mxu1 %v4106_v36 }
 0x455   :  { %v1192_v27 = vpop.f32.mrb[20].mxu0  ;;  %v1233_v28 = vpop.f32.mrb[20].mxu1 }
 0x456   :  { %v1193_v39 = vadd.f32 %v1192_v27, %v4632_v6  ;;  %v1234_v31 = vadd.f32 %v1233_v28, %v4634_v42  ;;  %v1194_v0 = vpop.f32.mrb[21].mxu0  ;;  %v1235_v55 = vpop.f32.mrb[21].mxu1 }
 0x457   :  { %v1195_v57 = vadd.f32 %v1194_v0, %v4636_v48  ;;  %v1236_v32 = vadd.f32 %v1235_v55, %v4638_v3  ;;  %v1196_v63 = vpop.f32.mrb[22].mxu0  ;;  %v1237_v29 = vpop.f32.mrb[22].mxu1 }
 0x458   :  { %v1240_v35 = vadd.f32 %v1193_v39, %v4540_v8  ;;  %v1197_v40 = vpop.f32.mrb[23].mxu0  ;;  %v1238_v30 = vpop.f32.mrb[23].mxu1  ;;  %v1242_v27 = vadd.f32 %v1234_v31, %v4553_v54 }
 0x459   :  { %v1241_v36 = vadd.f32 %v1195_v57, %v4542_v11  ;;  %v1243_v6 = vadd.f32 %v1236_v32, %v4550_v46 }
 0x45a   :  { %v3264_v62 = vmul.f32 -1.442695, %v1240_v35 }
 0x45b   :  { %v3265_v37 = vmul.f32 -1.442695, %v1241_v36  ;;  %v3266_v42 = vmul.f32 -1.442695, %v1243_v6  ;;  %v4754_v36 = vld [vmem:[%s6260_s1] ss:$16 sps:$4 sm:$0xff]  }
 0x45c   :  { %3519 = vpow2.f32 %v3264_v62  ;;  %v4766_v6 = vld [vmem:[%s6260_s1 + $0x24] ss:$16 sps:$4 sm:$0xff]  }
 0x45d   :  { %3521 = vpow2.f32 %v3265_v37 }
 0x45e   :  { %3523 = vpow2.f32 %v3266_v42  ;;  %v4772_v42 = vld [vmem:[%s6260_s1 + $0x2c] ss:$16 sps:$4 sm:$0xff]  }
 0x45f   :  { %3525 = vtanh.f32 %v1242_v27  ;;  %v4780_v27 = vld [vmem:[%s6260_s1 + $0x20] ss:$16 sps:$4 sm:$0xff]  }
 0x466   :  { %v3520_v48 = vpop.eup %3519 }
 0x467   :  { %v3522_v0 = vpop.eup %3521  ;;  %v1247_v3 = vadd.f32 1.0, %v3520_v48  ;;  %v4786_v48 = vld [vmem:[%s6260_s1 + $0x28] ss:$16 sps:$4 sm:$0xff]  }
 0x468   :  { %v1253_v63 = vadd.f32 1.0, %v3522_v0  ;;  %v3524_v40 = vpop.eup %3523  ;;  %v4792_v0 = vld [vmem:[%s6260_s1 + $0x44] ss:$16 sps:$4 sm:$0xff]  }
 0x469   :  { %3527 = vrcp.f32 %v1247_v3  ;;  %v3526_v39 = vpop.eup %3525  ;;  %v1260_v62 = vadd.f32 1.0, %v3524_v40  ;;  %v4799_v3 = vld [vmem:[%s6260_s1 + $0x40] ss:$16 sps:$4 sm:$0xff]  }
 0x46a   :  { %3529 = vrcp.f32 %v1253_v63  ;;  %6732 = vst [vmem:[#allocation25_spill] sm:$0xff] %v4799_v3  ;;  %v4806_v63 = vld [vmem:[%s6260_s1 + $0x64] ss:$16 sps:$4 sm:$0xff]  }
 0x46b   :  { %3531 = vrcp.f32 %v1260_v62  ;;  %6733 = vst [vmem:[#allocation20_spill] sm:$0xff] %v4806_v63  ;;  %v6758_v40 = vld [vmem:[#allocation61_spill] sm:$0xff]  ;;  %v6763_v62 = vld [vmem:[#allocation66_spill] sm:$0xff] }
 0x473   :  { %v3528_v57 = vpop.eup %3527 }
 0x474   :  { %v3530_v55 = vpop.eup %3529  ;;  %v1264_v28 = vmul.f32 %v3528_v57, %v3526_v39  ;;  %v6759_v39 = vld [vmem:[#allocation62_spill] sm:$0xff]  ;;  %v6760_v57 = vld [vmem:[#allocation63_spill] sm:$0xff] }
 0x475   :  { %v1263_v37 = vmul.f32 %v3530_v55, %v4556_v61  ;;  %v3532_v31 = vpop.eup %3531  ;;  %v4760_v61 = vld [vmem:[%s6260_s1 + $0x8] ss:$16 sps:$4 sm:$0xff]  }
 0x476   :  { %v6761_v55 = vld [vmem:[#allocation64_spill] sm:$0xff] }
 0x477   :  { %v4745_v32 = vadd.f32 %v1264_v28, %v1263_v37  ;;  %v6762_v28 = vld [vmem:[#allocation65_spill] sm:$0xff] }
 0x478   :  { %v4874_v37 = vld [vmem:[#allocation6 + $0x4] ss:$16 sps:$4 sm:$0xff]  }
 0x479   :  { %3533 = vtanh.f32 %v4745_v32  ;;  %6764 = vst [vmem:[#allocation29_spill] sm:$0xff] %v4874_v37 }
 0x483   :  { %v3534_v29 = vpop.eup %3533 }
 0x484   :  { %v1267_v35 = vmul.f32 %v3534_v29, %v3532_v31  ;;  %v4877_v31 = vld [vmem:[#allocation6 + $0xc] ss:$16 sps:$4 sm:$0xff]  }
 0x485   :  { %6765 = vst [vmem:[#allocation24_spill] sm:$0xff] %v4877_v31 }
 0x486   :  { %3267 = vst [vmem:[%s6264_s5 + $0x8] sm:$0xff] %v1267_v35  ;;  %v1270_v30 = vpack.c.bf16 %v1267_v35, %v1267_v35 }
 0x488   :  { %1304 = vmatmul.mubr.bf16.vlgmr.msra.gmra.mrb[24].mxu0 %v1270_v30  ;;  %1345 = vmatmul.mubr.bf16.vlgmr.msra.gmra.mrb[24].mxu1 %v1270_v30 }
 0x489   :  { %1361 = vmatpush1.bf16.msra.mxu0 %v4754_v36  ;;  %1402 = vmatpush1.bf16.msra.mxu1 %v4760_v61 }
 0x48a   :  { %1362 = vmatprep.subr.bf16.mxu0 %v4766_v6  ;;  %1403 = vmatprep.subr.bf16.mxu1 %v4772_v42 }
 0x48b   :  { %1392 = vmatprep.mubr.bf16.mxu0 %v6630_v58  ;;  %1433 = vmatprep.mubr.bf16.mxu1 %v6630_v58 }
 0x48d   :  { %1363 = vmatpush1.bf16.msra.mxu0 %v4780_v27  ;;  %1404 = vmatpush1.bf16.msra.mxu1 %v4786_v48 }
 0x48e   :  { %1364 = vmatprep.subr.bf16.mxu0 %v4792_v0  ;;  %1405 = vmatprep.subr.bf16.mxu1 %v6664_v2  ;;  %v4813_v2 = vld [vmem:[%s6260_s1 + $0x60] ss:$16 sps:$4 sm:$0xff]  }
 0x48f   :  { %6734 = vst [vmem:[#allocation26_spill] sm:$0xff] %v4813_v2 }
 0x491   :  { %1365 = vmatpush1.bf16.msra.mxu0 %v4799_v3  ;;  %1406 = vmatpush1.bf16.msra.mxu1 %v6666_v33  ;;  %v4820_v33 = vld [vmem:[%s6260_s1 + $0x84] ss:$16 sps:$4 sm:$0xff]  }
 0x492   :  { %1366 = vmatprep.subr.bf16.mxu0 %v4806_v63  ;;  %1407 = vmatprep.subr.bf16.mxu1 %v6668_v34  ;;  %6735 = vst [vmem:[#allocation23_spill] sm:$0xff] %v4820_v33  ;;  %v6736_v34 = vld [vmem:[#allocation39_spill] sm:$0xff] }
 0x495   :  { %1367 = vmatpush1.bf16.msra.mxu0 %v4813_v2  ;;  %1408 = vmatpush1.bf16.msra.mxu1 %v6670_v4  ;;  %v6737_v4 = vld [vmem:[#allocation40_spill] sm:$0xff] }
 0x496   :  { %1368 = vmatprep.subr.bf16.mxu0 %v4820_v33  ;;  %1409 = vmatprep.subr.bf16.mxu1 %v6672_v38  ;;  %v6738_v38 = vld [vmem:[#allocation41_spill] sm:$0xff] }
 0x499   :  { %1369 = vmatpush1.bf16.msra.mxu0 %v6673_v44  ;;  %1410 = vmatpush1.bf16.msra.mxu1 %v6674_v7  ;;  %v6739_v44 = vld [vmem:[#allocation42_spill] sm:$0xff]  ;;  %v6740_v7 = vld [vmem:[#allocation43_spill] sm:$0xff] }
 0x49a   :  { %1370 = vmatprep.subr.bf16.mxu0 %v6675_v9  ;;  %1411 = vmatprep.subr.bf16.mxu1 %v6676_v10  ;;  %v6741_v9 = vld [vmem:[#allocation44_spill] sm:$0xff]  ;;  %v6742_v10 = vld [vmem:[#allocation45_spill] sm:$0xff] }
 0x49d   :  { %1371 = vmatpush1.bf16.msra.mxu0 %v6677_v12  ;;  %1412 = vmatpush1.bf16.msra.mxu1 %v6678_v13  ;;  %v6743_v12 = vld [vmem:[#allocation46_spill] sm:$0xff]  ;;  %v6744_v13 = vld [vmem:[#allocation47_spill] sm:$0xff] }
 0x49e   :  { %1372 = vmatprep.subr.bf16.mxu0 %v6679_v14  ;;  %1413 = vmatprep.subr.bf16.mxu1 %v6680_v15  ;;  %v6745_v14 = vld [vmem:[#allocation48_spill] sm:$0xff]  ;;  %v6746_v15 = vld [vmem:[#allocation49_spill] sm:$0xff] }
 0x4a1   :  { %1373 = vmatpush1.bf16.msra.mxu0 %v6681_v16  ;;  %1414 = vmatpush1.bf16.msra.mxu1 %v6682_v17  ;;  %v6747_v16 = vld [vmem:[#allocation50_spill] sm:$0xff]  ;;  %v6748_v17 = vld [vmem:[#allocation51_spill] sm:$0xff] }
 0x4a2   :  { %1374 = vmatprep.subr.bf16.mxu0 %v6683_v18  ;;  %1415 = vmatprep.subr.bf16.mxu1 %v6684_v19  ;;  %v6749_v18 = vld [vmem:[#allocation52_spill] sm:$0xff]  ;;  %v6750_v19 = vld [vmem:[#allocation53_spill] sm:$0xff] }
 0x4a5   :  { %1375 = vmatpush1.bf16.msra.mxu0 %v6685_v20  ;;  %1416 = vmatpush1.bf16.msra.mxu1 %v6686_v21  ;;  %v6751_v20 = vld [vmem:[#allocation54_spill] sm:$0xff]  ;;  %v6752_v21 = vld [vmem:[#allocation55_spill] sm:$0xff] }
 0x4a6   :  { %1471 = vmatprep.subr.bf16.mxu0 %v6687_v22  ;;  %1512 = vmatprep.subr.bf16.mxu1 %v6688_v23  ;;  %v6753_v22 = vld [vmem:[#allocation56_spill] sm:$0xff]  ;;  %v6754_v23 = vld [vmem:[#allocation57_spill] sm:$0xff] }
 0x4a8   :  { %1393 = vmatmul.mubr.bf16.vlgmr.msra.gmra.mrb[28].mxu0 %v4650_v59  ;;  %1434 = vmatmul.mubr.bf16.vlgmr.msra.gmra.mrb[28].mxu1 %v4650_v59  ;;  %v6757_v59 = vld [vmem:[#allocation60_spill] sm:$0xff] }
 0x4a9   :  { %1472 = vmatpush1.bf16.msra.mxu0 %v6689_v24  ;;  %1513 = vmatpush1.bf16.msra.mxu1 %v6690_v25  ;;  %v6755_v24 = vld [vmem:[#allocation58_spill] sm:$0xff]  ;;  %v6756_v25 = vld [vmem:[#allocation59_spill] sm:$0xff] }
 0x4aa   :  { %1473 = vmatprep.subr.bf16.mxu0 %v6736_v34  ;;  %1514 = vmatprep.subr.bf16.mxu1 %v6737_v4 }
 0x4ab   :  { %1503 = vmatprep.mubr.bf16.mxu0 %v6630_v58  ;;  %1544 = vmatprep.mubr.bf16.mxu1 %v6630_v58 }
 0x4ad   :  { %1474 = vmatpush1.bf16.msra.mxu0 %v6738_v38  ;;  %1515 = vmatpush1.bf16.msra.mxu1 %v6739_v44 }
 0x4ae   :  { %1475 = vmatprep.subr.bf16.mxu0 %v6740_v7  ;;  %1516 = vmatprep.subr.bf16.mxu1 %v6741_v9  ;;  %v3268_v9 = vld [vmem:[%s6259_s0 + $0x20] sm:$0xff] }
 0x4b1   :  { %1476 = vmatpush1.bf16.msra.mxu0 %v6742_v10  ;;  %1517 = vmatpush1.bf16.msra.mxu1 %v6743_v12  ;;  %v1356_v10 = vunpack.c.l.bf16 %v3268_v9  ;;  %v1357_v12 = vunpack.c.h.bf16 %v3268_v9 }
 0x4b2   :  { %1477 = vmatprep.subr.bf16.mxu0 %v6744_v13  ;;  %1518 = vmatprep.subr.bf16.mxu1 %v6745_v14 }
 0x4b5   :  { %1478 = vmatpush1.bf16.msra.mxu0 %v6746_v15  ;;  %1519 = vmatpush1.bf16.msra.mxu1 %v6747_v16  ;;  %v3269_v16 = vld [vmem:[%s6259_s0 + $0x28] sm:$0xff] }
 0x4b6   :  { %1479 = vmatprep.subr.bf16.mxu0 %v6748_v17  ;;  %1520 = vmatprep.subr.bf16.mxu1 %v6749_v18 }
 0x4b9   :  { %1480 = vmatpush1.bf16.msra.mxu0 %v6750_v19  ;;  %1521 = vmatpush1.bf16.msra.mxu1 %v6751_v20 }
 0x4ba   :  { %1481 = vmatprep.subr.bf16.mxu0 %v6752_v21  ;;  %1522 = vmatprep.subr.bf16.mxu1 %v6753_v22 }
 0x4bd   :  { %1482 = vmatpush1.bf16.msra.mxu0 %v6754_v23  ;;  %1523 = vmatpush1.bf16.msra.mxu1 %v6755_v24 }
 0x4be   :  { %1483 = vmatprep.subr.bf16.mxu0 %v6756_v25  ;;  %1524 = vmatprep.subr.bf16.mxu1 %v6757_v59  ;;  %v1359_v59 = vunpack.c.h.bf16 %v3269_v16 }
 0x4c1   :  { %1484 = vmatpush1.bf16.msra.mxu0 %v6758_v40  ;;  %1525 = vmatpush1.bf16.msra.mxu1 %v6759_v39  ;;  %v1358_v39 = vunpack.c.l.bf16 %v3269_v16 }
 0x4c2   :  { %1485 = vmatprep.subr.bf16.mxu0 %v6760_v57  ;;  %1526 = vmatprep.subr.bf16.mxu1 %v6761_v55 }
 0x4c5   :  { %1486 = vmatpush1.bf16.msra.mxu0 %v6762_v28  ;;  %1527 = vmatpush1.bf16.msra.mxu1 %v6763_v62 }
 0x4c6   :  { %1584 = vmatprep.subr.bf16.mxu0 %v4874_v37  ;;  %1625 = vmatprep.subr.bf16.mxu1 %v4877_v31 }
 0x55b   :  { %v4880_v29 = vpop.f32.mrb[24].mxu0  ;;  %v4882_v35 = vpop.f32.mrb[24].mxu1 }
 0x55c   :  { %v4884_v30 = vpop.f32.mrb[25].mxu0  ;;  %v4886_v34 = vpop.f32.mrb[25].mxu1 }
 0x55d   :  { %v1309_v4 = vpop.f32.mrb[26].mxu0  ;;  %v1350_v38 = vpop.f32.mrb[26].mxu1 }
 0x55e   :  { %v1310_v44 = vpop.f32.mrb[27].mxu0  ;;  %v1351_v7 = vpop.f32.mrb[27].mxu1 }
 0x57b   :  { %v1394_v13 = vpop.f32.mrb[28].mxu0  ;;  %v1435_v14 = vpop.f32.mrb[28].mxu1 }
 0x57c   :  { %v1442_v15 = vadd.f32 %v1394_v13, %v1356_v10  ;;  %v1396_v17 = vpop.f32.mrb[29].mxu0  ;;  %v1437_v18 = vpop.f32.mrb[29].mxu1  ;;  %v1444_v55 = vadd.f32 %v1435_v14, %v1358_v39  ;;  %v6774_v39 = vld [vmem:[#allocation16_spill] sm:$0xff] }
 0x57d   :  { %v1443_v19 = vadd.f32 %v1396_v17, %v1357_v12  ;;  %v1398_v20 = vpop.f32.mrb[30].mxu0  ;;  %v1439_v21 = vpop.f32.mrb[30].mxu1  ;;  %v1445_v40 = vadd.f32 %v1437_v18, %v1359_v59  ;;  %v6773_v59 = vld [vmem:[#allocation21_spill] sm:$0xff] }
 0x57e   :  { %v3270_v22 = vmul.f32 -1.442695, %v1442_v15  ;;  %v1399_v23 = vpop.f32.mrb[31].mxu0  ;;  %v1440_v24 = vpop.f32.mrb[31].mxu1  ;;  %v6767_v20 = vld [vmem:[#allocation15_spill] sm:$0xff]  ;;  %v6768_v21 = vld [vmem:[#allocation12_spill] sm:$0xff] }
 0x57f   :  { %v3271_v25 = vmul.f32 -1.442695, %v1443_v19  ;;  %v3272_v57 = vmul.f32 -1.442695, %v1445_v40  ;;  %v6770_v23 = vld [vmem:[#allocation13_spill] sm:$0xff]  ;;  %v6771_v24 = vld [vmem:[#allocation18_spill] sm:$0xff] }
 0x580   :  { %3535 = vpow2.f32 %v3270_v22  ;;  %v6769_v22 = vld [vmem:[#allocation17_spill] sm:$0xff]  ;;  %v4925_v40 = vld [vmem:[#allocation6 + $0xa8] ss:$16 sps:$4 sm:$0xff]  }
 0x581   :  { %3537 = vpow2.f32 %v3271_v25  ;;  %v6772_v25 = vld [vmem:[#allocation14_spill] sm:$0xff] }
 0x582   :  { %3539 = vpow2.f32 %v3272_v57  ;;  %v4929_v57 = vld [vmem:[#allocation6 + $0xcc] ss:$16 sps:$4 sm:$0xff]  }
 0x583   :  { %3541 = vtanh.f32 %v1444_v55  ;;  %6775 = vst [vmem:[#allocation30_spill] sm:$0xff] %v4929_v57  ;;  %v6776_v55 = vld [vmem:[#allocation22_spill] sm:$0xff] }
 0x58a   :  { %v3536_v28 = vpop.eup %3535 }
 0x58b   :  { %v3538_v62 = vpop.eup %3537  ;;  %v1449_v4 = vadd.f32 1.0, %v3536_v28  ;;  %v4933_v28 = vld [vmem:[#allocation6 + $0xc8] ss:$16 sps:$4 sm:$0xff]  }
 0x58c   :  { %v1455_v38 = vadd.f32 1.0, %v3538_v62  ;;  %v3540_v44 = vpop.eup %3539  ;;  %6777 = vst [vmem:[#allocation27_spill] sm:$0xff] %v4933_v28  ;;  %v6778_v62 = vld [vmem:[#allocation19_spill] sm:$0xff] }
 0x58d   :  { %3543 = vrcp.f32 %v1449_v4  ;;  %v3542_v7 = vpop.eup %3541  ;;  %v1462_v13 = vadd.f32 1.0, %v3540_v44  ;;  %v4937_v4 = vld [vmem:[#allocation6 + $0xec] ss:$16 sps:$4 sm:$0xff]   ;;  %v4943_v44 = vld [vmem:[#allocation6 + $0xe8] ss:$16 sps:$4 sm:$0xff]  }
 0x58e   :  { %3545 = vrcp.f32 %v1455_v38  ;;  %6779 = vst [vmem:[#allocation32_spill] sm:$0xff] %v4937_v4  ;;  %v4940_v38 = vld [vmem:[#allocation6 + $0xe0] ss:$16 sps:$4 sm:$0xff]   ;;  %6781 = vst [vmem:[#allocation33_spill] sm:$0xff] %v4943_v44 }
 0x58f   :  { %3547 = vrcp.f32 %v1462_v13  ;;  %6780 = vst [vmem:[#allocation28_spill] sm:$0xff] %v4940_v38 }
 0x597   :  { %v3544_v9 = vpop.eup %3543 }
 0x598   :  { %v3546_v10 = vpop.eup %3545  ;;  %v1466_v12 = vmul.f32 %v3544_v9, %v3542_v7  ;;  %v4949_v7 = vld [vmem:[%s6260_s1 + $0x4] ss:$16 sps:$4 sm:$0xff]   ;;  %v4955_v9 = vld [vmem:[%s6260_s1 + $0xc] ss:$16 sps:$4 sm:$0xff]  }
 0x599   :  { %v1465_v15 = vmul.f32 %v3546_v10, %v4647_v60  ;;  %v3548_v14 = vpop.eup %3547  ;;  %v6766_v60 = vld [vmem:[#allocation11_spill] sm:$0xff]  ;;  %6782 = vst [vmem:[#allocation31_spill] sm:$0xff] %v4949_v7  ;;  %6783 = vst [vmem:[#allocation34_spill] sm:$0xff] %v4955_v9 }
 0x59b   :  { %v4895_v17 = vadd.f32 %v1466_v12, %v1465_v15 }
 0x59d   :  { %3549 = vtanh.f32 %v4895_v17 }
 0x5a7   :  { %v3550_v16 = vpop.eup %3549 }
 0x5a8   :  { %v1469_v18 = vmul.f32 %v3550_v16, %v3548_v14 }
 0x5aa   :  { %v4898_v19 = vpack.c.bf16 %v1469_v18, %v1469_v18 }
 0x5ac   :  { %1504 = vmatmul.mubr.bf16.vlgmr.msra.gmra.mrb[32].mxu0 %v4898_v19  ;;  %1545 = vmatmul.mubr.bf16.vlgmr.msra.gmra.mrb[32].mxu1 %v4898_v19 }
 0x5ad   :  { %1585 = vmatpush1.bf16.msra.mxu0 %v4654_v26  ;;  %1626 = vmatpush1.bf16.msra.mxu1 %v4657_v49 }
 0x5ae   :  { %1586 = vmatprep.subr.bf16.mxu0 %v4660_v43  ;;  %1627 = vmatprep.subr.bf16.mxu1 %v4663_v52 }
 0x5af   :  { %1616 = vmatprep.mubr.bf16.mxu0 %v6630_v58  ;;  %1657 = vmatprep.mubr.bf16.mxu1 %v6630_v58 }
 0x5b1   :  { %1587 = vmatpush1.bf16.msra.mxu0 %v4668_v45  ;;  %1628 = vmatpush1.bf16.msra.mxu1 %v4671_v41 }
 0x5b2   :  { %1588 = vmatprep.subr.bf16.mxu0 %v4674_v50  ;;  %1629 = vmatprep.subr.bf16.mxu1 %v4677_v5 }
 0x5b5   :  { %1589 = vmatpush1.bf16.msra.mxu0 %v4680_v56  ;;  %1630 = vmatpush1.bf16.msra.mxu1 %v4683_v47 }
 0x5b6   :  { %1590 = vmatprep.subr.bf16.mxu0 %v4686_v53  ;;  %1631 = vmatprep.subr.bf16.mxu1 %v4689_v51 }
 0x5b9   :  { %1591 = vmatpush1.bf16.msra.mxu0 %v4692_v1  ;;  %1632 = vmatpush1.bf16.msra.mxu1 %v6766_v60 }
 0x5ba   :  { %1592 = vmatprep.subr.bf16.mxu0 %v6767_v20  ;;  %1633 = vmatprep.subr.bf16.mxu1 %v6768_v21 }
 0x5bd   :  { %1593 = vmatpush1.bf16.msra.mxu0 %v6769_v22  ;;  %1634 = vmatpush1.bf16.msra.mxu1 %v6770_v23 }
 0x5be   :  { %1594 = vmatprep.subr.bf16.mxu0 %v6771_v24  ;;  %1635 = vmatprep.subr.bf16.mxu1 %v6772_v25 }
 0x5c1   :  { %1595 = vmatpush1.bf16.msra.mxu0 %v6773_v59  ;;  %1636 = vmatpush1.bf16.msra.mxu1 %v4925_v40 }
 0x5c2   :  { %1596 = vmatprep.subr.bf16.mxu0 %v6774_v39  ;;  %1637 = vmatprep.subr.bf16.mxu1 %v4929_v57 }
 0x5c5   :  { %1597 = vmatpush1.bf16.msra.mxu0 %v6776_v55  ;;  %1638 = vmatpush1.bf16.msra.mxu1 %v4933_v28 }
 0x5c6   :  { %1598 = vmatprep.subr.bf16.mxu0 %v6778_v62  ;;  %1639 = vmatprep.subr.bf16.mxu1 %v4937_v4 }
 0x5c9   :  { %1599 = vmatpush1.bf16.msra.mxu0 %v4940_v38  ;;  %1640 = vmatpush1.bf16.msra.mxu1 %v4943_v44 }
 0x5ca   :  { %1673 = vmatprep.subr.bf16.mxu0 %v4949_v7  ;;  %1714 = vmatprep.subr.bf16.mxu1 %v4955_v9 }
 0x67f   :  { %v1505_v10 = vpop.f32.mrb[32].mxu0  ;;  %v1546_v12 = vpop.f32.mrb[32].mxu1 }
 0x680   :  { %v1506_v13 = vadd.f32 %v1505_v10, %v4880_v29  ;;  %v1547_v15 = vadd.f32 %v1546_v12, %v4882_v35  ;;  %v1507_v14 = vpop.f32.mrb[33].mxu0  ;;  %v1548_v16 = vpop.f32.mrb[33].mxu1 }
 0x681   :  { %v1508_v18 = vadd.f32 %v1507_v14, %v4884_v30  ;;  %v1549_v44 = vadd.f32 %v1548_v16, %v4886_v34  ;;  %v1509_v7 = vpop.f32.mrb[34].mxu0  ;;  %v1550_v38 = vpop.f32.mrb[34].mxu1 }
 0x682   :  { %v1553_v4 = vadd.f32 %v1506_v13, %v4540_v8  ;;  %v1510_v62 = vpop.f32.mrb[35].mxu0  ;;  %v1551_v28 = vpop.f32.mrb[35].mxu1  ;;  %v1555_v10 = vadd.f32 %v1547_v15, %v4553_v54 }
 0x683   :  { %v1554_v9 = vadd.f32 %v1508_v18, %v4542_v11  ;;  %v1556_v29 = vadd.f32 %v1549_v44, %v4550_v46  ;;  %v4992_v18 = vld [vmem:[%s6260_s1 + $0x48] ss:$16 sps:$4 sm:$0xff]  }
 0x684   :  { %v3273_v55 = vmul.f32 -1.442695, %v1553_v4  ;;  %6784 = vst [vmem:[#allocation35_spill] sm:$0xff] %v4992_v18 }
 0x685   :  { %v3274_v57 = vmul.f32 -1.442695, %v1554_v9  ;;  %v3275_v35 = vmul.f32 -1.442695, %v1556_v29  ;;  %v4999_v29 = vld [vmem:[%s6260_s1 + $0x6c] ss:$16 sps:$4 sm:$0xff]  }
 0x686   :  { %3551 = vpow2.f32 %v3273_v55  ;;  %6785 = vst [vmem:[#allocation36_spill] sm:$0xff] %v4999_v29 }
 0x687   :  { %3553 = vpow2.f32 %v3274_v57 }
 0x688   :  { %3555 = vpow2.f32 %v3275_v35  ;;  %v5006_v35 = vld [vmem:[%s6260_s1 + $0x68] ss:$16 sps:$4 sm:$0xff]  }
 0x689   :  { %3557 = vtanh.f32 %v1555_v10  ;;  %6786 = vst [vmem:[#allocation37_spill] sm:$0xff] %v5006_v35  ;;  %v5013_v10 = vld [vmem:[%s6260_s1 + $0x8c] ss:$16 sps:$4 sm:$0xff]  }
 0x68a   :  { %6787 = vst [vmem:[#allocation38_spill] sm:$0xff] %v5013_v10 }
 0x690   :  { %v3552_v30 = vpop.eup %3551 }
 0x691   :  { %v3554_v12 = vpop.eup %3553  ;;  %v1560_v34 = vadd.f32 1.0, %v3552_v30  ;;  %v5019_v30 = vld [vmem:[%s6260_s1 + $0x80] ss:$16 sps:$4 sm:$0xff]  }
 0x692   :  { %v1566_v38 = vadd.f32 1.0, %v3554_v12  ;;  %v3556_v28 = vpop.eup %3555  ;;  %6788 = vst [vmem:[#allocation9_spill] sm:$0xff] %v5019_v30  ;;  %v5025_v12 = vld [vmem:[%s6260_s1 + $0x88] ss:$16 sps:$4 sm:$0xff]  }
 0x693   :  { %3559 = vrcp.f32 %v1560_v34  ;;  %v3558_v62 = vpop.eup %3557  ;;  %v1573_v55 = vadd.f32 1.0, %v3556_v28  ;;  %6789 = vst [vmem:[#allocation10_spill] sm:$0xff] %v5025_v12  ;;  %v5031_v34 = vld [vmem:[%s6260_s1 + $0xa4] ss:$16 sps:$4 sm:$0xff]   ;;  %v5043_v28 = vld [vmem:[%s6260_s1 + $0xa0] ss:$16 sps:$4 sm:$0xff]  }
 0x694   :  { %3561 = vrcp.f32 %v1566_v38  ;;  %6790 = vst [vmem:[#allocation39_spill] sm:$0xff] %v5031_v34  ;;  %v5037_v38 = vld [vmem:[%s6260_s1 + $0xac] ss:$16 sps:$4 sm:$0xff]   ;;  %6792 = vst [vmem:[#allocation41_spill] sm:$0xff] %v5043_v28 }
 0x695   :  { %3563 = vrcp.f32 %v1573_v55  ;;  %6791 = vst [vmem:[#allocation40_spill] sm:$0xff] %v5037_v38  ;;  %v5073_v55 = vld [vmem:[%s6260_s1 + $0xc8] ss:$16 sps:$4 sm:$0xff]  }
 0x696   :  { %6797 = vst [vmem:[#allocation46_spill] sm:$0xff] %v5073_v55 }
 0x69d   :  { %v3560_v7 = vpop.eup %3559 }
 0x69e   :  { %v3562_v4 = vpop.eup %3561  ;;  %v1577_v9 = vmul.f32 %v3560_v7, %v3558_v62  ;;  %v5049_v62 = vld [vmem:[%s6260_s1 + $0xa8] ss:$16 sps:$4 sm:$0xff]   ;;  %v5055_v7 = vld [vmem:[%s6260_s1 + $0xc4] ss:$16 sps:$4 sm:$0xff]  }
 0x69f   :  { %v1576_v57 = vmul.f32 %v3562_v4, %v4745_v32  ;;  %v3564_v13 = vpop.eup %3563  ;;  %v4985_v32 = vld [vmem:[%s6260_s1 + $0x4c] ss:$16 sps:$4 sm:$0xff]   ;;  %6793 = vst [vmem:[#allocation42_spill] sm:$0xff] %v5049_v62  ;;  %6794 = vst [vmem:[#allocation43_spill] sm:$0xff] %v5055_v7 }
 0x6a0   :  { %v5061_v4 = vld [vmem:[%s6260_s1 + $0xcc] ss:$16 sps:$4 sm:$0xff]  }
 0x6a1   :  { %v4967_v44 = vadd.f32 %v1577_v9, %v1576_v57  ;;  %6795 = vst [vmem:[#allocation44_spill] sm:$0xff] %v5061_v4  ;;  %v5067_v9 = vld [vmem:[%s6260_s1 + $0xc0] ss:$16 sps:$4 sm:$0xff]   ;;  %v5079_v57 = vld [vmem:[%s6260_s1 + $0xe4] ss:$16 sps:$4 sm:$0xff]  }
 0x6a2   :  { %6796 = vst [vmem:[#allocation45_spill] sm:$0xff] %v5067_v9  ;;  %6798 = vst [vmem:[#allocation47_spill] sm:$0xff] %v5079_v57 }
 0x6a3   :  { %3565 = vtanh.f32 %v4967_v44 }
 0x6ad   :  { %v3566_v15 = vpop.eup %3565 }
 0x6ae   :  { %v1580_v14 = vmul.f32 %v3566_v15, %v3564_v13  ;;  %v5085_v13 = vld [vmem:[%s6260_s1 + $0xec] ss:$16 sps:$4 sm:$0xff]   ;;  %v5091_v15 = vld [vmem:[%s6260_s1 + $0xe0] ss:$16 sps:$4 sm:$0xff]  }
 0x6af   :  { %6799 = vst [vmem:[#allocation48_spill] sm:$0xff] %v5085_v13  ;;  %6800 = vst [vmem:[#allocation49_spill] sm:$0xff] %v5091_v15 }
 0x6b0   :  { %3276 = vst [vmem:[%s6264_s5 + $0x10] sm:$0xff] %v1580_v14  ;;  %v1583_v16 = vpack.c.bf16 %v1580_v14, %v1580_v14  ;;  %v5097_v14 = vld [vmem:[%s6260_s1 + $0xe8] ss:$16 sps:$4 sm:$0xff]  }
 0x6b1   :  { %6801 = vst [vmem:[#allocation50_spill] sm:$0xff] %v5097_v14 }
 0x6b2   :  { %1617 = vmatmul.mubr.bf16.vlgmr.msra.gmra.mrb[36].mxu0 %v1583_v16  ;;  %1658 = vmatmul.mubr.bf16.vlgmr.msra.gmra.mrb[36].mxu1 %v1583_v16  ;;  %v5103_v16 = vld [vmem:[%s6261_s2 + $0x4] ss:$16 sps:$4 sm:$0xff]  }
 0x6b3   :  { %1674 = vmatpush1.bf16.msra.mxu0 %v4754_v36  ;;  %1715 = vmatpush1.bf16.msra.mxu1 %v4760_v61  ;;  %6802 = vst [vmem:[#allocation51_spill] sm:$0xff] %v5103_v16 }
 0x6b4   :  { %1675 = vmatprep.subr.bf16.mxu0 %v4766_v6  ;;  %1716 = vmatprep.subr.bf16.mxu1 %v4772_v42 }
 0x6b5   :  { %1705 = vmatprep.mubr.bf16.mxu0 %v6630_v58  ;;  %1746 = vmatprep.mubr.bf16.mxu1 %v6630_v58 }
 0x6b7   :  { %1676 = vmatpush1.bf16.msra.mxu0 %v4780_v27  ;;  %1717 = vmatpush1.bf16.msra.mxu1 %v4786_v48 }
 0x6b8   :  { %1677 = vmatprep.subr.bf16.mxu0 %v4792_v0  ;;  %1718 = vmatprep.subr.bf16.mxu1 %v4985_v32 }
 0x6bb   :  { %1678 = vmatpush1.bf16.msra.mxu0 %v4799_v3  ;;  %1719 = vmatpush1.bf16.msra.mxu1 %v4992_v18 }
 0x6bc   :  { %1679 = vmatprep.subr.bf16.mxu0 %v4806_v63  ;;  %1720 = vmatprep.subr.bf16.mxu1 %v4999_v29 }
 0x6bf   :  { %1680 = vmatpush1.bf16.msra.mxu0 %v4813_v2  ;;  %1721 = vmatpush1.bf16.msra.mxu1 %v5006_v35 }
 0x6c0   :  { %1681 = vmatprep.subr.bf16.mxu0 %v4820_v33  ;;  %1722 = vmatprep.subr.bf16.mxu1 %v5013_v10 }
 0x6c3   :  { %1682 = vmatpush1.bf16.msra.mxu0 %v5019_v30  ;;  %1723 = vmatpush1.bf16.msra.mxu1 %v5025_v12 }
 0x6c4   :  { %1683 = vmatprep.subr.bf16.mxu0 %v5031_v34  ;;  %1724 = vmatprep.subr.bf16.mxu1 %v5037_v38  ;;  %v3278_v38 = vld [vmem:[%s6259_s0 + $0x38] sm:$0xff] }
 0x6c5   :  { %v1672_v35 = vunpack.c.h.bf16 %v3278_v38  ;;  %v1671_v2 = vunpack.c.l.bf16 %v3278_v38 }
 0x6c7   :  { %1684 = vmatpush1.bf16.msra.mxu0 %v5043_v28  ;;  %1725 = vmatpush1.bf16.msra.mxu1 %v5049_v62 }
 0x6c8   :  { %1685 = vmatprep.subr.bf16.mxu0 %v5055_v7  ;;  %1726 = vmatprep.subr.bf16.mxu1 %v5061_v4 }
 0x6cb   :  { %1686 = vmatpush1.bf16.msra.mxu0 %v5067_v9  ;;  %1727 = vmatpush1.bf16.msra.mxu1 %v5073_v55 }
 0x6cc   :  { %1687 = vmatprep.subr.bf16.mxu0 %v5079_v57  ;;  %1728 = vmatprep.subr.bf16.mxu1 %v5085_v13  ;;  %v5109_v13 = vld [vmem:[%s6261_s2 + $0xc] ss:$16 sps:$4 sm:$0xff]  }
 0x6cd   :  { %6803 = vst [vmem:[#allocation52_spill] sm:$0xff] %v5109_v13 }
 0x6cf   :  { %1688 = vmatpush1.bf16.msra.mxu0 %v5091_v15  ;;  %1729 = vmatpush1.bf16.msra.mxu1 %v5097_v14  ;;  %v5117_v14 = vld [vmem:[%s6261_s2] ss:$16 sps:$4 sm:$0xff]  }
 0x6d0   :  { %1784 = vmatprep.subr.bf16.mxu0 %v5103_v16  ;;  %1825 = vmatprep.subr.bf16.mxu1 %v5109_v13  ;;  %6804 = vst [vmem:[#allocation53_spill] sm:$0xff] %v5117_v14  ;;  %v5123_v16 = vld [vmem:[%s6261_s2 + $0x8] ss:$16 sps:$4 sm:$0xff]   ;;  %v5129_v13 = vld [vmem:[%s6261_s2 + $0x24] ss:$16 sps:$4 sm:$0xff]  }
 0x6d1   :  { %6805 = vst [vmem:[#allocation54_spill] sm:$0xff] %v5123_v16  ;;  %6806 = vst [vmem:[#allocation55_spill] sm:$0xff] %v5129_v13 }
 0x6d2   :  { %1706 = vmatmul.mubr.bf16.vlgmr.msra.gmra.mrb[40].mxu0 %v4898_v19  ;;  %1747 = vmatmul.mubr.bf16.vlgmr.msra.gmra.mrb[40].mxu1 %v4898_v19  ;;  %v5135_v19 = vld [vmem:[%s6261_s2 + $0x2c] ss:$16 sps:$4 sm:$0xff]  }
 0x6d3   :  { %1785 = vmatpush1.bf16.msra.mxu0 %v5117_v14  ;;  %1826 = vmatpush1.bf16.msra.mxu1 %v5123_v16  ;;  %6807 = vst [vmem:[#allocation56_spill] sm:$0xff] %v5135_v19  ;;  %v5143_v16 = vld [vmem:[%s6261_s2 + $0x20] ss:$16 sps:$4 sm:$0xff]   ;;  %v5161_v14 = vld [vmem:[%s6261_s2 + $0x4c] ss:$16 sps:$4 sm:$0xff]  }
 0x6d4   :  { %1786 = vmatprep.subr.bf16.mxu0 %v5129_v13  ;;  %1827 = vmatprep.subr.bf16.mxu1 %v5135_v19  ;;  %6808 = vst [vmem:[#allocation57_spill] sm:$0xff] %v5143_v16  ;;  %v5149_v13 = vld [vmem:[%s6261_s2 + $0x28] ss:$16 sps:$4 sm:$0xff]   ;;  %v5155_v19 = vld [vmem:[%s6261_s2 + $0x44] ss:$16 sps:$4 sm:$0xff]   ;;  %6811 = vst [vmem:[#allocation60_spill] sm:$0xff] %v5161_v14 }
 0x6d5   :  { %1816 = vmatprep.mubr.bf16.mxu0 %v6630_v58  ;;  %1857 = vmatprep.mubr.bf16.mxu1 %v6630_v58  ;;  %6809 = vst [vmem:[#allocation58_spill] sm:$0xff] %v5149_v13  ;;  %6810 = vst [vmem:[#allocation59_spill] sm:$0xff] %v5155_v19 }
 0x6d7   :  { %1787 = vmatpush1.bf16.msra.mxu0 %v5143_v16  ;;  %1828 = vmatpush1.bf16.msra.mxu1 %v5149_v13  ;;  %v5167_v16 = vld [vmem:[%s6261_s2 + $0x40] ss:$16 sps:$4 sm:$0xff]   ;;  %v5173_v13 = vld [vmem:[%s6261_s2 + $0x48] ss:$16 sps:$4 sm:$0xff]  }
 0x6d8   :  { %1788 = vmatprep.subr.bf16.mxu0 %v5155_v19  ;;  %1829 = vmatprep.subr.bf16.mxu1 %v5161_v14  ;;  %6812 = vst [vmem:[#allocation61_spill] sm:$0xff] %v5167_v16  ;;  %6813 = vst [vmem:[#allocation62_spill] sm:$0xff] %v5173_v13  ;;  %v5179_v19 = vld [vmem:[%s6261_s2 + $0x64] ss:$16 sps:$4 sm:$0xff]   ;;  %v5185_v14 = vld [vmem:[%s6261_s2 + $0x6c] ss:$16 sps:$4 sm:$0xff]  }
 0x6d9   :  { %6814 = vst [vmem:[#allocation63_spill] sm:$0xff] %v5179_v19  ;;  %6815 = vst [vmem:[#allocation64_spill] sm:$0xff] %v5185_v14 }
 0x6db   :  { %1789 = vmatpush1.bf16.msra.mxu0 %v5167_v16  ;;  %1830 = vmatpush1.bf16.msra.mxu1 %v5173_v13  ;;  %v5191_v16 = vld [vmem:[%s6261_s2 + $0x60] ss:$16 sps:$4 sm:$0xff]   ;;  %v5197_v13 = vld [vmem:[%s6261_s2 + $0x68] ss:$16 sps:$4 sm:$0xff]  }
 0x6dc   :  { %1790 = vmatprep.subr.bf16.mxu0 %v5179_v19  ;;  %1831 = vmatprep.subr.bf16.mxu1 %v5185_v14  ;;  %6816 = vst [vmem:[#allocation65_spill] sm:$0xff] %v5191_v16  ;;  %6817 = vst [vmem:[#allocation66_spill] sm:$0xff] %v5197_v13  ;;  %v5203_v19 = vld [vmem:[%s6261_s2 + $0x84] ss:$16 sps:$4 sm:$0xff]   ;;  %v5209_v14 = vld [vmem:[%s6261_s2 + $0x8c] ss:$16 sps:$4 sm:$0xff]  }
 0x6dd   :  { %6818 = vst [vmem:[#allocation11_spill] sm:$0xff] %v5203_v19  ;;  %6819 = vst [vmem:[#allocation15_spill] sm:$0xff] %v5209_v14 }
 0x6df   :  { %1791 = vmatpush1.bf16.msra.mxu0 %v5191_v16  ;;  %1832 = vmatpush1.bf16.msra.mxu1 %v5197_v13  ;;  %v5215_v16 = vld [vmem:[%s6261_s2 + $0x80] ss:$16 sps:$4 sm:$0xff]   ;;  %v5221_v13 = vld [vmem:[%s6261_s2 + $0x88] ss:$16 sps:$4 sm:$0xff]  }
 0x6e0   :  { %1792 = vmatprep.subr.bf16.mxu0 %v5203_v19  ;;  %1833 = vmatprep.subr.bf16.mxu1 %v5209_v14  ;;  %6820 = vst [vmem:[#allocation12_spill] sm:$0xff] %v5215_v16  ;;  %6821 = vst [vmem:[#allocation17_spill] sm:$0xff] %v5221_v13  ;;  %v5227_v19 = vld [vmem:[%s6261_s2 + $0xa4] ss:$16 sps:$4 sm:$0xff]   ;;  %v5233_v14 = vld [vmem:[%s6261_s2 + $0xac] ss:$16 sps:$4 sm:$0xff]  }
 0x6e1   :  { %6822 = vst [vmem:[#allocation13_spill] sm:$0xff] %v5227_v19  ;;  %6823 = vst [vmem:[#allocation18_spill] sm:$0xff] %v5233_v14 }
 0x6e3   :  { %1793 = vmatpush1.bf16.msra.mxu0 %v5215_v16  ;;  %1834 = vmatpush1.bf16.msra.mxu1 %v5221_v13  ;;  %v5239_v16 = vld [vmem:[%s6261_s2 + $0xa0] ss:$16 sps:$4 sm:$0xff]   ;;  %v5245_v13 = vld [vmem:[%s6261_s2 + $0xa8] ss:$16 sps:$4 sm:$0xff]  }
 0x6e4   :  { %1794 = vmatprep.subr.bf16.mxu0 %v5227_v19  ;;  %1835 = vmatprep.subr.bf16.mxu1 %v5233_v14  ;;  %6824 = vst [vmem:[#allocation14_spill] sm:$0xff] %v5239_v16  ;;  %6825 = vst [vmem:[#allocation21_spill] sm:$0xff] %v5245_v13  ;;  %v5251_v19 = vld [vmem:[%s6261_s2 + $0xc4] ss:$16 sps:$4 sm:$0xff]   ;;  %v5257_v14 = vld [vmem:[%s6261_s2 + $0xcc] ss:$16 sps:$4 sm:$0xff]  }
 0x6e5   :  { %6826 = vst [vmem:[#allocation16_spill] sm:$0xff] %v5251_v19  ;;  %6827 = vst [vmem:[#allocation67_spill] sm:$0xff] %v5257_v14 }
 0x6e7   :  { %1795 = vmatpush1.bf16.msra.mxu0 %v5239_v16  ;;  %1836 = vmatpush1.bf16.msra.mxu1 %v5245_v13  ;;  %v5263_v16 = vld [vmem:[%s6261_s2 + $0xc0] ss:$16 sps:$4 sm:$0xff]   ;;  %v5269_v13 = vld [vmem:[%s6261_s2 + $0xc8] ss:$16 sps:$4 sm:$0xff]  }
 0x6e8   :  { %1796 = vmatprep.subr.bf16.mxu0 %v5251_v19  ;;  %1837 = vmatprep.subr.bf16.mxu1 %v5257_v14  ;;  %6828 = vst [vmem:[#allocation68_spill] sm:$0xff] %v5263_v16  ;;  %6829 = vst [vmem:[#allocation69_spill] sm:$0xff] %v5269_v13  ;;  %v5275_v19 = vld [vmem:[%s6261_s2 + $0xe4] ss:$16 sps:$4 sm:$0xff]   ;;  %v5281_v14 = vld [vmem:[%s6261_s2 + $0xec] ss:$16 sps:$4 sm:$0xff]  }
 0x6e9   :  { %6830 = vst [vmem:[#allocation70_spill] sm:$0xff] %v5275_v19  ;;  %6831 = vst [vmem:[#allocation71_spill] sm:$0xff] %v5281_v14 }
 0x6eb   :  { %1797 = vmatpush1.bf16.msra.mxu0 %v5263_v16  ;;  %1838 = vmatpush1.bf16.msra.mxu1 %v5269_v13  ;;  %v5287_v16 = vld [vmem:[%s6261_s2 + $0xe0] ss:$16 sps:$4 sm:$0xff]   ;;  %v5293_v13 = vld [vmem:[%s6261_s2 + $0xe8] ss:$16 sps:$4 sm:$0xff]  }
 0x6ec   :  { %1798 = vmatprep.subr.bf16.mxu0 %v5275_v19  ;;  %1839 = vmatprep.subr.bf16.mxu1 %v5281_v14  ;;  %6832 = vst [vmem:[#allocation72_spill] sm:$0xff] %v5287_v16  ;;  %6833 = vst [vmem:[#allocation73_spill] sm:$0xff] %v5293_v13 }
 0x6ef   :  { %1799 = vmatpush1.bf16.msra.mxu0 %v5287_v16  ;;  %1840 = vmatpush1.bf16.msra.mxu1 %v5293_v13  ;;  %v3277_v13 = vld [vmem:[%s6259_s0 + $0x30] sm:$0xff] }
 0x6f0   :  { %1897 = vmatprep.subr.bf16.mxu0 %v4874_v37  ;;  %1938 = vmatprep.subr.bf16.mxu1 %v4877_v31  ;;  %v1669_v7 = vunpack.c.l.bf16 %v3277_v13  ;;  %v1670_v37 = vunpack.c.h.bf16 %v3277_v13 }
 0x785   :  { %v5298_v19 = vpop.f32.mrb[36].mxu0  ;;  %v5300_v14 = vpop.f32.mrb[36].mxu1 }
 0x786   :  { %v5302_v15 = vpop.f32.mrb[37].mxu0  ;;  %v5304_v57 = vpop.f32.mrb[37].mxu1 }
 0x787   :  { %v1622_v16 = vpop.f32.mrb[38].mxu0  ;;  %v1663_v55 = vpop.f32.mrb[38].mxu1 }
 0x788   :  { %v1623_v9 = vpop.f32.mrb[39].mxu0  ;;  %v1664_v4 = vpop.f32.mrb[39].mxu1 }
 0x7a5   :  { %v1707_v62 = vpop.f32.mrb[40].mxu0  ;;  %v1748_v31 = vpop.f32.mrb[40].mxu1 }
 0x7a6   :  { %v1755_v28 = vadd.f32 %v1707_v62, %v1669_v7  ;;  %v1709_v34 = vpop.f32.mrb[41].mxu0  ;;  %v1750_v12 = vpop.f32.mrb[41].mxu1  ;;  %v1757_v62 = vadd.f32 %v1748_v31, %v1671_v2 }
 0x7a7   :  { %v1756_v30 = vadd.f32 %v1709_v34, %v1670_v37  ;;  %v1711_v16 = vpop.f32.mrb[42].mxu0  ;;  %v1752_v55 = vpop.f32.mrb[42].mxu1  ;;  %v1758_v13 = vadd.f32 %v1750_v12, %v1672_v35 }
 0x7a8   :  { %v3279_v9 = vmul.f32 -1.442695, %v1755_v28  ;;  %v1712_v4 = vpop.f32.mrb[43].mxu0  ;;  %v1753_v10 = vpop.f32.mrb[43].mxu1 }
 0x7a9   :  { %v3280_v33 = vmul.f32 -1.442695, %v1756_v30  ;;  %v3281_v29 = vmul.f32 -1.442695, %v1758_v13 }
 0x7aa   :  { %3567 = vpow2.f32 %v3279_v9 }
 0x7ab   :  { %3569 = vpow2.f32 %v3280_v33 }
 0x7ac   :  { %3571 = vpow2.f32 %v3281_v29 }
 0x7ad   :  { %3573 = vtanh.f32 %v1757_v62 }
 0x7b4   :  { %v3568_v7 = vpop.eup %3567 }
 0x7b5   :  { %v3570_v63 = vpop.eup %3569  ;;  %v1762_v18 = vadd.f32 1.0, %v3568_v7 }
 0x7b6   :  { %v1768_v3 = vadd.f32 1.0, %v3570_v63  ;;  %v3572_v37 = vpop.eup %3571 }
 0x7b7   :  { %3575 = vrcp.f32 %v1762_v18  ;;  %v3574_v34 = vpop.eup %3573  ;;  %v1775_v16 = vadd.f32 1.0, %v3572_v37 }
 0x7b8   :  { %3577 = vrcp.f32 %v1768_v3 }
 0x7b9   :  { %3579 = vrcp.f32 %v1775_v16 }
 0x7c1   :  { %v3576_v28 = vpop.eup %3575 }
 0x7c2   :  { %v3578_v10 = vpop.eup %3577  ;;  %v1779_v30 = vmul.f32 %v3576_v28, %v3574_v34 }
 0x7c3   :  { %v1778_v33 = vmul.f32 %v3578_v10, %v4895_v17  ;;  %v3580_v2 = vpop.eup %3579 }
 0x7c5   :  { %v5313_v35 = vadd.f32 %v1779_v30, %v1778_v33 }
 0x7c7   :  { %3581 = vtanh.f32 %v5313_v35 }
 0x7d1   :  { %v3582_v31 = vpop.eup %3581 }
 0x7d2   :  { %v1782_v29 = vmul.f32 %v3582_v31, %v3580_v2  ;;  %v6848_v2 = vld [vmem:[#allocation37_spill] sm:$0xff]  ;;  %v6849_v31 = vld [vmem:[#allocation23_spill] sm:$0xff] }
 0x7d4   :  { %v5316_v12 = vpack.c.bf16 %v1782_v29, %v1782_v29  ;;  %v6853_v29 = vld [vmem:[#allocation39_spill] sm:$0xff] }
 0x7d6   :  { %1817 = vmatmul.mubr.bf16.vlgmr.msra.gmra.mrb[44].mxu0 %v5316_v12  ;;  %1858 = vmatmul.mubr.bf16.vlgmr.msra.gmra.mrb[44].mxu1 %v5316_v12 }
 0x7d7   :  { %1898 = vmatpush1.bf16.msra.mxu0 %v4654_v26  ;;  %1939 = vmatpush1.bf16.msra.mxu1 %v4657_v49  ;;  %v6834_v26 = vld [vmem:[#allocation30_spill] sm:$0xff] }
 0x7d8   :  { %1899 = vmatprep.subr.bf16.mxu0 %v4660_v43  ;;  %1940 = vmatprep.subr.bf16.mxu1 %v4663_v52  ;;  %v6835_v49 = vld [vmem:[#allocation22_spill] sm:$0xff]  ;;  %v6836_v43 = vld [vmem:[#allocation27_spill] sm:$0xff] }
 0x7d9   :  { %1929 = vmatprep.mubr.bf16.mxu0 %v6630_v58  ;;  %1970 = vmatprep.mubr.bf16.mxu1 %v6630_v58  ;;  %v6837_v52 = vld [vmem:[#allocation19_spill] sm:$0xff] }
 0x7db   :  { %1900 = vmatpush1.bf16.msra.mxu0 %v4668_v45  ;;  %1941 = vmatpush1.bf16.msra.mxu1 %v4671_v41  ;;  %v6838_v45 = vld [vmem:[#allocation32_spill] sm:$0xff] }
 0x7dc   :  { %1901 = vmatprep.subr.bf16.mxu0 %v4674_v50  ;;  %1942 = vmatprep.subr.bf16.mxu1 %v4677_v5  ;;  %v6839_v41 = vld [vmem:[#allocation28_spill] sm:$0xff]  ;;  %v6840_v50 = vld [vmem:[#allocation33_spill] sm:$0xff]  ;;  %v6841_v5 = vld [vmem:[#allocation31_spill] sm:$0xff] }
 0x7df   :  { %1902 = vmatpush1.bf16.msra.mxu0 %v4680_v56  ;;  %1943 = vmatpush1.bf16.msra.mxu1 %v4683_v47  ;;  %v6842_v56 = vld [vmem:[#allocation34_spill] sm:$0xff] }
 0x7e0   :  { %1903 = vmatprep.subr.bf16.mxu0 %v4686_v53  ;;  %1944 = vmatprep.subr.bf16.mxu1 %v4689_v51 }
 0x7e3   :  { %1904 = vmatpush1.bf16.msra.mxu0 %v4692_v1  ;;  %1945 = vmatpush1.bf16.msra.mxu1 %v6766_v60 }
 0x7e4   :  { %1905 = vmatprep.subr.bf16.mxu0 %v6767_v20  ;;  %1946 = vmatprep.subr.bf16.mxu1 %v6768_v21 }
 0x7e7   :  { %1906 = vmatpush1.bf16.msra.mxu0 %v6769_v22  ;;  %1947 = vmatpush1.bf16.msra.mxu1 %v6770_v23 }
 0x7e8   :  { %1907 = vmatprep.subr.bf16.mxu0 %v6771_v24  ;;  %1948 = vmatprep.subr.bf16.mxu1 %v6772_v25 }
 0x7eb   :  { %1908 = vmatpush1.bf16.msra.mxu0 %v6773_v59  ;;  %1949 = vmatpush1.bf16.msra.mxu1 %v4925_v40 }
 0x7ec   :  { %1909 = vmatprep.subr.bf16.mxu0 %v6774_v39  ;;  %1950 = vmatprep.subr.bf16.mxu1 %v6834_v26 }
 0x7ef   :  { %1910 = vmatpush1.bf16.msra.mxu0 %v6835_v49  ;;  %1951 = vmatpush1.bf16.msra.mxu1 %v6836_v43  ;;  %v6854_v49 = vld [vmem:[#allocation40_spill] sm:$0xff] }
 0x7f0   :  { %1911 = vmatprep.subr.bf16.mxu0 %v6837_v52  ;;  %1952 = vmatprep.subr.bf16.mxu1 %v6838_v45  ;;  %v6855_v52 = vld [vmem:[#allocation41_spill] sm:$0xff] }
 0x7f3   :  { %1912 = vmatpush1.bf16.msra.mxu0 %v6839_v41  ;;  %1953 = vmatpush1.bf16.msra.mxu1 %v6840_v50 }
 0x7f4   :  { %1986 = vmatprep.subr.bf16.mxu0 %v6841_v5  ;;  %2027 = vmatprep.subr.bf16.mxu1 %v6842_v56 }
 0x8a9   :  { %v1818_v47 = vpop.f32.mrb[44].mxu0  ;;  %v1859_v53 = vpop.f32.mrb[44].mxu1 }
 0x8aa   :  { %v1819_v51 = vadd.f32 %v1818_v47, %v5298_v19  ;;  %v1860_v1 = vadd.f32 %v1859_v53, %v5300_v14  ;;  %v1820_v3 = vpop.f32.mrb[45].mxu0  ;;  %v1861_v63 = vpop.f32.mrb[45].mxu1  ;;  %v6856_v47 = vld [vmem:[#allocation42_spill] sm:$0xff]  ;;  %v6857_v53 = vld [vmem:[#allocation43_spill] sm:$0xff] }
 0x8ab   :  { %v1821_v17 = vadd.f32 %v1820_v3, %v5302_v15  ;;  %v1862_v60 = vadd.f32 %v1861_v63, %v5304_v57  ;;  %v1822_v20 = vpop.f32.mrb[46].mxu0  ;;  %v1863_v21 = vpop.f32.mrb[46].mxu1  ;;  %v6860_v3 = vld [vmem:[#allocation46_spill] sm:$0xff]  ;;  %v6861_v63 = vld [vmem:[#allocation47_spill] sm:$0xff] }
 0x8ac   :  { %v1866_v22 = vadd.f32 %v1819_v51, %v4540_v8  ;;  %v1823_v23 = vpop.f32.mrb[47].mxu0  ;;  %v1864_v24 = vpop.f32.mrb[47].mxu1  ;;  %v1868_v14 = vadd.f32 %v1860_v1, %v4553_v54  ;;  %v6858_v51 = vld [vmem:[#allocation44_spill] sm:$0xff]  ;;  %v6859_v1 = vld [vmem:[#allocation45_spill] sm:$0xff]  ;;  %v6864_v20 = vld [vmem:[#allocation50_spill] sm:$0xff] }
 0x8ad   :  { %v1867_v25 = vadd.f32 %v1821_v17, %v4542_v11  ;;  %v1869_v18 = vadd.f32 %v1862_v60, %v4550_v46  ;;  %v6862_v17 = vld [vmem:[#allocation48_spill] sm:$0xff]  ;;  %v6863_v60 = vld [vmem:[#allocation49_spill] sm:$0xff]  ;;  %v6865_v21 = vld [vmem:[#allocation51_spill] sm:$0xff] }
 0x8ae   :  { %v3282_v59 = vmul.f32 -1.442695, %v1866_v22  ;;  %v6866_v22 = vld [vmem:[#allocation52_spill] sm:$0xff]  ;;  %v6867_v23 = vld [vmem:[#allocation53_spill] sm:$0xff]  ;;  %v6868_v24 = vld [vmem:[#allocation54_spill] sm:$0xff] }
 0x8af   :  { %v3283_v39 = vmul.f32 -1.442695, %v1867_v25  ;;  %v3284_v38 = vmul.f32 -1.442695, %v1869_v18  ;;  %v6869_v25 = vld [vmem:[#allocation55_spill] sm:$0xff]  ;;  %v6872_v18 = vld [vmem:[#allocation58_spill] sm:$0xff] }
 0x8b0   :  { %3583 = vpow2.f32 %v3282_v59  ;;  %v6870_v59 = vld [vmem:[#allocation56_spill] sm:$0xff] }
 0x8b1   :  { %3585 = vpow2.f32 %v3283_v39  ;;  %v6871_v39 = vld [vmem:[#allocation57_spill] sm:$0xff] }
 0x8b2   :  { %3587 = vpow2.f32 %v3284_v38  ;;  %v6873_v38 = vld [vmem:[#allocation59_spill] sm:$0xff] }
 0x8b3   :  { %3589 = vtanh.f32 %v1868_v14  ;;  %v6874_v14 = vld [vmem:[#allocation60_spill] sm:$0xff] }
 0x8ba   :  { %v3584_v15 = vpop.eup %3583 }
 0x8bb   :  { %v3586_v19 = vpop.eup %3585  ;;  %v1873_v57 = vadd.f32 1.0, %v3584_v15  ;;  %v6876_v15 = vld [vmem:[#allocation62_spill] sm:$0xff] }
 0x8bc   :  { %v1879_v55 = vadd.f32 1.0, %v3586_v19  ;;  %v3588_v9 = vpop.eup %3587  ;;  %v6877_v19 = vld [vmem:[#allocation63_spill] sm:$0xff] }
 0x8bd   :  { %3591 = vrcp.f32 %v1873_v57  ;;  %v3590_v4 = vpop.eup %3589  ;;  %v1886_v37 = vadd.f32 1.0, %v3588_v9  ;;  %v6878_v57 = vld [vmem:[#allocation64_spill] sm:$0xff]  ;;  %v6880_v9 = vld [vmem:[#allocation66_spill] sm:$0xff] }
 0x8be   :  { %3593 = vrcp.f32 %v1879_v55  ;;  %v6879_v55 = vld [vmem:[#allocation65_spill] sm:$0xff] }
 0x8bf   :  { %3595 = vrcp.f32 %v1886_v37  ;;  %v6885_v37 = vld [vmem:[#allocation13_spill] sm:$0xff] }
 0x8c7   :  { %v3592_v13 = vpop.eup %3591 }
 0x8c8   :  { %v3594_v62 = vpop.eup %3593  ;;  %v1890_v7 = vmul.f32 %v3592_v13, %v3590_v4  ;;  %v6881_v4 = vld [vmem:[#allocation11_spill] sm:$0xff] }
 0x8c9   :  { %v1889_v34 = vmul.f32 %v3594_v62, %v4967_v44  ;;  %v3596_v10 = vpop.eup %3595  ;;  %v6843_v44 = vld [vmem:[#allocation25_spill] sm:$0xff]  ;;  %v6882_v13 = vld [vmem:[#allocation15_spill] sm:$0xff]  ;;  %v6883_v62 = vld [vmem:[#allocation12_spill] sm:$0xff] }
 0x8cb   :  { %v5363_v28 = vadd.f32 %v1890_v7, %v1889_v34  ;;  %v6884_v7 = vld [vmem:[#allocation17_spill] sm:$0xff]  ;;  %v6886_v34 = vld [vmem:[#allocation18_spill] sm:$0xff] }
 0x8cd   :  { %3597 = vtanh.f32 %v5363_v28 }
 0x8d7   :  { %v3598_v30 = vpop.eup %3597 }
 0x8d8   :  { %v1893_v16 = vmul.f32 %v3598_v30, %v3596_v10  ;;  %v6887_v10 = vld [vmem:[#allocation14_spill] sm:$0xff]  ;;  %v6888_v30 = vld [vmem:[#allocation21_spill] sm:$0xff] }
 0x8da   :  { %3285 = vst [vmem:[%s6264_s5 + $0x18] sm:$0xff] %v1893_v16  ;;  %v1896_v33 = vpack.c.bf16 %v1893_v16, %v1893_v16  ;;  %v6889_v16 = vld [vmem:[#allocation16_spill] sm:$0xff] }
 0x8dc   :  { %1930 = vmatmul.mubr.bf16.vlgmr.msra.gmra.mrb[48].mxu0 %v1896_v33  ;;  %1971 = vmatmul.mubr.bf16.vlgmr.msra.gmra.mrb[48].mxu1 %v1896_v33  ;;  %v6890_v33 = vld [vmem:[#allocation67_spill] sm:$0xff] }
 0x8dd   :  { %1987 = vmatpush1.bf16.msra.mxu0 %v4754_v36  ;;  %2028 = vmatpush1.bf16.msra.mxu1 %v4760_v61  ;;  %v6844_v36 = vld [vmem:[#allocation35_spill] sm:$0xff]  ;;  %v6845_v61 = vld [vmem:[#allocation20_spill] sm:$0xff] }
 0x8de   :  { %1988 = vmatprep.subr.bf16.mxu0 %v4766_v6  ;;  %2029 = vmatprep.subr.bf16.mxu1 %v4772_v42  ;;  %v6846_v6 = vld [vmem:[#allocation36_spill] sm:$0xff]  ;;  %v6847_v42 = vld [vmem:[#allocation26_spill] sm:$0xff] }
 0x8df   :  { %2018 = vmatprep.mubr.bf16.mxu0 %v6630_v58  ;;  %2059 = vmatprep.mubr.bf16.mxu1 %v6630_v58 }
 0x8e1   :  { %1989 = vmatpush1.bf16.msra.mxu0 %v4780_v27  ;;  %2030 = vmatpush1.bf16.msra.mxu1 %v4786_v48  ;;  %v6850_v27 = vld [vmem:[#allocation38_spill] sm:$0xff]  ;;  %v6851_v48 = vld [vmem:[#allocation9_spill] sm:$0xff] }
 0x8e2   :  { %1990 = vmatprep.subr.bf16.mxu0 %v4792_v0  ;;  %2031 = vmatprep.subr.bf16.mxu1 %v4985_v32  ;;  %v6852_v0 = vld [vmem:[#allocation10_spill] sm:$0xff] }
 0x8e5   :  { %1991 = vmatpush1.bf16.msra.mxu0 %v6843_v44  ;;  %2032 = vmatpush1.bf16.msra.mxu1 %v6844_v36  ;;  %v6891_v44 = vld [vmem:[#allocation68_spill] sm:$0xff] }
 0x8e6   :  { %1992 = vmatprep.subr.bf16.mxu0 %v6845_v61  ;;  %2033 = vmatprep.subr.bf16.mxu1 %v6846_v6  ;;  %v6892_v61 = vld [vmem:[#allocation69_spill] sm:$0xff] }
 0x8e9   :  { %1993 = vmatpush1.bf16.msra.mxu0 %v6847_v42  ;;  %2034 = vmatpush1.bf16.msra.mxu1 %v6848_v2  ;;  %v6893_v42 = vld [vmem:[#allocation70_spill] sm:$0xff] }
 0x8ea   :  { %1994 = vmatprep.subr.bf16.mxu0 %v6849_v31  ;;  %2035 = vmatprep.subr.bf16.mxu1 %v6850_v27  ;;  %v6894_v31 = vld [vmem:[#allocation71_spill] sm:$0xff] }
 0x8ed   :  { %1995 = vmatpush1.bf16.msra.mxu0 %v6851_v48  ;;  %2036 = vmatpush1.bf16.msra.mxu1 %v6852_v0 }
 0x8ee   :  { %1996 = vmatprep.subr.bf16.mxu0 %v6853_v29  ;;  %2037 = vmatprep.subr.bf16.mxu1 %v6854_v49 }
 0x8f1   :  { %1997 = vmatpush1.bf16.msra.mxu0 %v6855_v52  ;;  %2038 = vmatpush1.bf16.msra.mxu1 %v6856_v47 }
 0x8f2   :  { %1998 = vmatprep.subr.bf16.mxu0 %v6857_v53  ;;  %2039 = vmatprep.subr.bf16.mxu1 %v6858_v51 }
 0x8f5   :  { %1999 = vmatpush1.bf16.msra.mxu0 %v6859_v1  ;;  %2040 = vmatpush1.bf16.msra.mxu1 %v6860_v3 }
 0x8f6   :  { %2000 = vmatprep.subr.bf16.mxu0 %v6861_v63  ;;  %2041 = vmatprep.subr.bf16.mxu1 %v6862_v17 }
 0x8f9   :  { %2001 = vmatpush1.bf16.msra.mxu0 %v6863_v60  ;;  %2042 = vmatpush1.bf16.msra.mxu1 %v6864_v20 }
 0x8fa   :  { %2097 = vmatprep.subr.bf16.mxu0 %v6865_v21  ;;  %2138 = vmatprep.subr.bf16.mxu1 %v6866_v22 }
 0x8fc   :  { %2019 = vmatmul.mubr.bf16.vlgmr.msra.gmra.mrb[52].mxu0 %v5316_v12  ;;  %2060 = vmatmul.mubr.bf16.vlgmr.msra.gmra.mrb[52].mxu1 %v5316_v12  ;;  %v6875_v12 = vld [vmem:[#allocation61_spill] sm:$0xff] }
 0x8fd   :  { %2098 = vmatpush1.bf16.msra.mxu0 %v6867_v23  ;;  %2139 = vmatpush1.bf16.msra.mxu1 %v6868_v24 }
 0x8fe   :  { %2099 = vmatprep.subr.bf16.mxu0 %v6869_v25  ;;  %2140 = vmatprep.subr.bf16.mxu1 %v6870_v59 }
 0x8ff   :  { %2129 = vmatprep.mubr.bf16.mxu0 %v6630_v58  ;;  %2170 = vmatprep.mubr.bf16.mxu1 %v6630_v58 }
 0x901   :  { %2100 = vmatpush1.bf16.msra.mxu0 %v6871_v39  ;;  %2141 = vmatpush1.bf16.msra.mxu1 %v6872_v18 }
 0x902   :  { %2101 = vmatprep.subr.bf16.mxu0 %v6873_v38  ;;  %2142 = vmatprep.subr.bf16.mxu1 %v6874_v14 }
 0x905   :  { %2102 = vmatpush1.bf16.msra.mxu0 %v6875_v12  ;;  %2143 = vmatpush1.bf16.msra.mxu1 %v6876_v15 }
 0x906   :  { %2103 = vmatprep.subr.bf16.mxu0 %v6877_v19  ;;  %2144 = vmatprep.subr.bf16.mxu1 %v6878_v57 }
 0x909   :  { %2104 = vmatpush1.bf16.msra.mxu0 %v6879_v55  ;;  %2145 = vmatpush1.bf16.msra.mxu1 %v6880_v9  ;;  %v3287_v9 = vld [vmem:[%s6259_s0 + $0x48] sm:$0xff] }
 0x90a   :  { %2105 = vmatprep.subr.bf16.mxu0 %v6881_v4  ;;  %2146 = vmatprep.subr.bf16.mxu1 %v6882_v13  ;;  %v1985_v14 = vunpack.c.h.bf16 %v3287_v9  ;;  %v1984_v38 = vunpack.c.l.bf16 %v3287_v9 }
 0x90d   :  { %2106 = vmatpush1.bf16.msra.mxu0 %v6883_v62  ;;  %2147 = vmatpush1.bf16.msra.mxu1 %v6884_v7  ;;  %v6895_v7 = vld [vmem:[#allocation72_spill] sm:$0xff] }
 0x90e   :  { %2107 = vmatprep.subr.bf16.mxu0 %v6885_v37  ;;  %2148 = vmatprep.subr.bf16.mxu1 %v6886_v34  ;;  %v6896_v37 = vld [vmem:[#allocation73_spill] sm:$0xff] }
 0x90f   :  { %v6897_v34 = vld [vmem:[#allocation29_spill] sm:$0xff] }
 0x911   :  { %2108 = vmatpush1.bf16.msra.mxu0 %v6887_v10  ;;  %2149 = vmatpush1.bf16.msra.mxu1 %v6888_v30  ;;  %v6898_v10 = vld [vmem:[#allocation24_spill] sm:$0xff] }
 0x912   :  { %2109 = vmatprep.subr.bf16.mxu0 %v6889_v16  ;;  %2150 = vmatprep.subr.bf16.mxu1 %v6890_v33 }
 0x915   :  { %2110 = vmatpush1.bf16.msra.mxu0 %v6891_v44  ;;  %2151 = vmatpush1.bf16.msra.mxu1 %v6892_v61 }
 0x916   :  { %2111 = vmatprep.subr.bf16.mxu0 %v6893_v42  ;;  %2152 = vmatprep.subr.bf16.mxu1 %v6894_v31 }
 0x919   :  { %2112 = vmatpush1.bf16.msra.mxu0 %v6895_v7  ;;  %2153 = vmatpush1.bf16.msra.mxu1 %v6896_v37  ;;  %v3286_v37 = vld [vmem:[%s6259_s0 + $0x40] sm:$0xff] }
 0x91a   :  { %2210 = vmatprep.subr.bf16.mxu0 %v6897_v34  ;;  %2251 = vmatprep.subr.bf16.mxu1 %v6898_v10  ;;  %v1982_v7 = vunpack.c.l.bf16 %v3286_v37  ;;  %v1983_v34 = vunpack.c.h.bf16 %v3286_v37 }
 0x9af   :  { %v5439_v30 = vpop.f32.mrb[48].mxu0  ;;  %v5441_v16 = vpop.f32.mrb[48].mxu1 }
 0x9b0   :  { %v5443_v33 = vpop.f32.mrb[49].mxu0  ;;  %v5445_v44 = vpop.f32.mrb[49].mxu1 }
 0x9b1   :  { %v1935_v61 = vpop.f32.mrb[50].mxu0  ;;  %v1976_v42 = vpop.f32.mrb[50].mxu1 }
 0x9b2   :  { %v1936_v62 = vpop.f32.mrb[51].mxu0  ;;  %v1977_v31 = vpop.f32.mrb[51].mxu1 }
 0x9cf   :  { %v2020_v13 = vpop.f32.mrb[52].mxu0  ;;  %v2061_v10 = vpop.f32.mrb[52].mxu1 }
 0x9d0   :  { %v2068_v4 = vadd.f32 %v2020_v13, %v1982_v7  ;;  %v2022_v55 = vpop.f32.mrb[53].mxu0  ;;  %v2063_v57 = vpop.f32.mrb[53].mxu1  ;;  %v2070_v13 = vadd.f32 %v2061_v10, %v1984_v38  ;;  %v5475_v10 = vld [vmem:[#allocation6 + $0x20] ss:$16 sps:$4 sm:$0xff]  }
 0x9d1   :  { %v2069_v19 = vadd.f32 %v2022_v55, %v1983_v34  ;;  %v2024_v61 = vpop.f32.mrb[54].mxu0  ;;  %v2065_v42 = vpop.f32.mrb[54].mxu1  ;;  %v2071_v37 = vadd.f32 %v2063_v57, %v1985_v14 }
 0x9d2   :  { %v3288_v62 = vmul.f32 -1.442695, %v2068_v4  ;;  %v2025_v31 = vpop.f32.mrb[55].mxu0  ;;  %v2066_v15 = vpop.f32.mrb[55].mxu1  ;;  %v5478_v42 = vld [vmem:[#allocation6 + $0x28] ss:$16 sps:$4 sm:$0xff]  }
 0x9d3   :  { %v3289_v12 = vmul.f32 -1.442695, %v2069_v19  ;;  %v3290_v18 = vmul.f32 -1.442695, %v2071_v37  ;;  %v5484_v31 = vld [vmem:[#allocation6 + $0x4c] ss:$16 sps:$4 sm:$0xff]  }
 0x9d4   :  { %3599 = vpow2.f32 %v3288_v62  ;;  %v5481_v62 = vld [vmem:[#allocation6 + $0x44] ss:$16 sps:$4 sm:$0xff]   ;;  %v5487_v37 = vld [vmem:[#allocation6 + $0x40] ss:$16 sps:$4 sm:$0xff]  }
 0x9d5   :  { %3601 = vpow2.f32 %v3289_v12 }
 0x9d6   :  { %3603 = vpow2.f32 %v3290_v18 }
 0x9d7   :  { %3605 = vtanh.f32 %v2070_v13  ;;  %v5490_v13 = vld [vmem:[#allocation6 + $0x48] ss:$16 sps:$4 sm:$0xff]  }
 0x9de   :  { %v3600_v7 = vpop.eup %3599 }
 0x9df   :  { %v3602_v39 = vpop.eup %3601  ;;  %v2075_v59 = vadd.f32 1.0, %v3600_v7  ;;  %v5493_v7 = vld [vmem:[#allocation6 + $0x64] ss:$16 sps:$4 sm:$0xff]  }
 0x9e0   :  { %v2081_v25 = vadd.f32 1.0, %v3602_v39  ;;  %v3604_v55 = vpop.eup %3603  ;;  %v5470_v39 = vld [vmem:[#allocation6 + $0x2c] ss:$16 sps:$4 sm:$0xff]  }
 0x9e1   :  { %3607 = vrcp.f32 %v2075_v59  ;;  %v3606_v4 = vpop.eup %3605  ;;  %v2088_v61 = vadd.f32 1.0, %v3604_v55  ;;  %v5464_v59 = vld [vmem:[#allocation6 + $0x8] ss:$16 sps:$4 sm:$0xff]   ;;  %v5496_v55 = vld [vmem:[#allocation6 + $0x6c] ss:$16 sps:$4 sm:$0xff]  }
 0x9e2   :  { %3609 = vrcp.f32 %v2081_v25  ;;  %v5461_v25 = vld [vmem:[#allocation6] ss:$16 sps:$4 sm:$0xff]  }
 0x9e3   :  { %3611 = vrcp.f32 %v2088_v61  ;;  %v5511_v61 = vld [vmem:[#allocation6 + $0x80] ss:$16 sps:$4 sm:$0xff]  }
 0x9e4   :  { %6902 = vst [vmem:[#allocation19_spill] sm:$0xff] %v5511_v61 }
 0x9eb   :  { %v3608_v34 = vpop.eup %3607 }
 0x9ec   :  { %v3610_v15 = vpop.eup %3609  ;;  %v2092_v19 = vmul.f32 %v3608_v34, %v3606_v4  ;;  %v5499_v4 = vld [vmem:[#allocation6 + $0x60] ss:$16 sps:$4 sm:$0xff]   ;;  %v5502_v34 = vld [vmem:[#allocation6 + $0x68] ss:$16 sps:$4 sm:$0xff]  }
 0x9ed   :  { %v2091_v12 = vmul.f32 %v3610_v15, %v5313_v35  ;;  %v3612_v38 = vpop.eup %3611  ;;  %v5467_v35 = vld [vmem:[#allocation6 + $0x24] ss:$16 sps:$4 sm:$0xff]   ;;  %6899 = vst [vmem:[#allocation30_spill] sm:$0xff] %v5502_v34 }
 0x9ee   :  { %v5505_v15 = vld [vmem:[#allocation6 + $0x84] ss:$16 sps:$4 sm:$0xff]  }
 0x9ef   :  { %v5454_v14 = vadd.f32 %v2092_v19, %v2091_v12  ;;  %6900 = vst [vmem:[#allocation22_spill] sm:$0xff] %v5505_v15  ;;  %v5508_v19 = vld [vmem:[#allocation6 + $0x8c] ss:$16 sps:$4 sm:$0xff]   ;;  %v5514_v12 = vld [vmem:[#allocation6 + $0x88] ss:$16 sps:$4 sm:$0xff]  }
 0x9f0   :  { %6901 = vst [vmem:[#allocation27_spill] sm:$0xff] %v5508_v19  ;;  %6903 = vst [vmem:[#allocation32_spill] sm:$0xff] %v5514_v12 }
 0x9f1   :  { %3613 = vtanh.f32 %v5454_v14 }
 0x9fb   :  { %v3614_v57 = vpop.eup %3613 }
 0x9fc   :  { %v2095_v18 = vmul.f32 %v3614_v57, %v3612_v38  ;;  %v5517_v38 = vld [vmem:[#allocation6 + $0xa4] ss:$16 sps:$4 sm:$0xff]   ;;  %v5520_v57 = vld [vmem:[#allocation6 + $0xac] ss:$16 sps:$4 sm:$0xff]  }
 0x9fd   :  { %6904 = vst [vmem:[#allocation28_spill] sm:$0xff] %v5517_v38  ;;  %6905 = vst [vmem:[#allocation33_spill] sm:$0xff] %v5520_v57 }
 0x9fe   :  { %v5457_v9 = vpack.c.bf16 %v2095_v18, %v2095_v18  ;;  %v5523_v18 = vld [vmem:[#allocation6 + $0xa0] ss:$16 sps:$4 sm:$0xff]  }
 0x9ff   :  { %6906 = vst [vmem:[#allocation31_spill] sm:$0xff] %v5523_v18 }
 0xa00   :  { %2130 = vmatmul.mubr.bf16.vlgmr.msra.gmra.mrb[56].mxu0 %v5457_v9  ;;  %2171 = vmatmul.mubr.bf16.vlgmr.msra.gmra.mrb[56].mxu1 %v5457_v9 }
 0xa01   :  { %2211 = vmatpush1.bf16.msra.mxu0 %v5461_v25  ;;  %2252 = vmatpush1.bf16.msra.mxu1 %v5464_v59 }
 0xa02   :  { %2212 = vmatprep.subr.bf16.mxu0 %v5467_v35  ;;  %2253 = vmatprep.subr.bf16.mxu1 %v5470_v39 }
 0xa03   :  { %2242 = vmatprep.mubr.bf16.mxu0 %v6630_v58  ;;  %2283 = vmatprep.mubr.bf16.mxu1 %v6630_v58 }
 0xa05   :  { %2213 = vmatpush1.bf16.msra.mxu0 %v5475_v10  ;;  %2254 = vmatpush1.bf16.msra.mxu1 %v5478_v42 }
 0xa06   :  { %2214 = vmatprep.subr.bf16.mxu0 %v5481_v62  ;;  %2255 = vmatprep.subr.bf16.mxu1 %v5484_v31 }
 0xa09   :  { %2215 = vmatpush1.bf16.msra.mxu0 %v5487_v37  ;;  %2256 = vmatpush1.bf16.msra.mxu1 %v5490_v13 }
 0xa0a   :  { %2216 = vmatprep.subr.bf16.mxu0 %v5493_v7  ;;  %2257 = vmatprep.subr.bf16.mxu1 %v5496_v55 }
 0xa0d   :  { %2217 = vmatpush1.bf16.msra.mxu0 %v5499_v4  ;;  %2258 = vmatpush1.bf16.msra.mxu1 %v5502_v34 }
 0xa0e   :  { %2218 = vmatprep.subr.bf16.mxu0 %v5505_v15  ;;  %2259 = vmatprep.subr.bf16.mxu1 %v5508_v19  ;;  %v5527_v19 = vld [vmem:[#allocation6 + $0xc4] ss:$16 sps:$4 sm:$0xff]  }
 0xa0f   :  { %6907 = vst [vmem:[#allocation34_spill] sm:$0xff] %v5527_v19 }
 0xa11   :  { %2219 = vmatpush1.bf16.msra.mxu0 %v5511_v61  ;;  %2260 = vmatpush1.bf16.msra.mxu1 %v5514_v12  ;;  %v5531_v12 = vld [vmem:[#allocation6 + $0xc0] ss:$16 sps:$4 sm:$0xff]  }
 0xa12   :  { %2220 = vmatprep.subr.bf16.mxu0 %v5517_v38  ;;  %2261 = vmatprep.subr.bf16.mxu1 %v5520_v57  ;;  %6908 = vst [vmem:[#allocation25_spill] sm:$0xff] %v5531_v12  ;;  %v5535_v38 = vld [vmem:[#allocation6 + $0xe4] ss:$16 sps:$4 sm:$0xff]  }
 0xa13   :  { %6909 = vst [vmem:[#allocation35_spill] sm:$0xff] %v5535_v38 }
 0xa15   :  { %2221 = vmatpush1.bf16.msra.mxu0 %v5523_v18  ;;  %2262 = vmatpush1.bf16.msra.mxu1 %v4925_v40 }
 0xa16   :  { %2222 = vmatprep.subr.bf16.mxu0 %v5527_v19  ;;  %2263 = vmatprep.subr.bf16.mxu1 %v6834_v26 }
 0xa19   :  { %2223 = vmatpush1.bf16.msra.mxu0 %v5531_v12  ;;  %2264 = vmatpush1.bf16.msra.mxu1 %v6836_v43 }
 0xa1a   :  { %2224 = vmatprep.subr.bf16.mxu0 %v5535_v38  ;;  %2265 = vmatprep.subr.bf16.mxu1 %v6838_v45 }
 0xa1d   :  { %2225 = vmatpush1.bf16.msra.mxu0 %v6839_v41  ;;  %2266 = vmatpush1.bf16.msra.mxu1 %v6840_v50 }
 0xa1e   :  { %2299 = vmatprep.subr.bf16.mxu0 %v6841_v5  ;;  %2340 = vmatprep.subr.bf16.mxu1 %v6842_v56 }
 0xad3   :  { %v2131_v40 = vpop.f32.mrb[56].mxu0  ;;  %v2172_v26 = vpop.f32.mrb[56].mxu1 }
 0xad4   :  { %v2132_v12 = vadd.f32 %v2131_v40, %v5439_v30  ;;  %v2173_v43 = vadd.f32 %v2172_v26, %v5441_v16  ;;  %v2133_v19 = vpop.f32.mrb[57].mxu0  ;;  %v2174_v18 = vpop.f32.mrb[57].mxu1 }
 0xad5   :  { %v2134_v38 = vadd.f32 %v2133_v19, %v5443_v33  ;;  %v2175_v45 = vadd.f32 %v2174_v18, %v5445_v44  ;;  %v2135_v57 = vpop.f32.mrb[58].mxu0  ;;  %v2176_v41 = vpop.f32.mrb[58].mxu1 }
 0xad6   :  { %v2179_v50 = vadd.f32 %v2132_v12, %v4540_v8  ;;  %v2136_v61 = vpop.f32.mrb[59].mxu0  ;;  %v2177_v5 = vpop.f32.mrb[59].mxu1  ;;  %v2181_v40 = vadd.f32 %v2173_v43, %v4553_v54 }
 0xad7   :  { %v2180_v56 = vadd.f32 %v2134_v38, %v4542_v11  ;;  %v2182_v30 = vadd.f32 %v2175_v45, %v4550_v46 }
 0xad8   :  { %v3291_v15 = vmul.f32 -1.442695, %v2179_v50 }
 0xad9   :  { %v3292_v34 = vmul.f32 -1.442695, %v2180_v56  ;;  %v3293_v16 = vmul.f32 -1.442695, %v2182_v30  ;;  %v5561_v56 = vld [vmem:[%s6260_s1] ss:$16 sps:$4 sm:$0xff]  }
 0xada   :  { %3615 = vpow2.f32 %v3291_v15  ;;  %v5573_v30 = vld [vmem:[%s6260_s1 + $0x24] ss:$16 sps:$4 sm:$0xff]  }
 0xadb   :  { %3617 = vpow2.f32 %v3292_v34 }
 0xadc   :  { %3619 = vpow2.f32 %v3293_v16  ;;  %v5579_v16 = vld [vmem:[%s6260_s1 + $0x2c] ss:$16 sps:$4 sm:$0xff]  }
 0xadd   :  { %3621 = vtanh.f32 %v2181_v40  ;;  %v5587_v40 = vld [vmem:[%s6260_s1 + $0x20] ss:$16 sps:$4 sm:$0xff]  }
 0xae4   :  { %v3616_v33 = vpop.eup %3615 }
 0xae5   :  { %v3618_v19 = vpop.eup %3617  ;;  %v2186_v44 = vadd.f32 1.0, %v3616_v33  ;;  %v5593_v33 = vld [vmem:[%s6260_s1 + $0x28] ss:$16 sps:$4 sm:$0xff]  }
 0xae6   :  { %v2192_v57 = vadd.f32 1.0, %v3618_v19  ;;  %v3620_v61 = vpop.eup %3619  ;;  %v5599_v19 = vld [vmem:[%s6260_s1 + $0x44] ss:$16 sps:$4 sm:$0xff]  }
 0xae7   :  { %3623 = vrcp.f32 %v2186_v44  ;;  %v3622_v12 = vpop.eup %3621  ;;  %v2199_v15 = vadd.f32 1.0, %v3620_v61  ;;  %v5606_v44 = vld [vmem:[%s6260_s1 + $0x40] ss:$16 sps:$4 sm:$0xff]   ;;  %v6936_v61 = vld [vmem:[#allocation68_spill] sm:$0xff] }
 0xae8   :  { %3625 = vrcp.f32 %v2192_v57  ;;  %6910 = vst [vmem:[#allocation20_spill] sm:$0xff] %v5606_v44  ;;  %v5613_v57 = vld [vmem:[%s6260_s1 + $0x64] ss:$16 sps:$4 sm:$0xff]  }
 0xae9   :  { %3627 = vrcp.f32 %v2199_v15  ;;  %6911 = vst [vmem:[#allocation36_spill] sm:$0xff] %v5613_v57  ;;  %v6941_v15 = vld [vmem:[#allocation73_spill] sm:$0xff] }
 0xaf1   :  { %v3624_v38 = vpop.eup %3623 }
 0xaf2   :  { %v3626_v18 = vpop.eup %3625  ;;  %v2203_v26 = vmul.f32 %v3624_v38, %v3622_v12  ;;  %v6937_v12 = vld [vmem:[#allocation69_spill] sm:$0xff]  ;;  %v6938_v38 = vld [vmem:[#allocation70_spill] sm:$0xff] }
 0xaf3   :  { %v2202_v34 = vmul.f32 %v3626_v18, %v5363_v28  ;;  %v3628_v43 = vpop.eup %3627  ;;  %v5567_v28 = vld [vmem:[%s6260_s1 + $0x8] ss:$16 sps:$4 sm:$0xff]   ;;  %v6939_v18 = vld [vmem:[#allocation71_spill] sm:$0xff] }
 0xaf5   :  { %v5552_v45 = vadd.f32 %v2203_v26, %v2202_v34  ;;  %v6940_v26 = vld [vmem:[#allocation72_spill] sm:$0xff]  ;;  %v5681_v34 = vld [vmem:[#allocation6 + $0x4] ss:$16 sps:$4 sm:$0xff]  }
 0xaf7   :  { %3629 = vtanh.f32 %v5552_v45 }
 0xb01   :  { %v3630_v41 = vpop.eup %3629 }
 0xb02   :  { %v2206_v50 = vmul.f32 %v3630_v41, %v3628_v43  ;;  %v5684_v43 = vld [vmem:[#allocation6 + $0xc] ss:$16 sps:$4 sm:$0xff]  }
 0xb04   :  { %3294 = vst [vmem:[%s6264_s5 + $0x20] sm:$0xff] %v2206_v50  ;;  %v2209_v5 = vpack.c.bf16 %v2206_v50, %v2206_v50 }
 0xb06   :  { %2243 = vmatmul.mubr.bf16.vlgmr.msra.gmra.mrb[60].mxu0 %v2209_v5  ;;  %2284 = vmatmul.mubr.bf16.vlgmr.msra.gmra.mrb[60].mxu1 %v2209_v5 }
 0xb07   :  { %2300 = vmatpush1.bf16.msra.mxu0 %v5561_v56  ;;  %2341 = vmatpush1.bf16.msra.mxu1 %v5567_v28 }
 0xb08   :  { %2301 = vmatprep.subr.bf16.mxu0 %v5573_v30  ;;  %2342 = vmatprep.subr.bf16.mxu1 %v5579_v16 }
 0xb09   :  { %2331 = vmatprep.mubr.bf16.mxu0 %v6630_v58  ;;  %2372 = vmatprep.mubr.bf16.mxu1 %v6630_v58 }
 0xb0b   :  { %2302 = vmatpush1.bf16.msra.mxu0 %v5587_v40  ;;  %2343 = vmatpush1.bf16.msra.mxu1 %v5593_v33 }
 0xb0c   :  { %2303 = vmatprep.subr.bf16.mxu0 %v5599_v19  ;;  %2344 = vmatprep.subr.bf16.mxu1 %v4985_v32  ;;  %v5620_v32 = vld [vmem:[%s6260_s1 + $0x60] ss:$16 sps:$4 sm:$0xff]  }
 0xb0d   :  { %6912 = vst [vmem:[#allocation26_spill] sm:$0xff] %v5620_v32 }
 0xb0f   :  { %2304 = vmatpush1.bf16.msra.mxu0 %v5606_v44  ;;  %2345 = vmatpush1.bf16.msra.mxu1 %v6844_v36  ;;  %v5627_v36 = vld [vmem:[%s6260_s1 + $0x84] ss:$16 sps:$4 sm:$0xff]  }
 0xb10   :  { %2305 = vmatprep.subr.bf16.mxu0 %v5613_v57  ;;  %2346 = vmatprep.subr.bf16.mxu1 %v6846_v6  ;;  %6913 = vst [vmem:[#allocation37_spill] sm:$0xff] %v5627_v36  ;;  %v6914_v6 = vld [vmem:[#allocation55_spill] sm:$0xff] }
 0xb13   :  { %2306 = vmatpush1.bf16.msra.mxu0 %v5620_v32  ;;  %2347 = vmatpush1.bf16.msra.mxu1 %v6848_v2  ;;  %v6915_v2 = vld [vmem:[#allocation56_spill] sm:$0xff] }
 0xb14   :  { %2307 = vmatprep.subr.bf16.mxu0 %v5627_v36  ;;  %2348 = vmatprep.subr.bf16.mxu1 %v6850_v27  ;;  %v6916_v27 = vld [vmem:[#allocation57_spill] sm:$0xff] }
 0xb17   :  { %2308 = vmatpush1.bf16.msra.mxu0 %v6851_v48  ;;  %2349 = vmatpush1.bf16.msra.mxu1 %v6852_v0  ;;  %v6917_v48 = vld [vmem:[#allocation58_spill] sm:$0xff]  ;;  %v6918_v0 = vld [vmem:[#allocation59_spill] sm:$0xff] }
 0xb18   :  { %2309 = vmatprep.subr.bf16.mxu0 %v6853_v29  ;;  %2350 = vmatprep.subr.bf16.mxu1 %v6854_v49  ;;  %v6919_v29 = vld [vmem:[#allocation60_spill] sm:$0xff]  ;;  %v6920_v49 = vld [vmem:[#allocation61_spill] sm:$0xff] }
 0xb1b   :  { %2310 = vmatpush1.bf16.msra.mxu0 %v6855_v52  ;;  %2351 = vmatpush1.bf16.msra.mxu1 %v6856_v47  ;;  %v6921_v52 = vld [vmem:[#allocation62_spill] sm:$0xff]  ;;  %v6922_v47 = vld [vmem:[#allocation63_spill] sm:$0xff] }
 0xb1c   :  { %2311 = vmatprep.subr.bf16.mxu0 %v6857_v53  ;;  %2352 = vmatprep.subr.bf16.mxu1 %v6858_v51  ;;  %v6923_v53 = vld [vmem:[#allocation64_spill] sm:$0xff]  ;;  %v6924_v51 = vld [vmem:[#allocation65_spill] sm:$0xff] }
 0xb1f   :  { %2312 = vmatpush1.bf16.msra.mxu0 %v6859_v1  ;;  %2353 = vmatpush1.bf16.msra.mxu1 %v6860_v3  ;;  %v6925_v1 = vld [vmem:[#allocation66_spill] sm:$0xff]  ;;  %v6926_v3 = vld [vmem:[#allocation11_spill] sm:$0xff] }
 0xb20   :  { %2313 = vmatprep.subr.bf16.mxu0 %v6861_v63  ;;  %2354 = vmatprep.subr.bf16.mxu1 %v6862_v17  ;;  %v6927_v63 = vld [vmem:[#allocation15_spill] sm:$0xff]  ;;  %v6928_v17 = vld [vmem:[#allocation12_spill] sm:$0xff] }
 0xb23   :  { %2314 = vmatpush1.bf16.msra.mxu0 %v6863_v60  ;;  %2355 = vmatpush1.bf16.msra.mxu1 %v6864_v20  ;;  %v6929_v60 = vld [vmem:[#allocation17_spill] sm:$0xff] }
 0xb24   :  { %2410 = vmatprep.subr.bf16.mxu0 %v6865_v21  ;;  %2451 = vmatprep.subr.bf16.mxu1 %v6866_v22  ;;  %v6930_v20 = vld [vmem:[#allocation13_spill] sm:$0xff]  ;;  %v6931_v21 = vld [vmem:[#allocation18_spill] sm:$0xff] }
 0xb25   :  { %v6932_v22 = vld [vmem:[#allocation14_spill] sm:$0xff] }
 0xb26   :  { %2332 = vmatmul.mubr.bf16.vlgmr.msra.gmra.mrb[64].mxu0 %v5457_v9  ;;  %2373 = vmatmul.mubr.bf16.vlgmr.msra.gmra.mrb[64].mxu1 %v5457_v9  ;;  %v6935_v9 = vld [vmem:[#allocation67_spill] sm:$0xff] }
 0xb27   :  { %2411 = vmatpush1.bf16.msra.mxu0 %v6867_v23  ;;  %2452 = vmatpush1.bf16.msra.mxu1 %v6868_v24  ;;  %v6933_v23 = vld [vmem:[#allocation21_spill] sm:$0xff]  ;;  %v6934_v24 = vld [vmem:[#allocation16_spill] sm:$0xff] }
 0xb28   :  { %2412 = vmatprep.subr.bf16.mxu0 %v6914_v6  ;;  %2453 = vmatprep.subr.bf16.mxu1 %v6915_v2 }
 0xb29   :  { %2442 = vmatprep.mubr.bf16.mxu0 %v6630_v58  ;;  %2483 = vmatprep.mubr.bf16.mxu1 %v6630_v58 }
 0xb2b   :  { %2413 = vmatpush1.bf16.msra.mxu0 %v6916_v27  ;;  %2454 = vmatpush1.bf16.msra.mxu1 %v6917_v48 }
 0xb2c   :  { %2414 = vmatprep.subr.bf16.mxu0 %v6918_v0  ;;  %2455 = vmatprep.subr.bf16.mxu1 %v6919_v29  ;;  %v3295_v29 = vld [vmem:[%s6259_s0 + $0x50] sm:$0xff] }
 0xb2f   :  { %2415 = vmatpush1.bf16.msra.mxu0 %v6920_v49  ;;  %2456 = vmatpush1.bf16.msra.mxu1 %v6921_v52  ;;  %v2295_v49 = vunpack.c.l.bf16 %v3295_v29  ;;  %v2296_v52 = vunpack.c.h.bf16 %v3295_v29 }
 0xb30   :  { %2416 = vmatprep.subr.bf16.mxu0 %v6922_v47  ;;  %2457 = vmatprep.subr.bf16.mxu1 %v6923_v53 }
 0xb33   :  { %2417 = vmatpush1.bf16.msra.mxu0 %v6924_v51  ;;  %2458 = vmatpush1.bf16.msra.mxu1 %v6925_v1  ;;  %v3296_v1 = vld [vmem:[%s6259_s0 + $0x58] sm:$0xff] }
 0xb34   :  { %2418 = vmatprep.subr.bf16.mxu0 %v6926_v3  ;;  %2459 = vmatprep.subr.bf16.mxu1 %v6927_v63 }
 0xb37   :  { %2419 = vmatpush1.bf16.msra.mxu0 %v6928_v17  ;;  %2460 = vmatpush1.bf16.msra.mxu1 %v6929_v60 }
 0xb38   :  { %2420 = vmatprep.subr.bf16.mxu0 %v6930_v20  ;;  %2461 = vmatprep.subr.bf16.mxu1 %v6931_v21 }
 0xb3b   :  { %2421 = vmatpush1.bf16.msra.mxu0 %v6932_v22  ;;  %2462 = vmatpush1.bf16.msra.mxu1 %v6933_v23 }
 0xb3c   :  { %2422 = vmatprep.subr.bf16.mxu0 %v6934_v24  ;;  %2463 = vmatprep.subr.bf16.mxu1 %v6935_v9  ;;  %v2298_v9 = vunpack.c.h.bf16 %v3296_v1 }
 0xb3f   :  { %2423 = vmatpush1.bf16.msra.mxu0 %v6936_v61  ;;  %2464 = vmatpush1.bf16.msra.mxu1 %v6937_v12  ;;  %v2297_v12 = vunpack.c.l.bf16 %v3296_v1 }
 0xb40   :  { %2424 = vmatprep.subr.bf16.mxu0 %v6938_v38  ;;  %2465 = vmatprep.subr.bf16.mxu1 %v6939_v18 }
 0xb43   :  { %2425 = vmatpush1.bf16.msra.mxu0 %v6940_v26  ;;  %2466 = vmatpush1.bf16.msra.mxu1 %v6941_v15 }
 0xb44   :  { %2523 = vmatprep.subr.bf16.mxu0 %v5681_v34  ;;  %2564 = vmatprep.subr.bf16.mxu1 %v5684_v43 }
 0xbd9   :  { %v5687_v41 = vpop.f32.mrb[60].mxu0  ;;  %v5689_v50 = vpop.f32.mrb[60].mxu1 }
 0xbda   :  { %v5691_v5 = vpop.f32.mrb[61].mxu0  ;;  %v5693_v6 = vpop.f32.mrb[61].mxu1 }
 0xbdb   :  { %v2248_v2 = vpop.f32.mrb[62].mxu0  ;;  %v2289_v27 = vpop.f32.mrb[62].mxu1 }
 0xbdc   :  { %v2249_v48 = vpop.f32.mrb[63].mxu0  ;;  %v2290_v0 = vpop.f32.mrb[63].mxu1 }
 0xbf9   :  { %v2333_v47 = vpop.f32.mrb[64].mxu0  ;;  %v2374_v53 = vpop.f32.mrb[64].mxu1 }
 0xbfa   :  { %v2381_v51 = vadd.f32 %v2333_v47, %v2295_v49  ;;  %v2335_v3 = vpop.f32.mrb[65].mxu0  ;;  %v2376_v63 = vpop.f32.mrb[65].mxu1  ;;  %v2383_v18 = vadd.f32 %v2374_v53, %v2297_v12  ;;  %v6950_v12 = vld [vmem:[#allocation34_spill] sm:$0xff] }
 0xbfb   :  { %v2382_v17 = vadd.f32 %v2335_v3, %v2296_v52  ;;  %v2337_v60 = vpop.f32.mrb[66].mxu0  ;;  %v2378_v20 = vpop.f32.mrb[66].mxu1  ;;  %v2384_v61 = vadd.f32 %v2376_v63, %v2298_v9  ;;  %v6949_v9 = vld [vmem:[#allocation31_spill] sm:$0xff] }
 0xbfc   :  { %v3297_v21 = vmul.f32 -1.442695, %v2381_v51  ;;  %v2338_v22 = vpop.f32.mrb[67].mxu0  ;;  %v2379_v23 = vpop.f32.mrb[67].mxu1  ;;  %v6943_v60 = vld [vmem:[#allocation22_spill] sm:$0xff]  ;;  %v6944_v20 = vld [vmem:[#allocation27_spill] sm:$0xff] }
 0xbfd   :  { %v3298_v24 = vmul.f32 -1.442695, %v2382_v17  ;;  %v3299_v38 = vmul.f32 -1.442695, %v2384_v61  ;;  %v6946_v22 = vld [vmem:[#allocation32_spill] sm:$0xff] }
 0xbfe   :  { %3631 = vpow2.f32 %v3297_v21  ;;  %v6945_v21 = vld [vmem:[#allocation19_spill] sm:$0xff]  ;;  %v6947_v23 = vld [vmem:[#allocation28_spill] sm:$0xff] }
 0xbff   :  { %3633 = vpow2.f32 %v3298_v24  ;;  %v6948_v24 = vld [vmem:[#allocation33_spill] sm:$0xff]  ;;  %v5732_v61 = vld [vmem:[#allocation6 + $0xa8] ss:$16 sps:$4 sm:$0xff]  }
 0xc00   :  { %3635 = vpow2.f32 %v3299_v38  ;;  %v5736_v38 = vld [vmem:[#allocation6 + $0xcc] ss:$16 sps:$4 sm:$0xff]  }
 0xc01   :  { %3637 = vtanh.f32 %v2383_v18  ;;  %6951 = vst [vmem:[#allocation23_spill] sm:$0xff] %v5736_v38  ;;  %v6952_v18 = vld [vmem:[#allocation25_spill] sm:$0xff] }
 0xc08   :  { %v3632_v26 = vpop.eup %3631 }
 0xc09   :  { %v3634_v15 = vpop.eup %3633  ;;  %v2388_v2 = vadd.f32 1.0, %v3632_v26  ;;  %v5740_v26 = vld [vmem:[#allocation6 + $0xc8] ss:$16 sps:$4 sm:$0xff]  }
 0xc0a   :  { %v2394_v27 = vadd.f32 1.0, %v3634_v15  ;;  %v3636_v48 = vpop.eup %3635  ;;  %6953 = vst [vmem:[#allocation38_spill] sm:$0xff] %v5740_v26  ;;  %v6954_v15 = vld [vmem:[#allocation35_spill] sm:$0xff] }
 0xc0b   :  { %3639 = vrcp.f32 %v2388_v2  ;;  %v3638_v0 = vpop.eup %3637  ;;  %v2401_v47 = vadd.f32 1.0, %v3636_v48  ;;  %v5744_v2 = vld [vmem:[#allocation6 + $0xec] ss:$16 sps:$4 sm:$0xff]   ;;  %v5750_v48 = vld [vmem:[#allocation6 + $0xe8] ss:$16 sps:$4 sm:$0xff]  }
 0xc0c   :  { %3641 = vrcp.f32 %v2394_v27  ;;  %6955 = vst [vmem:[#allocation9_spill] sm:$0xff] %v5744_v2  ;;  %v5747_v27 = vld [vmem:[#allocation6 + $0xe0] ss:$16 sps:$4 sm:$0xff]   ;;  %6957 = vst [vmem:[#allocation39_spill] sm:$0xff] %v5750_v48 }
 0xc0d   :  { %3643 = vrcp.f32 %v2401_v47  ;;  %6956 = vst [vmem:[#allocation10_spill] sm:$0xff] %v5747_v27 }
 0xc15   :  { %v3640_v29 = vpop.eup %3639 }
 0xc16   :  { %v3642_v49 = vpop.eup %3641  ;;  %v2405_v52 = vmul.f32 %v3640_v29, %v3638_v0  ;;  %v5756_v0 = vld [vmem:[%s6260_s1 + $0x4] ss:$16 sps:$4 sm:$0xff]   ;;  %v5762_v29 = vld [vmem:[%s6260_s1 + $0xc] ss:$16 sps:$4 sm:$0xff]  }
 0xc17   :  { %v2404_v51 = vmul.f32 %v3642_v49, %v5454_v14  ;;  %v3644_v53 = vpop.eup %3643  ;;  %v6942_v14 = vld [vmem:[#allocation30_spill] sm:$0xff]  ;;  %6958 = vst [vmem:[#allocation40_spill] sm:$0xff] %v5756_v0  ;;  %6959 = vst [vmem:[#allocation41_spill] sm:$0xff] %v5762_v29 }
 0xc19   :  { %v5702_v3 = vadd.f32 %v2405_v52, %v2404_v51 }
 0xc1b   :  { %3645 = vtanh.f32 %v5702_v3 }
 0xc25   :  { %v3646_v1 = vpop.eup %3645 }
 0xc26   :  { %v2408_v63 = vmul.f32 %v3646_v1, %v3644_v53 }
 0xc28   :  { %v5705_v17 = vpack.c.bf16 %v2408_v63, %v2408_v63 }
 0xc2a   :  { %2443 = vmatmul.mubr.bf16.vlgmr.msra.gmra.mrb[68].mxu0 %v5705_v17  ;;  %2484 = vmatmul.mubr.bf16.vlgmr.msra.gmra.mrb[68].mxu1 %v5705_v17 }
 0xc2b   :  { %2524 = vmatpush1.bf16.msra.mxu0 %v5461_v25  ;;  %2565 = vmatpush1.bf16.msra.mxu1 %v5464_v59 }
 0xc2c   :  { %2525 = vmatprep.subr.bf16.mxu0 %v5467_v35  ;;  %2566 = vmatprep.subr.bf16.mxu1 %v5470_v39 }
 0xc2d   :  { %2555 = vmatprep.mubr.bf16.mxu0 %v6630_v58  ;;  %2596 = vmatprep.mubr.bf16.mxu1 %v6630_v58 }
 0xc2f   :  { %2526 = vmatpush1.bf16.msra.mxu0 %v5475_v10  ;;  %2567 = vmatpush1.bf16.msra.mxu1 %v5478_v42 }
 0xc30   :  { %2527 = vmatprep.subr.bf16.mxu0 %v5481_v62  ;;  %2568 = vmatprep.subr.bf16.mxu1 %v5484_v31 }
 0xc33   :  { %2528 = vmatpush1.bf16.msra.mxu0 %v5487_v37  ;;  %2569 = vmatpush1.bf16.msra.mxu1 %v5490_v13 }
 0xc34   :  { %2529 = vmatprep.subr.bf16.mxu0 %v5493_v7  ;;  %2570 = vmatprep.subr.bf16.mxu1 %v5496_v55 }
 0xc37   :  { %2530 = vmatpush1.bf16.msra.mxu0 %v5499_v4  ;;  %2571 = vmatpush1.bf16.msra.mxu1 %v6942_v14 }
 0xc38   :  { %2531 = vmatprep.subr.bf16.mxu0 %v6943_v60  ;;  %2572 = vmatprep.subr.bf16.mxu1 %v6944_v20 }
 0xc3b   :  { %2532 = vmatpush1.bf16.msra.mxu0 %v6945_v21  ;;  %2573 = vmatpush1.bf16.msra.mxu1 %v6946_v22 }
 0xc3c   :  { %2533 = vmatprep.subr.bf16.mxu0 %v6947_v23  ;;  %2574 = vmatprep.subr.bf16.mxu1 %v6948_v24 }
 0xc3f   :  { %2534 = vmatpush1.bf16.msra.mxu0 %v6949_v9  ;;  %2575 = vmatpush1.bf16.msra.mxu1 %v5732_v61 }
 0xc40   :  { %2535 = vmatprep.subr.bf16.mxu0 %v6950_v12  ;;  %2576 = vmatprep.subr.bf16.mxu1 %v5736_v38 }
 0xc43   :  { %2536 = vmatpush1.bf16.msra.mxu0 %v6952_v18  ;;  %2577 = vmatpush1.bf16.msra.mxu1 %v5740_v26 }
 0xc44   :  { %2537 = vmatprep.subr.bf16.mxu0 %v6954_v15  ;;  %2578 = vmatprep.subr.bf16.mxu1 %v5744_v2 }
 0xc47   :  { %2538 = vmatpush1.bf16.msra.mxu0 %v5747_v27  ;;  %2579 = vmatpush1.bf16.msra.mxu1 %v5750_v48 }
 0xc48   :  { %2612 = vmatprep.subr.bf16.mxu0 %v5756_v0  ;;  %2653 = vmatprep.subr.bf16.mxu1 %v5762_v29 }
 0xcfd   :  { %v2444_v49 = vpop.f32.mrb[68].mxu0  ;;  %v2485_v52 = vpop.f32.mrb[68].mxu1 }
 0xcfe   :  { %v2445_v47 = vadd.f32 %v2444_v49, %v5687_v41  ;;  %v2486_v51 = vadd.f32 %v2485_v52, %v5689_v50  ;;  %v2446_v53 = vpop.f32.mrb[69].mxu0  ;;  %v2487_v1 = vpop.f32.mrb[69].mxu1 }
 0xcff   :  { %v2447_v63 = vadd.f32 %v2446_v53, %v5691_v5  ;;  %v2488_v48 = vadd.f32 %v2487_v1, %v5693_v6  ;;  %v2448_v0 = vpop.f32.mrb[70].mxu0  ;;  %v2489_v27 = vpop.f32.mrb[70].mxu1 }
 0xd00   :  { %v2492_v2 = vadd.f32 %v2445_v47, %v4540_v8  ;;  %v2449_v15 = vpop.f32.mrb[71].mxu0  ;;  %v2490_v26 = vpop.f32.mrb[71].mxu1  ;;  %v2494_v49 = vadd.f32 %v2486_v51, %v4553_v54 }
 0xd01   :  { %v2493_v29 = vadd.f32 %v2447_v63, %v4542_v11  ;;  %v2495_v41 = vadd.f32 %v2488_v48, %v4550_v46  ;;  %v5799_v63 = vld [vmem:[%s6260_s1 + $0x48] ss:$16 sps:$4 sm:$0xff]  }
 0xd02   :  { %v3300_v18 = vmul.f32 -1.442695, %v2492_v2  ;;  %6960 = vst [vmem:[#allocation42_spill] sm:$0xff] %v5799_v63 }
 0xd03   :  { %v3301_v38 = vmul.f32 -1.442695, %v2493_v29  ;;  %v3302_v50 = vmul.f32 -1.442695, %v2495_v41  ;;  %v5806_v41 = vld [vmem:[%s6260_s1 + $0x6c] ss:$16 sps:$4 sm:$0xff]  }
 0xd04   :  { %3647 = vpow2.f32 %v3300_v18  ;;  %6961 = vst [vmem:[#allocation43_spill] sm:$0xff] %v5806_v41 }
 0xd05   :  { %3649 = vpow2.f32 %v3301_v38 }
 0xd06   :  { %3651 = vpow2.f32 %v3302_v50  ;;  %v5813_v50 = vld [vmem:[%s6260_s1 + $0x68] ss:$16 sps:$4 sm:$0xff]  }
 0xd07   :  { %3653 = vtanh.f32 %v2494_v49  ;;  %6962 = vst [vmem:[#allocation44_spill] sm:$0xff] %v5813_v50  ;;  %v5820_v49 = vld [vmem:[%s6260_s1 + $0x8c] ss:$16 sps:$4 sm:$0xff]  }
 0xd08   :  { %6963 = vst [vmem:[#allocation45_spill] sm:$0xff] %v5820_v49 }
 0xd0e   :  { %v3648_v5 = vpop.eup %3647 }
 0xd0f   :  { %v3650_v52 = vpop.eup %3649  ;;  %v2499_v6 = vadd.f32 1.0, %v3648_v5  ;;  %v5826_v5 = vld [vmem:[%s6260_s1 + $0x80] ss:$16 sps:$4 sm:$0xff]  }
 0xd10   :  { %v2505_v27 = vadd.f32 1.0, %v3650_v52  ;;  %v3652_v26 = vpop.eup %3651  ;;  %6964 = vst [vmem:[#allocation46_spill] sm:$0xff] %v5826_v5  ;;  %v5832_v52 = vld [vmem:[%s6260_s1 + $0x88] ss:$16 sps:$4 sm:$0xff]  }
 0xd11   :  { %3655 = vrcp.f32 %v2499_v6  ;;  %v3654_v15 = vpop.eup %3653  ;;  %v2512_v18 = vadd.f32 1.0, %v3652_v26  ;;  %6965 = vst [vmem:[#allocation47_spill] sm:$0xff] %v5832_v52  ;;  %v5838_v6 = vld [vmem:[%s6260_s1 + $0xa4] ss:$16 sps:$4 sm:$0xff]   ;;  %v5850_v26 = vld [vmem:[%s6260_s1 + $0xa0] ss:$16 sps:$4 sm:$0xff]  }
 0xd12   :  { %3657 = vrcp.f32 %v2505_v27  ;;  %6966 = vst [vmem:[#allocation48_spill] sm:$0xff] %v5838_v6  ;;  %v5844_v27 = vld [vmem:[%s6260_s1 + $0xac] ss:$16 sps:$4 sm:$0xff]   ;;  %6968 = vst [vmem:[#allocation50_spill] sm:$0xff] %v5850_v26 }
 0xd13   :  { %3659 = vrcp.f32 %v2512_v18  ;;  %6967 = vst [vmem:[#allocation49_spill] sm:$0xff] %v5844_v27  ;;  %v5880_v18 = vld [vmem:[%s6260_s1 + $0xc8] ss:$16 sps:$4 sm:$0xff]  }
 0xd14   :  { %6973 = vst [vmem:[#allocation29_spill] sm:$0xff] %v5880_v18 }
 0xd1b   :  { %v3656_v0 = vpop.eup %3655 }
 0xd1c   :  { %v3658_v2 = vpop.eup %3657  ;;  %v2516_v29 = vmul.f32 %v3656_v0, %v3654_v15  ;;  %v5856_v15 = vld [vmem:[%s6260_s1 + $0xa8] ss:$16 sps:$4 sm:$0xff]   ;;  %v5862_v0 = vld [vmem:[%s6260_s1 + $0xc4] ss:$16 sps:$4 sm:$0xff]  }
 0xd1d   :  { %v2515_v38 = vmul.f32 %v3658_v2, %v5552_v45  ;;  %v3660_v47 = vpop.eup %3659  ;;  %v5792_v45 = vld [vmem:[%s6260_s1 + $0x4c] ss:$16 sps:$4 sm:$0xff]   ;;  %6969 = vst [vmem:[#allocation51_spill] sm:$0xff] %v5856_v15  ;;  %6970 = vst [vmem:[#allocation52_spill] sm:$0xff] %v5862_v0 }
 0xd1e   :  { %v5868_v2 = vld [vmem:[%s6260_s1 + $0xcc] ss:$16 sps:$4 sm:$0xff]  }
 0xd1f   :  { %v5774_v48 = vadd.f32 %v2516_v29, %v2515_v38  ;;  %6971 = vst [vmem:[#allocation53_spill] sm:$0xff] %v5868_v2  ;;  %v5874_v29 = vld [vmem:[%s6260_s1 + $0xc0] ss:$16 sps:$4 sm:$0xff]   ;;  %v5886_v38 = vld [vmem:[%s6260_s1 + $0xe4] ss:$16 sps:$4 sm:$0xff]  }
 0xd20   :  { %6972 = vst [vmem:[#allocation54_spill] sm:$0xff] %v5874_v29  ;;  %6974 = vst [vmem:[#allocation24_spill] sm:$0xff] %v5886_v38 }
 0xd21   :  { %3661 = vtanh.f32 %v5774_v48 }
 0xd2b   :  { %v3662_v51 = vpop.eup %3661 }
 0xd2c   :  { %v2519_v53 = vmul.f32 %v3662_v51, %v3660_v47  ;;  %v5892_v47 = vld [vmem:[%s6260_s1 + $0xec] ss:$16 sps:$4 sm:$0xff]   ;;  %v5898_v51 = vld [vmem:[%s6260_s1 + $0xe0] ss:$16 sps:$4 sm:$0xff]  }
 0xd2d   :  { %6975 = vst [vmem:[#allocation55_spill] sm:$0xff] %v5892_v47  ;;  %6976 = vst [vmem:[#allocation56_spill] sm:$0xff] %v5898_v51 }
 0xd2e   :  { %3303 = vst [vmem:[%s6264_s5 + $0x28] sm:$0xff] %v2519_v53  ;;  %v2522_v1 = vpack.c.bf16 %v2519_v53, %v2519_v53  ;;  %v5904_v53 = vld [vmem:[%s6260_s1 + $0xe8] ss:$16 sps:$4 sm:$0xff]  }
 0xd2f   :  { %6977 = vst [vmem:[#allocation57_spill] sm:$0xff] %v5904_v53 }
 0xd30   :  { %2556 = vmatmul.mubr.bf16.vlgmr.msra.gmra.mrb[72].mxu0 %v2522_v1  ;;  %2597 = vmatmul.mubr.bf16.vlgmr.msra.gmra.mrb[72].mxu1 %v2522_v1  ;;  %v5910_v1 = vld [vmem:[%s6261_s2 + $0x4] ss:$16 sps:$4 sm:$0xff]  }
 0xd31   :  { %2613 = vmatpush1.bf16.msra.mxu0 %v5561_v56  ;;  %2654 = vmatpush1.bf16.msra.mxu1 %v5567_v28  ;;  %6978 = vst [vmem:[#allocation58_spill] sm:$0xff] %v5910_v1 }
 0xd32   :  { %2614 = vmatprep.subr.bf16.mxu0 %v5573_v30  ;;  %2655 = vmatprep.subr.bf16.mxu1 %v5579_v16 }
 0xd33   :  { %2644 = vmatprep.mubr.bf16.mxu0 %v6630_v58  ;;  %2685 = vmatprep.mubr.bf16.mxu1 %v6630_v58 }
 0xd35   :  { %2615 = vmatpush1.bf16.msra.mxu0 %v5587_v40  ;;  %2656 = vmatpush1.bf16.msra.mxu1 %v5593_v33 }
 0xd36   :  { %2616 = vmatprep.subr.bf16.mxu0 %v5599_v19  ;;  %2657 = vmatprep.subr.bf16.mxu1 %v5792_v45 }
 0xd39   :  { %2617 = vmatpush1.bf16.msra.mxu0 %v5606_v44  ;;  %2658 = vmatpush1.bf16.msra.mxu1 %v5799_v63 }
 0xd3a   :  { %2618 = vmatprep.subr.bf16.mxu0 %v5613_v57  ;;  %2659 = vmatprep.subr.bf16.mxu1 %v5806_v41 }
 0xd3d   :  { %2619 = vmatpush1.bf16.msra.mxu0 %v5620_v32  ;;  %2660 = vmatpush1.bf16.msra.mxu1 %v5813_v50 }
 0xd3e   :  { %2620 = vmatprep.subr.bf16.mxu0 %v5627_v36  ;;  %2661 = vmatprep.subr.bf16.mxu1 %v5820_v49 }
 0xd41   :  { %2621 = vmatpush1.bf16.msra.mxu0 %v5826_v5  ;;  %2662 = vmatpush1.bf16.msra.mxu1 %v5832_v52 }
 0xd42   :  { %2622 = vmatprep.subr.bf16.mxu0 %v5838_v6  ;;  %2663 = vmatprep.subr.bf16.mxu1 %v5844_v27  ;;  %v3305_v27 = vld [vmem:[%s6259_s0 + $0x68] sm:$0xff] }
 0xd43   :  { %v2611_v50 = vunpack.c.h.bf16 %v3305_v27  ;;  %v2610_v32 = vunpack.c.l.bf16 %v3305_v27 }
 0xd45   :  { %2623 = vmatpush1.bf16.msra.mxu0 %v5850_v26  ;;  %2664 = vmatpush1.bf16.msra.mxu1 %v5856_v15 }
 0xd46   :  { %2624 = vmatprep.subr.bf16.mxu0 %v5862_v0  ;;  %2665 = vmatprep.subr.bf16.mxu1 %v5868_v2 }
 0xd49   :  { %2625 = vmatpush1.bf16.msra.mxu0 %v5874_v29  ;;  %2666 = vmatpush1.bf16.msra.mxu1 %v5880_v18 }
 0xd4a   :  { %2626 = vmatprep.subr.bf16.mxu0 %v5886_v38  ;;  %2667 = vmatprep.subr.bf16.mxu1 %v5892_v47  ;;  %v5916_v47 = vld [vmem:[%s6261_s2 + $0xc] ss:$16 sps:$4 sm:$0xff]  }
 0xd4b   :  { %6979 = vst [vmem:[#allocation59_spill] sm:$0xff] %v5916_v47 }
 0xd4d   :  { %2627 = vmatpush1.bf16.msra.mxu0 %v5898_v51  ;;  %2668 = vmatpush1.bf16.msra.mxu1 %v5904_v53  ;;  %v5924_v53 = vld [vmem:[%s6261_s2] ss:$16 sps:$4 sm:$0xff]  }
 0xd4e   :  { %2723 = vmatprep.subr.bf16.mxu0 %v5910_v1  ;;  %2764 = vmatprep.subr.bf16.mxu1 %v5916_v47  ;;  %6980 = vst [vmem:[#allocation60_spill] sm:$0xff] %v5924_v53  ;;  %v5930_v1 = vld [vmem:[%s6261_s2 + $0x8] ss:$16 sps:$4 sm:$0xff]   ;;  %v5936_v47 = vld [vmem:[%s6261_s2 + $0x24] ss:$16 sps:$4 sm:$0xff]  }
 0xd4f   :  { %6981 = vst [vmem:[#allocation61_spill] sm:$0xff] %v5930_v1  ;;  %6982 = vst [vmem:[#allocation62_spill] sm:$0xff] %v5936_v47 }
 0xd50   :  { %2645 = vmatmul.mubr.bf16.vlgmr.msra.gmra.mrb[76].mxu0 %v5705_v17  ;;  %2686 = vmatmul.mubr.bf16.vlgmr.msra.gmra.mrb[76].mxu1 %v5705_v17  ;;  %v5942_v17 = vld [vmem:[%s6261_s2 + $0x2c] ss:$16 sps:$4 sm:$0xff]  }
 0xd51   :  { %2724 = vmatpush1.bf16.msra.mxu0 %v5924_v53  ;;  %2765 = vmatpush1.bf16.msra.mxu1 %v5930_v1  ;;  %6983 = vst [vmem:[#allocation63_spill] sm:$0xff] %v5942_v17  ;;  %v5950_v1 = vld [vmem:[%s6261_s2 + $0x20] ss:$16 sps:$4 sm:$0xff]   ;;  %v5968_v53 = vld [vmem:[%s6261_s2 + $0x4c] ss:$16 sps:$4 sm:$0xff]  }
 0xd52   :  { %2725 = vmatprep.subr.bf16.mxu0 %v5936_v47  ;;  %2766 = vmatprep.subr.bf16.mxu1 %v5942_v17  ;;  %6984 = vst [vmem:[#allocation64_spill] sm:$0xff] %v5950_v1  ;;  %v5956_v47 = vld [vmem:[%s6261_s2 + $0x28] ss:$16 sps:$4 sm:$0xff]   ;;  %v5962_v17 = vld [vmem:[%s6261_s2 + $0x44] ss:$16 sps:$4 sm:$0xff]   ;;  %6987 = vst [vmem:[#allocation11_spill] sm:$0xff] %v5968_v53 }
 0xd53   :  { %2755 = vmatprep.mubr.bf16.mxu0 %v6630_v58  ;;  %2796 = vmatprep.mubr.bf16.mxu1 %v6630_v58  ;;  %6985 = vst [vmem:[#allocation65_spill] sm:$0xff] %v5956_v47  ;;  %6986 = vst [vmem:[#allocation66_spill] sm:$0xff] %v5962_v17 }
 0xd55   :  { %2726 = vmatpush1.bf16.msra.mxu0 %v5950_v1  ;;  %2767 = vmatpush1.bf16.msra.mxu1 %v5956_v47  ;;  %v5974_v1 = vld [vmem:[%s6261_s2 + $0x40] ss:$16 sps:$4 sm:$0xff]   ;;  %v5980_v47 = vld [vmem:[%s6261_s2 + $0x48] ss:$16 sps:$4 sm:$0xff]  }
 0xd56   :  { %2727 = vmatprep.subr.bf16.mxu0 %v5962_v17  ;;  %2768 = vmatprep.subr.bf16.mxu1 %v5968_v53  ;;  %6988 = vst [vmem:[#allocation15_spill] sm:$0xff] %v5974_v1  ;;  %6989 = vst [vmem:[#allocation12_spill] sm:$0xff] %v5980_v47  ;;  %v5986_v17 = vld [vmem:[%s6261_s2 + $0x64] ss:$16 sps:$4 sm:$0xff]   ;;  %v5992_v53 = vld [vmem:[%s6261_s2 + $0x6c] ss:$16 sps:$4 sm:$0xff]  }
 0xd57   :  { %6990 = vst [vmem:[#allocation17_spill] sm:$0xff] %v5986_v17  ;;  %6991 = vst [vmem:[#allocation13_spill] sm:$0xff] %v5992_v53 }
 0xd59   :  { %2728 = vmatpush1.bf16.msra.mxu0 %v5974_v1  ;;  %2769 = vmatpush1.bf16.msra.mxu1 %v5980_v47  ;;  %v5998_v1 = vld [vmem:[%s6261_s2 + $0x60] ss:$16 sps:$4 sm:$0xff]   ;;  %v6004_v47 = vld [vmem:[%s6261_s2 + $0x68] ss:$16 sps:$4 sm:$0xff]  }
 0xd5a   :  { %2729 = vmatprep.subr.bf16.mxu0 %v5986_v17  ;;  %2770 = vmatprep.subr.bf16.mxu1 %v5992_v53  ;;  %6992 = vst [vmem:[#allocation18_spill] sm:$0xff] %v5998_v1  ;;  %6993 = vst [vmem:[#allocation14_spill] sm:$0xff] %v6004_v47  ;;  %v6010_v17 = vld [vmem:[%s6261_s2 + $0x84] ss:$16 sps:$4 sm:$0xff]   ;;  %v6016_v53 = vld [vmem:[%s6261_s2 + $0x8c] ss:$16 sps:$4 sm:$0xff]  }
 0xd5b   :  { %6994 = vst [vmem:[#allocation21_spill] sm:$0xff] %v6010_v17  ;;  %6995 = vst [vmem:[#allocation16_spill] sm:$0xff] %v6016_v53 }
 0xd5d   :  { %2730 = vmatpush1.bf16.msra.mxu0 %v5998_v1  ;;  %2771 = vmatpush1.bf16.msra.mxu1 %v6004_v47  ;;  %v6022_v1 = vld [vmem:[%s6261_s2 + $0x80] ss:$16 sps:$4 sm:$0xff]   ;;  %v6028_v47 = vld [vmem:[%s6261_s2 + $0x88] ss:$16 sps:$4 sm:$0xff]  }
 0xd5e   :  { %2731 = vmatprep.subr.bf16.mxu0 %v6010_v17  ;;  %2772 = vmatprep.subr.bf16.mxu1 %v6016_v53  ;;  %6996 = vst [vmem:[#allocation67_spill] sm:$0xff] %v6022_v1  ;;  %6997 = vst [vmem:[#allocation68_spill] sm:$0xff] %v6028_v47  ;;  %v6034_v17 = vld [vmem:[%s6261_s2 + $0xa4] ss:$16 sps:$4 sm:$0xff]   ;;  %v6040_v53 = vld [vmem:[%s6261_s2 + $0xac] ss:$16 sps:$4 sm:$0xff]  }
 0xd5f   :  { %6998 = vst [vmem:[#allocation69_spill] sm:$0xff] %v6034_v17  ;;  %6999 = vst [vmem:[#allocation70_spill] sm:$0xff] %v6040_v53 }
 0xd61   :  { %2732 = vmatpush1.bf16.msra.mxu0 %v6022_v1  ;;  %2773 = vmatpush1.bf16.msra.mxu1 %v6028_v47  ;;  %v6046_v1 = vld [vmem:[%s6261_s2 + $0xa0] ss:$16 sps:$4 sm:$0xff]   ;;  %v6052_v47 = vld [vmem:[%s6261_s2 + $0xa8] ss:$16 sps:$4 sm:$0xff]  }
 0xd62   :  { %2733 = vmatprep.subr.bf16.mxu0 %v6034_v17  ;;  %2774 = vmatprep.subr.bf16.mxu1 %v6040_v53  ;;  %7000 = vst [vmem:[#allocation71_spill] sm:$0xff] %v6046_v1  ;;  %7001 = vst [vmem:[#allocation72_spill] sm:$0xff] %v6052_v47  ;;  %v6058_v17 = vld [vmem:[%s6261_s2 + $0xc4] ss:$16 sps:$4 sm:$0xff]   ;;  %v6064_v53 = vld [vmem:[%s6261_s2 + $0xcc] ss:$16 sps:$4 sm:$0xff]  }
 0xd63   :  { %7002 = vst [vmem:[#allocation73_spill] sm:$0xff] %v6058_v17  ;;  %7003 = vst [vmem:[#allocation30_spill] sm:$0xff] %v6064_v53 }
 0xd65   :  { %2734 = vmatpush1.bf16.msra.mxu0 %v6046_v1  ;;  %2775 = vmatpush1.bf16.msra.mxu1 %v6052_v47  ;;  %v6070_v1 = vld [vmem:[%s6261_s2 + $0xc0] ss:$16 sps:$4 sm:$0xff]   ;;  %v6076_v47 = vld [vmem:[%s6261_s2 + $0xc8] ss:$16 sps:$4 sm:$0xff]  }
 0xd66   :  { %2735 = vmatprep.subr.bf16.mxu0 %v6058_v17  ;;  %2776 = vmatprep.subr.bf16.mxu1 %v6064_v53  ;;  %7004 = vst [vmem:[#allocation22_spill] sm:$0xff] %v6070_v1  ;;  %7005 = vst [vmem:[#allocation27_spill] sm:$0xff] %v6076_v47  ;;  %v6082_v17 = vld [vmem:[%s6261_s2 + $0xe4] ss:$16 sps:$4 sm:$0xff]   ;;  %v6088_v53 = vld [vmem:[%s6261_s2 + $0xec] ss:$16 sps:$4 sm:$0xff]  }
 0xd67   :  { %7006 = vst [vmem:[#allocation19_spill] sm:$0xff] %v6082_v17  ;;  %7007 = vst [vmem:[#allocation32_spill] sm:$0xff] %v6088_v53 }
 0xd69   :  { %2736 = vmatpush1.bf16.msra.mxu0 %v6070_v1  ;;  %2777 = vmatpush1.bf16.msra.mxu1 %v6076_v47  ;;  %v6094_v1 = vld [vmem:[%s6261_s2 + $0xe0] ss:$16 sps:$4 sm:$0xff]   ;;  %v6100_v47 = vld [vmem:[%s6261_s2 + $0xe8] ss:$16 sps:$4 sm:$0xff]  }
 0xd6a   :  { %2737 = vmatprep.subr.bf16.mxu0 %v6082_v17  ;;  %2778 = vmatprep.subr.bf16.mxu1 %v6088_v53  ;;  %7008 = vst [vmem:[#allocation28_spill] sm:$0xff] %v6094_v1  ;;  %7009 = vst [vmem:[#allocation33_spill] sm:$0xff] %v6100_v47 }
 0xd6d   :  { %2738 = vmatpush1.bf16.msra.mxu0 %v6094_v1  ;;  %2779 = vmatpush1.bf16.msra.mxu1 %v6100_v47  ;;  %v3304_v47 = vld [vmem:[%s6259_s0 + $0x60] sm:$0xff] }
 0xd6e   :  { %2836 = vmatprep.subr.bf16.mxu0 %v5681_v34  ;;  %2877 = vmatprep.subr.bf16.mxu1 %v5684_v43  ;;  %v2608_v0 = vunpack.c.l.bf16 %v3304_v47  ;;  %v2609_v34 = vunpack.c.h.bf16 %v3304_v47 }
 0xe03   :  { %v6105_v17 = vpop.f32.mrb[72].mxu0  ;;  %v6107_v53 = vpop.f32.mrb[72].mxu1 }
 0xe04   :  { %v6109_v51 = vpop.f32.mrb[73].mxu0  ;;  %v6111_v38 = vpop.f32.mrb[73].mxu1 }
 0xe05   :  { %v2561_v1 = vpop.f32.mrb[74].mxu0  ;;  %v2602_v18 = vpop.f32.mrb[74].mxu1 }
 0xe06   :  { %v2562_v29 = vpop.f32.mrb[75].mxu0  ;;  %v2603_v2 = vpop.f32.mrb[75].mxu1 }
 0xe23   :  { %v2646_v15 = vpop.f32.mrb[76].mxu0  ;;  %v2687_v43 = vpop.f32.mrb[76].mxu1 }
 0xe24   :  { %v2694_v26 = vadd.f32 %v2646_v15, %v2608_v0  ;;  %v2648_v6 = vpop.f32.mrb[77].mxu0  ;;  %v2689_v52 = vpop.f32.mrb[77].mxu1  ;;  %v2696_v15 = vadd.f32 %v2687_v43, %v2610_v32 }
 0xe25   :  { %v2695_v5 = vadd.f32 %v2648_v6, %v2609_v34  ;;  %v2650_v1 = vpop.f32.mrb[78].mxu0  ;;  %v2691_v18 = vpop.f32.mrb[78].mxu1  ;;  %v2697_v47 = vadd.f32 %v2689_v52, %v2611_v50 }
 0xe26   :  { %v3306_v29 = vmul.f32 -1.442695, %v2694_v26  ;;  %v2651_v2 = vpop.f32.mrb[79].mxu0  ;;  %v2692_v49 = vpop.f32.mrb[79].mxu1 }
 0xe27   :  { %v3307_v36 = vmul.f32 -1.442695, %v2695_v5  ;;  %v3308_v41 = vmul.f32 -1.442695, %v2697_v47 }
 0xe28   :  { %3663 = vpow2.f32 %v3306_v29 }
 0xe29   :  { %3665 = vpow2.f32 %v3307_v36 }
 0xe2a   :  { %3667 = vpow2.f32 %v3308_v41 }
 0xe2b   :  { %3669 = vtanh.f32 %v2696_v15 }
 0xe32   :  { %v3664_v0 = vpop.eup %3663 }
 0xe33   :  { %v3666_v57 = vpop.eup %3665  ;;  %v2701_v63 = vadd.f32 1.0, %v3664_v0 }
 0xe34   :  { %v2707_v44 = vadd.f32 1.0, %v3666_v57  ;;  %v3668_v6 = vpop.eup %3667 }
 0xe35   :  { %3671 = vrcp.f32 %v2701_v63  ;;  %v3670_v26 = vpop.eup %3669  ;;  %v2714_v1 = vadd.f32 1.0, %v3668_v6 }
 0xe36   :  { %3673 = vrcp.f32 %v2707_v44 }
 0xe37   :  { %3675 = vrcp.f32 %v2714_v1 }
 0xe3f   :  { %v3672_v34 = vpop.eup %3671 }
 0xe40   :  { %v3674_v49 = vpop.eup %3673  ;;  %v2718_v5 = vmul.f32 %v3672_v34, %v3670_v26 }
 0xe41   :  { %v2717_v36 = vmul.f32 %v3674_v49, %v5702_v3  ;;  %v3676_v32 = vpop.eup %3675 }
 0xe43   :  { %v6120_v50 = vadd.f32 %v2718_v5, %v2717_v36  ;;  %v7024_v36 = vld [vmem:[#allocation44_spill] sm:$0xff] }
 0xe45   :  { %3677 = vtanh.f32 %v6120_v50 }
 0xe4f   :  { %v3678_v52 = vpop.eup %3677 }
 0xe50   :  { %v2721_v41 = vmul.f32 %v3678_v52, %v3676_v32  ;;  %v7025_v32 = vld [vmem:[#allocation37_spill] sm:$0xff] }
 0xe51   :  { %v7030_v52 = vld [vmem:[#allocation49_spill] sm:$0xff] }
 0xe52   :  { %v6123_v27 = vpack.c.bf16 %v2721_v41, %v2721_v41  ;;  %v7031_v41 = vld [vmem:[#allocation50_spill] sm:$0xff] }
 0xe54   :  { %2756 = vmatmul.mubr.bf16.vlgmr.msra.gmra.mrb[80].mxu0 %v6123_v27  ;;  %2797 = vmatmul.mubr.bf16.vlgmr.msra.gmra.mrb[80].mxu1 %v6123_v27 }
 0xe55   :  { %2837 = vmatpush1.bf16.msra.mxu0 %v5461_v25  ;;  %2878 = vmatpush1.bf16.msra.mxu1 %v5464_v59  ;;  %v7010_v25 = vld [vmem:[#allocation23_spill] sm:$0xff]  ;;  %v7011_v59 = vld [vmem:[#allocation25_spill] sm:$0xff] }
 0xe56   :  { %2838 = vmatprep.subr.bf16.mxu0 %v5467_v35  ;;  %2879 = vmatprep.subr.bf16.mxu1 %v5470_v39  ;;  %v7012_v35 = vld [vmem:[#allocation38_spill] sm:$0xff]  ;;  %v7013_v39 = vld [vmem:[#allocation35_spill] sm:$0xff] }
 0xe57   :  { %2868 = vmatprep.mubr.bf16.mxu0 %v6630_v58  ;;  %2909 = vmatprep.mubr.bf16.mxu1 %v6630_v58 }
 0xe59   :  { %2839 = vmatpush1.bf16.msra.mxu0 %v5475_v10  ;;  %2880 = vmatpush1.bf16.msra.mxu1 %v5478_v42  ;;  %v7014_v10 = vld [vmem:[#allocation9_spill] sm:$0xff]  ;;  %v7015_v42 = vld [vmem:[#allocation10_spill] sm:$0xff] }
 0xe5a   :  { %2840 = vmatprep.subr.bf16.mxu0 %v5481_v62  ;;  %2881 = vmatprep.subr.bf16.mxu1 %v5484_v31  ;;  %v7016_v62 = vld [vmem:[#allocation39_spill] sm:$0xff]  ;;  %v7017_v31 = vld [vmem:[#allocation40_spill] sm:$0xff] }
 0xe5d   :  { %2841 = vmatpush1.bf16.msra.mxu0 %v5487_v37  ;;  %2882 = vmatpush1.bf16.msra.mxu1 %v5490_v13  ;;  %v7018_v37 = vld [vmem:[#allocation41_spill] sm:$0xff] }
 0xe5e   :  { %2842 = vmatprep.subr.bf16.mxu0 %v5493_v7  ;;  %2883 = vmatprep.subr.bf16.mxu1 %v5496_v55 }
 0xe61   :  { %2843 = vmatpush1.bf16.msra.mxu0 %v5499_v4  ;;  %2884 = vmatpush1.bf16.msra.mxu1 %v6942_v14 }
 0xe62   :  { %2844 = vmatprep.subr.bf16.mxu0 %v6943_v60  ;;  %2885 = vmatprep.subr.bf16.mxu1 %v6944_v20 }
 0xe65   :  { %2845 = vmatpush1.bf16.msra.mxu0 %v6945_v21  ;;  %2886 = vmatpush1.bf16.msra.mxu1 %v6946_v22 }
 0xe66   :  { %2846 = vmatprep.subr.bf16.mxu0 %v6947_v23  ;;  %2887 = vmatprep.subr.bf16.mxu1 %v6948_v24 }
 0xe69   :  { %2847 = vmatpush1.bf16.msra.mxu0 %v6949_v9  ;;  %2888 = vmatpush1.bf16.msra.mxu1 %v5732_v61 }
 0xe6a   :  { %2848 = vmatprep.subr.bf16.mxu0 %v6950_v12  ;;  %2889 = vmatprep.subr.bf16.mxu1 %v7010_v25  ;;  %v7032_v25 = vld [vmem:[#allocation51_spill] sm:$0xff] }
 0xe6d   :  { %2849 = vmatpush1.bf16.msra.mxu0 %v7011_v59  ;;  %2890 = vmatpush1.bf16.msra.mxu1 %v7012_v35  ;;  %v7033_v59 = vld [vmem:[#allocation52_spill] sm:$0xff]  ;;  %v7034_v35 = vld [vmem:[#allocation53_spill] sm:$0xff] }
 0xe6e   :  { %2850 = vmatprep.subr.bf16.mxu0 %v7013_v39  ;;  %2891 = vmatprep.subr.bf16.mxu1 %v7014_v10  ;;  %v7035_v39 = vld [vmem:[#allocation54_spill] sm:$0xff]  ;;  %v7036_v10 = vld [vmem:[#allocation29_spill] sm:$0xff] }
 0xe71   :  { %2851 = vmatpush1.bf16.msra.mxu0 %v7015_v42  ;;  %2892 = vmatpush1.bf16.msra.mxu1 %v7016_v62  ;;  %v7037_v42 = vld [vmem:[#allocation24_spill] sm:$0xff]  ;;  %v7038_v62 = vld [vmem:[#allocation55_spill] sm:$0xff] }
 0xe72   :  { %2925 = vmatprep.subr.bf16.mxu0 %v7017_v31  ;;  %2966 = vmatprep.subr.bf16.mxu1 %v7018_v37  ;;  %v7039_v31 = vld [vmem:[#allocation56_spill] sm:$0xff]  ;;  %v7040_v37 = vld [vmem:[#allocation57_spill] sm:$0xff] }
 0xf27   :  { %v2757_v13 = vpop.f32.mrb[80].mxu0  ;;  %v2798_v7 = vpop.f32.mrb[80].mxu1 }
 0xf28   :  { %v2758_v55 = vadd.f32 %v2757_v13, %v6105_v17  ;;  %v2799_v4 = vadd.f32 %v2798_v7, %v6107_v53  ;;  %v2759_v44 = vpop.f32.mrb[81].mxu0  ;;  %v2800_v57 = vpop.f32.mrb[81].mxu1  ;;  %v7041_v13 = vld [vmem:[#allocation58_spill] sm:$0xff]  ;;  %v7042_v7 = vld [vmem:[#allocation59_spill] sm:$0xff] }
 0xf29   :  { %v2760_v3 = vadd.f32 %v2759_v44, %v6109_v51  ;;  %v2801_v14 = vadd.f32 %v2800_v57, %v6111_v38  ;;  %v2761_v60 = vpop.f32.mrb[82].mxu0  ;;  %v2802_v20 = vpop.f32.mrb[82].mxu1  ;;  %v7045_v44 = vld [vmem:[#allocation62_spill] sm:$0xff]  ;;  %v7046_v57 = vld [vmem:[#allocation63_spill] sm:$0xff] }
 0xf2a   :  { %v2805_v21 = vadd.f32 %v2758_v55, %v4540_v8  ;;  %v2762_v22 = vpop.f32.mrb[83].mxu0  ;;  %v2803_v23 = vpop.f32.mrb[83].mxu1  ;;  %v2807_v53 = vadd.f32 %v2799_v4, %v4553_v54  ;;  %v7043_v55 = vld [vmem:[#allocation60_spill] sm:$0xff]  ;;  %v7044_v4 = vld [vmem:[#allocation61_spill] sm:$0xff]  ;;  %v7049_v60 = vld [vmem:[#allocation66_spill] sm:$0xff] }
 0xf2b   :  { %v2806_v24 = vadd.f32 %v2760_v3, %v4542_v11  ;;  %v2808_v12 = vadd.f32 %v2801_v14, %v4550_v46  ;;  %v7047_v3 = vld [vmem:[#allocation64_spill] sm:$0xff]  ;;  %v7048_v14 = vld [vmem:[#allocation65_spill] sm:$0xff]  ;;  %v7050_v20 = vld [vmem:[#allocation11_spill] sm:$0xff] }
 0xf2c   :  { %v3309_v9 = vmul.f32 -1.442695, %v2805_v21  ;;  %v7052_v21 = vld [vmem:[#allocation12_spill] sm:$0xff]  ;;  %v7053_v22 = vld [vmem:[#allocation17_spill] sm:$0xff] }
 0xf2d   :  { %v3310_v61 = vmul.f32 -1.442695, %v2806_v24  ;;  %v3311_v63 = vmul.f32 -1.442695, %v2808_v12  ;;  %v7054_v23 = vld [vmem:[#allocation13_spill] sm:$0xff]  ;;  %v7055_v24 = vld [vmem:[#allocation18_spill] sm:$0xff] }
 0xf2e   :  { %3679 = vpow2.f32 %v3309_v9  ;;  %v7056_v9 = vld [vmem:[#allocation14_spill] sm:$0xff]  ;;  %v7059_v12 = vld [vmem:[#allocation67_spill] sm:$0xff] }
 0xf2f   :  { %3681 = vpow2.f32 %v3310_v61  ;;  %v7058_v61 = vld [vmem:[#allocation16_spill] sm:$0xff] }
 0xf30   :  { %3683 = vpow2.f32 %v3311_v63  ;;  %v7060_v63 = vld [vmem:[#allocation68_spill] sm:$0xff] }
 0xf31   :  { %3685 = vtanh.f32 %v2807_v53  ;;  %v7061_v53 = vld [vmem:[#allocation69_spill] sm:$0xff] }
 0xf38   :  { %v3680_v51 = vpop.eup %3679 }
 0xf39   :  { %v3682_v17 = vpop.eup %3681  ;;  %v2812_v38 = vadd.f32 1.0, %v3680_v51  ;;  %v7062_v51 = vld [vmem:[#allocation70_spill] sm:$0xff] }
 0xf3a   :  { %v2818_v43 = vadd.f32 1.0, %v3682_v17  ;;  %v3684_v18 = vpop.eup %3683  ;;  %v7063_v17 = vld [vmem:[#allocation71_spill] sm:$0xff] }
 0xf3b   :  { %3687 = vrcp.f32 %v2812_v38  ;;  %v3686_v29 = vpop.eup %3685  ;;  %v2825_v0 = vadd.f32 1.0, %v3684_v18  ;;  %v7064_v38 = vld [vmem:[#allocation72_spill] sm:$0xff]  ;;  %v7066_v18 = vld [vmem:[#allocation30_spill] sm:$0xff] }
 0xf3c   :  { %3689 = vrcp.f32 %v2818_v43  ;;  %v7065_v43 = vld [vmem:[#allocation73_spill] sm:$0xff] }
 0xf3d   :  { %3691 = vrcp.f32 %v2825_v0  ;;  %v7071_v0 = vld [vmem:[#allocation28_spill] sm:$0xff] }
 0xf45   :  { %v3688_v2 = vpop.eup %3687 }
 0xf46   :  { %v3690_v47 = vpop.eup %3689  ;;  %v2829_v15 = vmul.f32 %v3688_v2, %v3686_v29  ;;  %v7067_v29 = vld [vmem:[#allocation22_spill] sm:$0xff]  ;;  %v7068_v2 = vld [vmem:[#allocation27_spill] sm:$0xff] }
 0xf47   :  { %v2828_v6 = vmul.f32 %v3690_v47, %v5774_v48  ;;  %v3692_v34 = vpop.eup %3691  ;;  %v7019_v48 = vld [vmem:[#allocation20_spill] sm:$0xff]  ;;  %v7069_v47 = vld [vmem:[#allocation19_spill] sm:$0xff] }
 0xf49   :  { %v6170_v26 = vadd.f32 %v2829_v15, %v2828_v6  ;;  %v7070_v15 = vld [vmem:[#allocation32_spill] sm:$0xff]  ;;  %v7072_v6 = vld [vmem:[#allocation33_spill] sm:$0xff] }
 0xf4b   :  { %3693 = vtanh.f32 %v6170_v26 }
 0xf55   :  { %v3694_v49 = vpop.eup %3693 }
 0xf56   :  { %v2832_v5 = vmul.f32 %v3694_v49, %v3692_v34 }
 0xf58   :  { %3312 = vst [vmem:[%s6264_s5 + $0x30] sm:$0xff] %v2832_v5  ;;  %v2835_v1 = vpack.c.bf16 %v2832_v5, %v2832_v5 }
 0xf5a   :  { %2869 = vmatmul.mubr.bf16.vlgmr.msra.gmra.mrb[84].mxu0 %v2835_v1  ;;  %2910 = vmatmul.mubr.bf16.vlgmr.msra.gmra.mrb[84].mxu1 %v2835_v1 }
 0xf5b   :  { %2926 = vmatpush1.bf16.msra.mxu0 %v5561_v56  ;;  %2967 = vmatpush1.bf16.msra.mxu1 %v5567_v28  ;;  %v7020_v56 = vld [vmem:[#allocation42_spill] sm:$0xff]  ;;  %v7021_v28 = vld [vmem:[#allocation36_spill] sm:$0xff] }
 0xf5c   :  { %2927 = vmatprep.subr.bf16.mxu0 %v5573_v30  ;;  %2968 = vmatprep.subr.bf16.mxu1 %v5579_v16  ;;  %v7022_v30 = vld [vmem:[#allocation43_spill] sm:$0xff]  ;;  %v7023_v16 = vld [vmem:[#allocation26_spill] sm:$0xff] }
 0xf5d   :  { %2957 = vmatprep.mubr.bf16.mxu0 %v6630_v58  ;;  %2998 = vmatprep.mubr.bf16.mxu1 %v6630_v58 }
 0xf5f   :  { %2928 = vmatpush1.bf16.msra.mxu0 %v5587_v40  ;;  %2969 = vmatpush1.bf16.msra.mxu1 %v5593_v33  ;;  %v7026_v40 = vld [vmem:[#allocation45_spill] sm:$0xff]  ;;  %v7027_v33 = vld [vmem:[#allocation46_spill] sm:$0xff] }
 0xf60   :  { %2929 = vmatprep.subr.bf16.mxu0 %v5599_v19  ;;  %2970 = vmatprep.subr.bf16.mxu1 %v5792_v45  ;;  %v7028_v19 = vld [vmem:[#allocation47_spill] sm:$0xff]  ;;  %v7029_v45 = vld [vmem:[#allocation48_spill] sm:$0xff] }
 0xf63   :  { %2930 = vmatpush1.bf16.msra.mxu0 %v7019_v48  ;;  %2971 = vmatpush1.bf16.msra.mxu1 %v7020_v56 }
 0xf64   :  { %2931 = vmatprep.subr.bf16.mxu0 %v7021_v28  ;;  %2972 = vmatprep.subr.bf16.mxu1 %v7022_v30 }
 0xf67   :  { %2932 = vmatpush1.bf16.msra.mxu0 %v7023_v16  ;;  %2973 = vmatpush1.bf16.msra.mxu1 %v7024_v36  ;;  %v3313_v16 = vld [vmem:[%s6259_s0 + $0x70] sm:$0xff] }
 0xf68   :  { %2933 = vmatprep.subr.bf16.mxu0 %v7025_v32  ;;  %2974 = vmatprep.subr.bf16.mxu1 %v7026_v40  ;;  %v2921_v36 = vunpack.c.l.bf16 %v3313_v16  ;;  %v2922_v32 = vunpack.c.h.bf16 %v3313_v16 }
 0xf6b   :  { %2934 = vmatpush1.bf16.msra.mxu0 %v7027_v33  ;;  %2975 = vmatpush1.bf16.msra.mxu1 %v7028_v19 }
 0xf6c   :  { %2935 = vmatprep.subr.bf16.mxu0 %v7029_v45  ;;  %2976 = vmatprep.subr.bf16.mxu1 %v7030_v52  ;;  %v3314_v45 = vld [vmem:[%s6259_s0 + $0x78] sm:$0xff] }
 0xf6f   :  { %2936 = vmatpush1.bf16.msra.mxu0 %v7031_v41  ;;  %2977 = vmatpush1.bf16.msra.mxu1 %v7032_v25 }
 0xf70   :  { %2937 = vmatprep.subr.bf16.mxu0 %v7033_v59  ;;  %2978 = vmatprep.subr.bf16.mxu1 %v7034_v35 }
 0xf73   :  { %2938 = vmatpush1.bf16.msra.mxu0 %v7035_v39  ;;  %2979 = vmatpush1.bf16.msra.mxu1 %v7036_v10 }
 0xf74   :  { %2939 = vmatprep.subr.bf16.mxu0 %v7037_v42  ;;  %2980 = vmatprep.subr.bf16.mxu1 %v7038_v62 }
 0xf77   :  { %2940 = vmatpush1.bf16.msra.mxu0 %v7039_v31  ;;  %2981 = vmatpush1.bf16.msra.mxu1 %v7040_v37  ;;  %v2924_v31 = vunpack.c.h.bf16 %v3314_v45 }
 0xf78   :  { %3036 = vmatprep.subr.bf16.mxu0 %v7041_v13  ;;  %3077 = vmatprep.subr.bf16.mxu1 %v7042_v7  ;;  %v2923_v13 = vunpack.c.l.bf16 %v3314_v45 }
 0xf7a   :  { %2958 = vmatmul.mubr.bf16.vlgmr.msra.gmra.mrb[88].mxu0 %v6123_v27  ;;  %2999 = vmatmul.mubr.bf16.vlgmr.msra.gmra.mrb[88].mxu1 %v6123_v27  ;;  %v7051_v27 = vld [vmem:[#allocation15_spill] sm:$0xff] }
 0xf7b   :  { %3037 = vmatpush1.bf16.msra.mxu0 %v7043_v55  ;;  %3078 = vmatpush1.bf16.msra.mxu1 %v7044_v4 }
 0xf7c   :  { %3038 = vmatprep.subr.bf16.mxu0 %v7045_v44  ;;  %3079 = vmatprep.subr.bf16.mxu1 %v7046_v57 }
 0xf7d   :  { %3068 = vmatprep.mubr.bf16.mxu0 %v6630_v58  ;;  %3109 = vmatprep.mubr.bf16.mxu1 %v6630_v58  ;;  %v7057_v58 = vld [vmem:[#allocation21_spill] sm:$0xff] }
 0xf7f   :  { %3039 = vmatpush1.bf16.msra.mxu0 %v7047_v3  ;;  %3080 = vmatpush1.bf16.msra.mxu1 %v7048_v14 }
 0xf80   :  { %3040 = vmatprep.subr.bf16.mxu0 %v7049_v60  ;;  %3081 = vmatprep.subr.bf16.mxu1 %v7050_v20 }
 0xf83   :  { %3041 = vmatpush1.bf16.msra.mxu0 %v7051_v27  ;;  %3082 = vmatpush1.bf16.msra.mxu1 %v7052_v21 }
 0xf84   :  { %3042 = vmatprep.subr.bf16.mxu0 %v7053_v22  ;;  %3083 = vmatprep.subr.bf16.mxu1 %v7054_v23 }
 0xf87   :  { %3043 = vmatpush1.bf16.msra.mxu0 %v7055_v24  ;;  %3084 = vmatpush1.bf16.msra.mxu1 %v7056_v9 }
 0xf88   :  { %3044 = vmatprep.subr.bf16.mxu0 %v7057_v58  ;;  %3085 = vmatprep.subr.bf16.mxu1 %v7058_v61 }
 0xf8b   :  { %3045 = vmatpush1.bf16.msra.mxu0 %v7059_v12  ;;  %3086 = vmatpush1.bf16.msra.mxu1 %v7060_v63 }
 0xf8c   :  { %3046 = vmatprep.subr.bf16.mxu0 %v7061_v53  ;;  %3087 = vmatprep.subr.bf16.mxu1 %v7062_v51 }
 0xf8f   :  { %3047 = vmatpush1.bf16.msra.mxu0 %v7063_v17  ;;  %3088 = vmatpush1.bf16.msra.mxu1 %v7064_v38 }
 0xf90   :  { %3048 = vmatprep.subr.bf16.mxu0 %v7065_v43  ;;  %3089 = vmatprep.subr.bf16.mxu1 %v7066_v18 }
 0xf93   :  { %3049 = vmatpush1.bf16.msra.mxu0 %v7067_v29  ;;  %3090 = vmatpush1.bf16.msra.mxu1 %v7068_v2 }
 0xf94   :  { %3050 = vmatprep.subr.bf16.mxu0 %v7069_v47  ;;  %3091 = vmatprep.subr.bf16.mxu1 %v7070_v15 }
 0xf97   :  { %3051 = vmatpush1.bf16.msra.mxu0 %v7071_v0  ;;  %3092 = vmatpush1.bf16.msra.mxu1 %v7072_v6 }
0x102d   :  { %v2870_v34 = vpop.f32.mrb[84].mxu0  ;;  %v2911_v49 = vpop.f32.mrb[84].mxu1 }
0x102e   :  { %v2872_v5 = vpop.f32.mrb[85].mxu0  ;;  %v2913_v1 = vpop.f32.mrb[85].mxu1 }
0x102f   :  { %v2874_v48 = vpop.f32.mrb[86].mxu0  ;;  %v2915_v56 = vpop.f32.mrb[86].mxu1 }
0x1030   :  { %v2875_v28 = vpop.f32.mrb[87].mxu0  ;;  %v2916_v30 = vpop.f32.mrb[87].mxu1 }
0x104d   :  { %v2959_v40 = vpop.f32.mrb[88].mxu0  ;;  %v3000_v33 = vpop.f32.mrb[88].mxu1 }
0x104e   :  { %v3007_v19 = vadd.f32 %v2959_v40, %v2921_v36  ;;  %v2961_v52 = vpop.f32.mrb[89].mxu0  ;;  %v3002_v41 = vpop.f32.mrb[89].mxu1  ;;  %v3009_v55 = vadd.f32 %v3000_v33, %v2923_v13 }
0x104f   :  { %v3008_v25 = vadd.f32 %v2961_v52, %v2922_v32  ;;  %v2963_v59 = vpop.f32.mrb[90].mxu0  ;;  %v3004_v35 = vpop.f32.mrb[90].mxu1  ;;  %v3010_v37 = vadd.f32 %v3002_v41, %v2924_v31 }
0x1050   :  { %v3315_v39 = vmul.f32 -1.442695, %v3007_v19  ;;  %v2964_v10 = vpop.f32.mrb[91].mxu0  ;;  %v3005_v42 = vpop.f32.mrb[91].mxu1 }
0x1051   :  { %v3316_v62 = vmul.f32 -1.442695, %v3008_v25  ;;  %v3317_v7 = vmul.f32 -1.442695, %v3010_v37 }
0x1052   :  { %3695 = vpow2.f32 %v3315_v39 }
0x1053   :  { %3697 = vpow2.f32 %v3316_v62 }
0x1054   :  { %3699 = vpow2.f32 %v3317_v7 }
0x1055   :  { %3701 = vtanh.f32 %v3009_v55 }
0x105c   :  { %v3696_v4 = vpop.eup %3695 }
0x105d   :  { %v3698_v44 = vpop.eup %3697  ;;  %v3014_v57 = vadd.f32 1.0, %v3696_v4 }
0x105e   :  { %v3020_v3 = vadd.f32 1.0, %v3698_v44  ;;  %v3700_v14 = vpop.eup %3699 }
0x105f   :  { %3703 = vrcp.f32 %v3014_v57  ;;  %v3702_v60 = vpop.eup %3701  ;;  %v3027_v22 = vadd.f32 1.0, %v3700_v14 }
0x1060   :  { %3705 = vrcp.f32 %v3020_v3 }
0x1061   :  { %3707 = vrcp.f32 %v3027_v22 }
0x1069   :  { %v3704_v20 = vpop.eup %3703 }
0x106a   :  { %v3706_v27 = vpop.eup %3705  ;;  %v3031_v21 = vmul.f32 %v3704_v20, %v3702_v60 }
0x106b   :  { %v3030_v23 = vmul.f32 %v3706_v27, %v6120_v50  ;;  %v3708_v9 = vpop.eup %3707 }
0x106d   :  { %v3032_v24 = vadd.f32 %v3031_v21, %v3030_v23 }
0x106f   :  { %3709 = vtanh.f32 %v3032_v24 }
0x1079   :  { %v3710_v58 = vpop.eup %3709 }
0x107a   :  { %v3034_v61 = vmul.f32 %v3710_v58, %v3708_v9 }
0x107c   :  { %v3035_v12 = vpack.c.bf16 %v3034_v61, %v3034_v61 }
0x107e   :  { %3069 = vmatmul.mubr.bf16.vlgmr.msra.gmra.mrb[92].mxu0 %v3035_v12  ;;  %3110 = vmatmul.mubr.bf16.vlgmr.msra.gmra.mrb[92].mxu1 %v3035_v12 }
0x1151   :  { %v3070_v63 = vpop.f32.mrb[92].mxu0  ;;  %v3111_v53 = vpop.f32.mrb[92].mxu1 }
0x1152   :  { %v3071_v51 = vadd.f32 %v3070_v63, %v2870_v34  ;;  %v3112_v17 = vadd.f32 %v3111_v53, %v2911_v49  ;;  %v3072_v38 = vpop.f32.mrb[93].mxu0  ;;  %v3113_v43 = vpop.f32.mrb[93].mxu1 }
0x1153   :  { %v3073_v18 = vadd.f32 %v3072_v38, %v2872_v5  ;;  %v3114_v29 = vadd.f32 %v3113_v43, %v2913_v1  ;;  %v3074_v2 = vpop.f32.mrb[94].mxu0  ;;  %v3115_v47 = vpop.f32.mrb[94].mxu1 }
0x1154   :  { %v3118_v50 = vadd.f32 %v3071_v51, %v4540_v8  ;;  %v3075_v15 = vpop.f32.mrb[95].mxu0  ;;  %v3116_v0 = vpop.f32.mrb[95].mxu1  ;;  %v3120_v49 = vadd.f32 %v3112_v17, %v4553_v54 }
0x1155   :  { %v3119_v6 = vadd.f32 %v3073_v18, %v4542_v11  ;;  %v3121_v28 = vadd.f32 %v3114_v29, %v4550_v46 }
0x1156   :  { %v3318_v48 = vmul.f32 -1.442695, %v3118_v50 }
0x1157   :  { %v3319_v56 = vmul.f32 -1.442695, %v3119_v6  ;;  %v3320_v34 = vmul.f32 -1.442695, %v3121_v28 }
0x1158   :  { %3711 = vpow2.f32 %v3318_v48 }
0x1159   :  { %3713 = vpow2.f32 %v3319_v56 }
0x115a   :  { %3715 = vpow2.f32 %v3320_v34 }
0x115b   :  { %3717 = vtanh.f32 %v3120_v49 }
0x1162   :  { %v3712_v30 = vpop.eup %3711 }
0x1163   :  { %v3714_v5 = vpop.eup %3713  ;;  %v3125_v1 = vadd.f32 1.0, %v3712_v30 }
0x1164   :  { %v3131_v16 = vadd.f32 1.0, %v3714_v5  ;;  %v3716_v8 = vpop.eup %3715 }
0x1165   :  { %3719 = vrcp.f32 %v3125_v1  ;;  %v3718_v36 = vpop.eup %3717  ;;  %v3138_v33 = vadd.f32 1.0, %v3716_v8 }
0x1166   :  { %3721 = vrcp.f32 %v3131_v16 }
0x1167   :  { %3723 = vrcp.f32 %v3138_v33 }
0x116f   :  { %v3720_v11 = vpop.eup %3719 }
0x1170   :  { %v3722_v32 = vpop.eup %3721  ;;  %v3142_v40 = vmul.f32 %v3720_v11, %v3718_v36 }
0x1171   :  { %v3141_v19 = vmul.f32 %v3722_v32, %v6170_v26  ;;  %v3724_v54 = vpop.eup %3723 }
0x1173   :  { %v3143_v46 = vadd.f32 %v3142_v40, %v3141_v19 }
0x1175   :  { %3725 = vtanh.f32 %v3143_v46 }
0x117f   :  { %v3726_v45 = vpop.eup %3725 }
0x1180   :  { %v3145_v52 = vmul.f32 %v3726_v45, %v3724_v54 }
0x1182   :  { %3321 = vst [vmem:[%s6264_s5 + $0x38] sm:$0xff] %v3145_v52 }
0x1183   :  { %3156 = vsyncpa [#allocation7], 1 }

</bundles_post_ra>
